<compile_context>
chip_gen: v7x
topology: tpu7x:2x2x1
jax: 0.10.0
libtpu: 0.0.40
codegen_flags: <defaults>
</compile_context>

<pallas_src>
import functools

import jax
import jax.numpy as jnp
from jax import lax
from jax.experimental import pallas as pl
from jax.experimental.pallas import tpu as pltpu

# nn.PReLU() default init.  The PyTorch module shares ONE PReLU instance (single
# alpha) across every RCB because it is a default argument of RCB.__init__.
# TODO(synk): plumb a learned alpha from a checkpoint instead of the init constant.
PRELU_ALPHA = 0.25

N_CONV3 = 14  # 7 RCBs x 2 conv3x3 each


# ----------------------------------------------------------------------------
# Fused fractIn4 kernel (one batch element per grid step)
# ----------------------------------------------------------------------------
def _fract_in4_kernel(x_ref, w3_ref, b3_ref, w1_ref, b1_ref, o_ref,
                      zbuf_ref, col_ref, cat_ref, *, C, H, W, alpha):
    HW = H * W
    PAD = W + 1  # zero padding (in flat pixels) on each end of zbuf

    # Zero the padded flat scratch once; only the interior is rewritten per conv,
    # so the pad regions stay zero for the whole kernel.
    zbuf_ref[...] = jnp.zeros(zbuf_ref.shape, zbuf_ref.dtype)

    # Per-column validity masks for the horizontal taps.  Vertical out-of-bounds
    # is already handled by the zero pad rows of zbuf.
    col_idx = lax.broadcasted_iota(jnp.int32, (1, HW), 1) % W
    wvalid = {dx: (col_idx + dx >= 0) & (col_idx + dx < W) for dx in (-1, 1)}

    taps = [(dy, dx) for dy in (-1, 0, 1) for dx in (-1, 0, 1)]

    def conv3(a, idx, prelu):
        # a: [C, HW] f32  ->  [C, HW] f32   (3x3 'same' conv + bias [+ PReLU])
        zbuf_ref[:, PAD:PAD + HW] = a
        for t, (dy, dx) in enumerate(taps):
            start = PAD + dy * W + dx                  # static offset in [0, 2W+2]
            shifted = zbuf_ref[:, start:start + HW]    # shifted lane-slice load
            if dx != 0:
                shifted = jnp.where(wvalid[dx], shifted, 0.0)
            col_ref[t * C:(t + 1) * C, :] = shifted    # build im2col stack [9C, HW]
        y = jnp.dot(w3_ref[idx], col_ref[...],
                    preferred_element_type=jnp.float32) + b3_ref[idx]
        if prelu:
            y = jnp.maximum(y, 0.0) + alpha * jnp.minimum(y, 0.0)
        return y

    def rcb(a, i):
        # res = conv(PReLU(conv(a))) ; res += a
        t = conv3(a, 2 * i, prelu=True)
        return conv3(t, 2 * i + 1, prelu=False) + a

    x = x_ref[0].astype(jnp.float32)                   # [C, HW]

    # ---- fractIn2 #1 on x (RCBs 0, 1, 2) ----
    r1 = rcb(rcb(x, 0), 1)
    o1 = rcb(x, 2)
    cat_ref[0:C, :] = r1                               # torch.cat([res, out], dim=1)
    cat_ref[C:2 * C, :] = o1

    # ---- join: 1x1 conv (2C -> C) ----
    j = jnp.dot(w1_ref[...], cat_ref[...],
                preferred_element_type=jnp.float32) + b1_ref[...]

    # ---- fractIn2 #2 on join output (RCBs 3, 4, 5) ----
    r2 = rcb(rcb(j, 3), 4)
    o2 = rcb(j, 5)

    # ---- fractIn4.fract3 on x (RCB 6) ----
    o3 = rcb(x, 6)

    # ---- final torch.cat([fract2(join), fract3(x)], dim=1) via channel slices ----
    o_ref[0, 0:C, :] = r2.astype(o_ref.dtype)
    o_ref[0, C:2 * C, :] = o2.astype(o_ref.dtype)
    o_ref[0, 2 * C:3 * C, :] = o3.astype(o_ref.dtype)


# ----------------------------------------------------------------------------
# Wrapper
# ----------------------------------------------------------------------------
def _pack_conv3_weights(conv3_w):
    # [N, Cout, Cin, 3, 3] (PyTorch OIHW) -> [N, Cout, 9*Cin], tap-major (ky, kx),
    # channel-minor, matching the kernel's im2col row order.
    n, co, ci, kh, kw = conv3_w.shape
    return jnp.transpose(conv3_w, (0, 1, 3, 4, 2)).reshape(n, co, kh * kw * ci)


def fract_in4_forward(params, x_nchw):
    """fractIn4 forward.  x: [B, C, H, W] (NCHW) -> [B, 3*C, H, W]."""
    B, C, H, W = x_nchw.shape
    HW = H * W

    x = x_nchw.reshape(B, C, HW)                          # NCHW -> [B, C, H*W] (free)
    w3 = _pack_conv3_weights(params["conv3_w"])           # [14, C, 9C]
    b3 = params["conv3_b"].reshape(N_CONV3, C, 1)         # [14, C, 1]
    w1 = params["join_w"]                                 # [C, 2C]
    b1 = params["join_b"].reshape(C, 1)                   # [C, 1]

    kernel = functools.partial(_fract_in4_kernel, C=C, H=H, W=W,
                               alpha=float(PRELU_ALPHA))

    out = pl.pallas_call(
        kernel,
        out_shape=jax.ShapeDtypeStruct((B, 3 * C, HW), x.dtype),
        grid=(B,),
        in_specs=[
            pl.BlockSpec((1, C, HW), lambda i: (i, 0, 0)),
            pl.BlockSpec((N_CONV3, C, 9 * C), lambda i: (0, 0, 0)),
            pl.BlockSpec((N_CONV3, C, 1), lambda i: (0, 0, 0)),
            pl.BlockSpec((C, 2 * C), lambda i: (0, 0)),
            pl.BlockSpec((C, 1), lambda i: (0, 0)),
        ],
        out_specs=pl.BlockSpec((1, 3 * C, HW), lambda i: (i, 0, 0)),
        scratch_shapes=[
            pltpu.VMEM((C, HW + 2 * (W + 1)), jnp.float32),   # zero-padded flat activation
            pltpu.VMEM((9 * C, HW), jnp.float32),             # im2col stack
            pltpu.VMEM((2 * C, HW), jnp.float32),             # concat buffer for the join
        ],
        compiler_params=pltpu.CompilerParams(
            dimension_semantics=("parallel",)),
    )(x, w3, b3, w1, b1)

    # TODO(synk): for real EDSR sizes (C=64, large H*W) add a spatial grid axis with
    # 1-row halos so tiles fit v7x's 64 MiB VMEM and both TensorCores stay busy at B=1.
    return out.reshape(B, 3 * C, H, W)


# ----------------------------------------------------------------------------
# Pure-JAX reference (for correctness check only)
# ----------------------------------------------------------------------------
def _conv3x3_ref(x, w, b):
    y = lax.conv_general_dilated(
        x, w, window_strides=(1, 1), padding=((1, 1), (1, 1)),
        dimension_numbers=("NCHW", "OIHW", "NCHW"),
        precision=lax.Precision.HIGHEST)
    return y + b.reshape(1, -1, 1, 1)


def _prelu(x, a):
    return jnp.maximum(x, 0.0) + a * jnp.minimum(x, 0.0)


def fract_in4_reference(params, x):
    w3, b3 = params["conv3_w"], params["conv3_b"]

    def rcb(a, i):
        t = _prelu(_conv3x3_ref(a, w3[2 * i], b3[2 * i]), PRELU_ALPHA)
        return _conv3x3_ref(t, w3[2 * i + 1], b3[2 * i + 1]) + a

    r1 = rcb(rcb(x, 0), 1)
    o1 = rcb(x, 2)
    cat = jnp.concatenate([r1, o1], axis=1)
    j = jnp.einsum("oc,bchw->bohw", params["join_w"], cat,
                   precision=lax.Precision.HIGHEST) \
        + params["join_b"].reshape(1, -1, 1, 1)
    r2 = rcb(rcb(j, 3), 4)
    o2 = rcb(j, 5)
    o3 = rcb(x, 6)
    return jnp.concatenate([r2, o2, o3], axis=1)


# ----------------------------------------------------------------------------
# Deterministic parameters
# ----------------------------------------------------------------------------
def make_params(key, C):
    k = jax.random.split(key, 4)
    return {
        "conv3_w": 0.05 * jax.random.normal(k[0], (N_CONV3, C, C, 3, 3), jnp.float32),
        "conv3_b": 0.01 * jax.random.normal(k[1], (N_CONV3, C), jnp.float32),
        "join_w": 0.05 * jax.random.normal(k[2], (C, 2 * C), jnp.float32),
        "join_b": 0.01 * jax.random.normal(k[3], (C,), jnp.float32),
    }


# ----------------------------------------------------------------------------
if __name__ == "__main__":
    B, C, H, W = 2, 4, 16, 16   # n_feats = 4, kernel_size = 3

    key = jax.random.PRNGKey(0)
    kx, kp = jax.random.split(key)
    x = jax.random.normal(kx, (B, C, H, W), jnp.float32)   # NCHW like PyTorch
    params = make_params(kp, C)

    fwd = jax.jit(fract_in4_forward)
    out = fwd(params, x)
    jax.block_until_ready(out)

    assert out.shape == (B, 3 * C, H, W), out.shape
    assert bool(jnp.all(jnp.isfinite(out)))

    ref = fract_in4_reference(params, x)
    err = float(jnp.max(jnp.abs(out - ref)))
    assert err < 1e-3, f"mismatch vs reference: max abs err = {err}"

    print("KERNEL_OK")
</pallas_src>

<mosaic_0001>
module attributes {stable_mosaic.version = 11 : i64} {
  func.func @_fract_in4_kernel(%arg0: i32, %arg1: memref<1x4x256xf32, #tpu.memory_space<vmem>>, %arg2: memref<14x4x36xf32, #tpu.memory_space<vmem>>, %arg3: memref<14x4x1xf32, #tpu.memory_space<vmem>>, %arg4: memref<4x8xf32, #tpu.memory_space<vmem>>, %arg5: memref<4x1xf32, #tpu.memory_space<vmem>>, %arg6: memref<1x12x256xf32, #tpu.memory_space<vmem>>, %arg7: memref<4x290xf32, #tpu.memory_space<vmem>>, %arg8: memref<36x256xf32, #tpu.memory_space<vmem>>, %arg9: memref<8x256xf32, #tpu.memory_space<vmem>>) attributes {dimension_semantics = [#tpu.dimension_semantics<parallel>], iteration_bounds = array<i64: 2>, scalar_prefetch = 0 : i64, scratch_operands = 3 : i64, tpu.core_type = #tpu.core_type<tc>, window_params = [{transform_indices = @transform_0, window_bounds = array<i64: 1, 4, 256>}, {pipeline_mode = #tpu.pipeline_mode<synchronous>, transform_indices = @transform_1, window_bounds = array<i64: 14, 4, 36>}, {pipeline_mode = #tpu.pipeline_mode<synchronous>, transform_indices = @transform_2, window_bounds = array<i64: 14, 4, 1>}, {pipeline_mode = #tpu.pipeline_mode<synchronous>, transform_indices = @transform_3, window_bounds = array<i64: 4, 8>}, {pipeline_mode = #tpu.pipeline_mode<synchronous>, transform_indices = @transform_4, window_bounds = array<i64: 4, 1>}, {transform_indices = @transform_5, window_bounds = array<i64: 1, 12, 256>}]} {
    %cst = arith.constant 0.000000e+00 : f32
    %0 = vector.broadcast %cst : f32 to vector<4x290xf32>
    %c0 = arith.constant 0 : index
    %c0_0 = arith.constant 0 : index
    %1 = vector.load %arg7[%c0, %c0_0] : memref<4x290xf32, #tpu.memory_space<vmem>>, vector<4x290xf32>
    tpu.vector_store %arg7[%c0, %c0_0], %0 {strides = array<i32>} : memref<4x290xf32, #tpu.memory_space<vmem>>, vector<4x290xf32>,
    %2 = tpu.iota {dimensions = array<i32: 1>} : vector<1x256xi32>
    %c16_i32 = arith.constant 16 : i32
    %c0_i32 = arith.constant 0 : i32
    %3 = arith.cmpi eq, %c16_i32, %c0_i32 : i32
    %c1_i32 = arith.constant 1 : i32
    %4 = arith.select %3, %c1_i32, %c16_i32 : i32
    %5 = vector.broadcast %4 : i32 to vector<1x256xi32>
    %6 = arith.remsi %2, %5 : vector<1x256xi32>
    %c0_i32_1 = arith.constant 0 : i32
    %7 = vector.broadcast %c0_i32_1 : i32 to vector<1x256xi32>
    %8 = arith.cmpi ne, %6, %7 : vector<1x256xi32>
    %c0_i32_2 = arith.constant 0 : i32
    %9 = vector.broadcast %c0_i32_2 : i32 to vector<1x256xi32>
    %10 = arith.cmpi slt, %6, %9 : vector<1x256xi32>
    %c0_i32_3 = arith.constant 0 : i32
    %11 = arith.cmpi slt, %4, %c0_i32_3 : i32
    %12 = vector.broadcast %11 : i1 to vector<1x256xi1>
    %13 = vector.broadcast %12 : vector<1x256xi1> to vector<1x256xi1>
    %14 = arith.xori %10, %13 : vector<1x256xi1>
    %15 = arith.andi %14, %8 : vector<1x256xi1>
    %16 = vector.broadcast %4 : i32 to vector<1x256xi32>
    %17 = arith.addi %6, %16 : vector<1x256xi32>
    %18 = arith.select %15, %17, %6 : vector<1x256xi1>, vector<1x256xi32>
    %c-1_i32 = arith.constant -1 : i32
    %19 = vector.broadcast %c-1_i32 : i32 to vector<1x256xi32>
    %20 = arith.addi %18, %19 : vector<1x256xi32>
    %c0_i32_4 = arith.constant 0 : i32
    %21 = vector.broadcast %c0_i32_4 : i32 to vector<1x256xi32>
    %22 = arith.cmpi sge, %20, %21 : vector<1x256xi32>
    %c-1_i32_5 = arith.constant -1 : i32
    %23 = vector.broadcast %c-1_i32_5 : i32 to vector<1x256xi32>
    %24 = arith.addi %18, %23 : vector<1x256xi32>
    %c16_i32_6 = arith.constant 16 : i32
    %25 = vector.broadcast %c16_i32_6 : i32 to vector<1x256xi32>
    %26 = arith.cmpi slt, %24, %25 : vector<1x256xi32>
    %27 = arith.andi %22, %26 : vector<1x256xi1>
    %c1_i32_7 = arith.constant 1 : i32
    %28 = vector.broadcast %c1_i32_7 : i32 to vector<1x256xi32>
    %29 = arith.addi %18, %28 : vector<1x256xi32>
    %c0_i32_8 = arith.constant 0 : i32
    %30 = vector.broadcast %c0_i32_8 : i32 to vector<1x256xi32>
    %31 = arith.cmpi sge, %29, %30 : vector<1x256xi32>
    %c1_i32_9 = arith.constant 1 : i32
    %32 = vector.broadcast %c1_i32_9 : i32 to vector<1x256xi32>
    %33 = arith.addi %18, %32 : vector<1x256xi32>
    %c16_i32_10 = arith.constant 16 : i32
    %34 = vector.broadcast %c16_i32_10 : i32 to vector<1x256xi32>
    %35 = arith.cmpi slt, %33, %34 : vector<1x256xi32>
    %36 = arith.andi %31, %35 : vector<1x256xi1>
    %c0_11 = arith.constant 0 : index
    %c0_12 = arith.constant 0 : index
    %c0_13 = arith.constant 0 : index
    %37 = vector.load %arg1[%c0_11, %c0_12, %c0_13] : memref<1x4x256xf32, #tpu.memory_space<vmem>>, vector<1x4x256xf32>
    %38 = vector.shape_cast %37 : vector<1x4x256xf32> to vector<4x256xf32>
    %c0_14 = arith.constant 0 : index
    %c17 = arith.constant 17 : index
    %39 = vector.load %arg7[%c0_14, %c17] : memref<4x290xf32, #tpu.memory_space<vmem>>, vector<4x256xf32>
    tpu.vector_store %arg7[%c0_14, %c17], %38 {strides = array<i32>} : memref<4x290xf32, #tpu.memory_space<vmem>>, vector<4x256xf32>,
    %c0_15 = arith.constant 0 : index
    %c0_16 = arith.constant 0 : index
    %40 = vector.load %arg7[%c0_15, %c0_16] : memref<4x290xf32, #tpu.memory_space<vmem>>, vector<4x256xf32>
    %cst_17 = arith.constant 0.000000e+00 : f32
    %41 = vector.shape_cast %27 : vector<1x256xi1> to vector<1x256xi1>
    %42 = vector.broadcast %41 : vector<1x256xi1> to vector<4x256xi1>
    %43 = vector.broadcast %cst_17 : f32 to vector<4x256xf32>
    %44 = arith.select %42, %40, %43 : vector<4x256xi1>, vector<4x256xf32>
    %c0_18 = arith.constant 0 : index
    %c0_19 = arith.constant 0 : index
    %45 = vector.load %arg8[%c0_18, %c0_19] : memref<36x256xf32, #tpu.memory_space<vmem>>, vector<4x256xf32>
    tpu.vector_store %arg8[%c0_18, %c0_19], %44 {strides = array<i32>} : memref<36x256xf32, #tpu.memory_space<vmem>>, vector<4x256xf32>,
    %c0_20 = arith.constant 0 : index
    %c1 = arith.constant 1 : index
    %46 = vector.load %arg7[%c0_20, %c1] : memref<4x290xf32, #tpu.memory_space<vmem>>, vector<4x256xf32>
    %c4 = arith.constant 4 : index
    %c0_21 = arith.constant 0 : index
    %47 = vector.load %arg8[%c4, %c0_21] : memref<36x256xf32, #tpu.memory_space<vmem>>, vector<4x256xf32>
    tpu.vector_store %arg8[%c4, %c0_21], %46 {strides = array<i32>} : memref<36x256xf32, #tpu.memory_space<vmem>>, vector<4x256xf32>,
    %c0_22 = arith.constant 0 : index
    %c2 = arith.constant 2 : index
    %48 = vector.load %arg7[%c0_22, %c2] : memref<4x290xf32, #tpu.memory_space<vmem>>, vector<4x256xf32>
    %cst_23 = arith.constant 0.000000e+00 : f32
    %49 = vector.shape_cast %36 : vector<1x256xi1> to vector<1x256xi1>
    %50 = vector.broadcast %49 : vector<1x256xi1> to vector<4x256xi1>
    %51 = vector.broadcast %cst_23 : f32 to vector<4x256xf32>
    %52 = arith.select %50, %48, %51 : vector<4x256xi1>, vector<4x256xf32>
    %c8 = arith.constant 8 : index
    %c0_24 = arith.constant 0 : index
    %53 = vector.load %arg8[%c8, %c0_24] : memref<36x256xf32, #tpu.memory_space<vmem>>, vector<4x256xf32>
    tpu.vector_store %arg8[%c8, %c0_24], %52 {strides = array<i32>} : memref<36x256xf32, #tpu.memory_space<vmem>>, vector<4x256xf32>,
    %c0_25 = arith.constant 0 : index
    %c16 = arith.constant 16 : index
    %54 = vector.load %arg7[%c0_25, %c16] : memref<4x290xf32, #tpu.memory_space<vmem>>, vector<4x256xf32>
    %cst_26 = arith.constant 0.000000e+00 : f32
    %55 = vector.shape_cast %27 : vector<1x256xi1> to vector<1x256xi1>
    %56 = vector.broadcast %55 : vector<1x256xi1> to vector<4x256xi1>
    %57 = vector.broadcast %cst_26 : f32 to vector<4x256xf32>
    %58 = arith.select %56, %54, %57 : vector<4x256xi1>, vector<4x256xf32>
    %c12 = arith.constant 12 : index
    %c0_27 = arith.constant 0 : index
    %59 = vector.load %arg8[%c12, %c0_27] : memref<36x256xf32, #tpu.memory_space<vmem>>, vector<4x256xf32>
    tpu.vector_store %arg8[%c12, %c0_27], %58 {strides = array<i32>} : memref<36x256xf32, #tpu.memory_space<vmem>>, vector<4x256xf32>,
    %c0_28 = arith.constant 0 : index
    %c17_29 = arith.constant 17 : index
    %60 = vector.load %arg7[%c0_28, %c17_29] : memref<4x290xf32, #tpu.memory_space<vmem>>, vector<4x256xf32>
    %c16_30 = arith.constant 16 : index
    %c0_31 = arith.constant 0 : index
    %61 = vector.load %arg8[%c16_30, %c0_31] : memref<36x256xf32, #tpu.memory_space<vmem>>, vector<4x256xf32>
    tpu.vector_store %arg8[%c16_30, %c0_31], %60 {strides = array<i32>} : memref<36x256xf32, #tpu.memory_space<vmem>>, vector<4x256xf32>,
    %c0_32 = arith.constant 0 : index
    %c18 = arith.constant 18 : index
    %62 = vector.load %arg7[%c0_32, %c18] : memref<4x290xf32, #tpu.memory_space<vmem>>, vector<4x256xf32>
    %cst_33 = arith.constant 0.000000e+00 : f32
    %63 = vector.shape_cast %36 : vector<1x256xi1> to vector<1x256xi1>
    %64 = vector.broadcast %63 : vector<1x256xi1> to vector<4x256xi1>
    %65 = vector.broadcast %cst_33 : f32 to vector<4x256xf32>
    %66 = arith.select %64, %62, %65 : vector<4x256xi1>, vector<4x256xf32>
    %c20 = arith.constant 20 : index
    %c0_34 = arith.constant 0 : index
    %67 = vector.load %arg8[%c20, %c0_34] : memref<36x256xf32, #tpu.memory_space<vmem>>, vector<4x256xf32>
    tpu.vector_store %arg8[%c20, %c0_34], %66 {strides = array<i32>} : memref<36x256xf32, #tpu.memory_space<vmem>>, vector<4x256xf32>,
    %c0_35 = arith.constant 0 : index
    %c32 = arith.constant 32 : index
    %68 = vector.load %arg7[%c0_35, %c32] : memref<4x290xf32, #tpu.memory_space<vmem>>, vector<4x256xf32>
    %cst_36 = arith.constant 0.000000e+00 : f32
    %69 = vector.shape_cast %27 : vector<1x256xi1> to vector<1x256xi1>
    %70 = vector.broadcast %69 : vector<1x256xi1> to vector<4x256xi1>
    %71 = vector.broadcast %cst_36 : f32 to vector<4x256xf32>
    %72 = arith.select %70, %68, %71 : vector<4x256xi1>, vector<4x256xf32>
    %c24 = arith.constant 24 : index
    %c0_37 = arith.constant 0 : index
    %73 = vector.load %arg8[%c24, %c0_37] : memref<36x256xf32, #tpu.memory_space<vmem>>, vector<4x256xf32>
    tpu.vector_store %arg8[%c24, %c0_37], %72 {strides = array<i32>} : memref<36x256xf32, #tpu.memory_space<vmem>>, vector<4x256xf32>,
    %c0_38 = arith.constant 0 : index
    %c33 = arith.constant 33 : index
    %74 = vector.load %arg7[%c0_38, %c33] : memref<4x290xf32, #tpu.memory_space<vmem>>, vector<4x256xf32>
    %c28 = arith.constant 28 : index
    %c0_39 = arith.constant 0 : index
    %75 = vector.load %arg8[%c28, %c0_39] : memref<36x256xf32, #tpu.memory_space<vmem>>, vector<4x256xf32>
    tpu.vector_store %arg8[%c28, %c0_39], %74 {strides = array<i32>} : memref<36x256xf32, #tpu.memory_space<vmem>>, vector<4x256xf32>,
    %c0_40 = arith.constant 0 : index
    %c34 = arith.constant 34 : index
    %76 = vector.load %arg7[%c0_40, %c34] : memref<4x290xf32, #tpu.memory_space<vmem>>, vector<4x256xf32>
    %cst_41 = arith.constant 0.000000e+00 : f32
    %77 = vector.shape_cast %36 : vector<1x256xi1> to vector<1x256xi1>
    %78 = vector.broadcast %77 : vector<1x256xi1> to vector<4x256xi1>
    %79 = vector.broadcast %cst_41 : f32 to vector<4x256xf32>
    %80 = arith.select %78, %76, %79 : vector<4x256xi1>, vector<4x256xf32>
    %c32_42 = arith.constant 32 : index
    %c0_43 = arith.constant 0 : index
    %81 = vector.load %arg8[%c32_42, %c0_43] : memref<36x256xf32, #tpu.memory_space<vmem>>, vector<4x256xf32>
    tpu.vector_store %arg8[%c32_42, %c0_43], %80 {strides = array<i32>} : memref<36x256xf32, #tpu.memory_space<vmem>>, vector<4x256xf32>,
    %c0_44 = arith.constant 0 : index
    %c0_45 = arith.constant 0 : index
    %c0_46 = arith.constant 0 : index
    %82 = vector.load %arg2[%c0_44, %c0_45, %c0_46] : memref<14x4x36xf32, #tpu.memory_space<vmem>>, vector<1x4x36xf32>
    %83 = vector.shape_cast %82 : vector<1x4x36xf32> to vector<4x36xf32>
    %c0_47 = arith.constant 0 : index
    %c0_48 = arith.constant 0 : index
    %84 = vector.load %arg8[%c0_47, %c0_48] : memref<36x256xf32, #tpu.memory_space<vmem>>, vector<36x256xf32>
    %cst_49 = arith.constant dense<0.000000e+00> : vector<4x256xf32>
    %85 = tpu.matmul %83, %84, %cst_49 {dimension_numbers = #tpu.dot_dimension_numbers<[1], [0], [0], [1], [0, 0, 1, 1], [], []>} : vector<4x36xf32>, vector<36x256xf32>, vector<4x256xf32> -> vector<4x256xf32>
    %c0_50 = arith.constant 0 : index
    %c0_51 = arith.constant 0 : index
    %c0_52 = arith.constant 0 : index
    %86 = vector.load %arg3[%c0_50, %c0_51, %c0_52] : memref<14x4x1xf32, #tpu.memory_space<vmem>>, vector<1x4x1xf32>
    %87 = vector.shape_cast %86 : vector<1x4x1xf32> to vector<4x1xf32>
    %88 = vector.broadcast %87 : vector<4x1xf32> to vector<4x256xf32>
    %89 = arith.addf %85, %88 : vector<4x256xf32>
    %cst_53 = arith.constant 0.000000e+00 : f32
    %90 = vector.broadcast %cst_53 : f32 to vector<4x256xf32>
    %91 = arith.maximumf %89, %90 : vector<4x256xf32>
    %cst_54 = arith.constant 0.000000e+00 : f32
    %92 = vector.broadcast %cst_54 : f32 to vector<4x256xf32>
    %93 = arith.minimumf %89, %92 : vector<4x256xf32>
    %cst_55 = arith.constant 2.500000e-01 : f32
    %94 = vector.broadcast %cst_55 : f32 to vector<4x256xf32>
    %95 = arith.mulf %94, %93 : vector<4x256xf32>
    %96 = arith.addf %91, %95 : vector<4x256xf32>
    %c0_56 = arith.constant 0 : index
    %c17_57 = arith.constant 17 : index
    %97 = vector.load %arg7[%c0_56, %c17_57] : memref<4x290xf32, #tpu.memory_space<vmem>>, vector<4x256xf32>
    tpu.vector_store %arg7[%c0_56, %c17_57], %96 {strides = array<i32>} : memref<4x290xf32, #tpu.memory_space<vmem>>, vector<4x256xf32>,
    %c0_58 = arith.constant 0 : index
    %c0_59 = arith.constant 0 : index
    %98 = vector.load %arg7[%c0_58, %c0_59] : memref<4x290xf32, #tpu.memory_space<vmem>>, vector<4x256xf32>
    %cst_60 = arith.constant 0.000000e+00 : f32
    %99 = vector.shape_cast %27 : vector<1x256xi1> to vector<1x256xi1>
    %100 = vector.broadcast %99 : vector<1x256xi1> to vector<4x256xi1>
    %101 = vector.broadcast %cst_60 : f32 to vector<4x256xf32>
    %102 = arith.select %100, %98, %101 : vector<4x256xi1>, vector<4x256xf32>
    %c0_61 = arith.constant 0 : index
    %c0_62 = arith.constant 0 : index
    %103 = vector.load %arg8[%c0_61, %c0_62] : memref<36x256xf32, #tpu.memory_space<vmem>>, vector<4x256xf32>
    tpu.vector_store %arg8[%c0_61, %c0_62], %102 {strides = array<i32>} : memref<36x256xf32, #tpu.memory_space<vmem>>, vector<4x256xf32>,
    %c0_63 = arith.constant 0 : index
    %c1_64 = arith.constant 1 : index
    %104 = vector.load %arg7[%c0_63, %c1_64] : memref<4x290xf32, #tpu.memory_space<vmem>>, vector<4x256xf32>
    %c4_65 = arith.constant 4 : index
    %c0_66 = arith.constant 0 : index
    %105 = vector.load %arg8[%c4_65, %c0_66] : memref<36x256xf32, #tpu.memory_space<vmem>>, vector<4x256xf32>
    tpu.vector_store %arg8[%c4_65, %c0_66], %104 {strides = array<i32>} : memref<36x256xf32, #tpu.memory_space<vmem>>, vector<4x256xf32>,
    %c0_67 = arith.constant 0 : index
    %c2_68 = arith.constant 2 : index
    %106 = vector.load %arg7[%c0_67, %c2_68] : memref<4x290xf32, #tpu.memory_space<vmem>>, vector<4x256xf32>
    %cst_69 = arith.constant 0.000000e+00 : f32
    %107 = vector.shape_cast %36 : vector<1x256xi1> to vector<1x256xi1>
    %108 = vector.broadcast %107 : vector<1x256xi1> to vector<4x256xi1>
    %109 = vector.broadcast %cst_69 : f32 to vector<4x256xf32>
    %110 = arith.select %108, %106, %109 : vector<4x256xi1>, vector<4x256xf32>
    %c8_70 = arith.constant 8 : index
    %c0_71 = arith.constant 0 : index
    %111 = vector.load %arg8[%c8_70, %c0_71] : memref<36x256xf32, #tpu.memory_space<vmem>>, vector<4x256xf32>
    tpu.vector_store %arg8[%c8_70, %c0_71], %110 {strides = array<i32>} : memref<36x256xf32, #tpu.memory_space<vmem>>, vector<4x256xf32>,
    %c0_72 = arith.constant 0 : index
    %c16_73 = arith.constant 16 : index
    %112 = vector.load %arg7[%c0_72, %c16_73] : memref<4x290xf32, #tpu.memory_space<vmem>>, vector<4x256xf32>
    %cst_74 = arith.constant 0.000000e+00 : f32
    %113 = vector.shape_cast %27 : vector<1x256xi1> to vector<1x256xi1>
    %114 = vector.broadcast %113 : vector<1x256xi1> to vector<4x256xi1>
    %115 = vector.broadcast %cst_74 : f32 to vector<4x256xf32>
    %116 = arith.select %114, %112, %115 : vector<4x256xi1>, vector<4x256xf32>
    %c12_75 = arith.constant 12 : index
    %c0_76 = arith.constant 0 : index
    %117 = vector.load %arg8[%c12_75, %c0_76] : memref<36x256xf32, #tpu.memory_space<vmem>>, vector<4x256xf32>
    tpu.vector_store %arg8[%c12_75, %c0_76], %116 {strides = array<i32>} : memref<36x256xf32, #tpu.memory_space<vmem>>, vector<4x256xf32>,
    %c0_77 = arith.constant 0 : index
    %c17_78 = arith.constant 17 : index
    %118 = vector.load %arg7[%c0_77, %c17_78] : memref<4x290xf32, #tpu.memory_space<vmem>>, vector<4x256xf32>
    %c16_79 = arith.constant 16 : index
    %c0_80 = arith.constant 0 : index
    %119 = vector.load %arg8[%c16_79, %c0_80] : memref<36x256xf32, #tpu.memory_space<vmem>>, vector<4x256xf32>
    tpu.vector_store %arg8[%c16_79, %c0_80], %118 {strides = array<i32>} : memref<36x256xf32, #tpu.memory_space<vmem>>, vector<4x256xf32>,
    %c0_81 = arith.constant 0 : index
    %c18_82 = arith.constant 18 : index
    %120 = vector.load %arg7[%c0_81, %c18_82] : memref<4x290xf32, #tpu.memory_space<vmem>>, vector<4x256xf32>
    %cst_83 = arith.constant 0.000000e+00 : f32
    %121 = vector.shape_cast %36 : vector<1x256xi1> to vector<1x256xi1>
    %122 = vector.broadcast %121 : vector<1x256xi1> to vector<4x256xi1>
    %123 = vector.broadcast %cst_83 : f32 to vector<4x256xf32>
    %124 = arith.select %122, %120, %123 : vector<4x256xi1>, vector<4x256xf32>
    %c20_84 = arith.constant 20 : index
    %c0_85 = arith.constant 0 : index
    %125 = vector.load %arg8[%c20_84, %c0_85] : memref<36x256xf32, #tpu.memory_space<vmem>>, vector<4x256xf32>
    tpu.vector_store %arg8[%c20_84, %c0_85], %124 {strides = array<i32>} : memref<36x256xf32, #tpu.memory_space<vmem>>, vector<4x256xf32>,
    %c0_86 = arith.constant 0 : index
    %c32_87 = arith.constant 32 : index
    %126 = vector.load %arg7[%c0_86, %c32_87] : memref<4x290xf32, #tpu.memory_space<vmem>>, vector<4x256xf32>
    %cst_88 = arith.constant 0.000000e+00 : f32
    %127 = vector.shape_cast %27 : vector<1x256xi1> to vector<1x256xi1>
    %128 = vector.broadcast %127 : vector<1x256xi1> to vector<4x256xi1>
    %129 = vector.broadcast %cst_88 : f32 to vector<4x256xf32>
    %130 = arith.select %128, %126, %129 : vector<4x256xi1>, vector<4x256xf32>
    %c24_89 = arith.constant 24 : index
    %c0_90 = arith.constant 0 : index
    %131 = vector.load %arg8[%c24_89, %c0_90] : memref<36x256xf32, #tpu.memory_space<vmem>>, vector<4x256xf32>
    tpu.vector_store %arg8[%c24_89, %c0_90], %130 {strides = array<i32>} : memref<36x256xf32, #tpu.memory_space<vmem>>, vector<4x256xf32>,
    %c0_91 = arith.constant 0 : index
    %c33_92 = arith.constant 33 : index
    %132 = vector.load %arg7[%c0_91, %c33_92] : memref<4x290xf32, #tpu.memory_space<vmem>>, vector<4x256xf32>
    %c28_93 = arith.constant 28 : index
    %c0_94 = arith.constant 0 : index
    %133 = vector.load %arg8[%c28_93, %c0_94] : memref<36x256xf32, #tpu.memory_space<vmem>>, vector<4x256xf32>
    tpu.vector_store %arg8[%c28_93, %c0_94], %132 {strides = array<i32>} : memref<36x256xf32, #tpu.memory_space<vmem>>, vector<4x256xf32>,
    %c0_95 = arith.constant 0 : index
    %c34_96 = arith.constant 34 : index
    %134 = vector.load %arg7[%c0_95, %c34_96] : memref<4x290xf32, #tpu.memory_space<vmem>>, vector<4x256xf32>
    %cst_97 = arith.constant 0.000000e+00 : f32
    %135 = vector.shape_cast %36 : vector<1x256xi1> to vector<1x256xi1>
    %136 = vector.broadcast %135 : vector<1x256xi1> to vector<4x256xi1>
    %137 = vector.broadcast %cst_97 : f32 to vector<4x256xf32>
    %138 = arith.select %136, %134, %137 : vector<4x256xi1>, vector<4x256xf32>
    %c32_98 = arith.constant 32 : index
    %c0_99 = arith.constant 0 : index
    %139 = vector.load %arg8[%c32_98, %c0_99] : memref<36x256xf32, #tpu.memory_space<vmem>>, vector<4x256xf32>
    tpu.vector_store %arg8[%c32_98, %c0_99], %138 {strides = array<i32>} : memref<36x256xf32, #tpu.memory_space<vmem>>, vector<4x256xf32>,
    %c1_100 = arith.constant 1 : index
    %c0_101 = arith.constant 0 : index
    %c0_102 = arith.constant 0 : index
    %140 = vector.load %arg2[%c1_100, %c0_101, %c0_102] : memref<14x4x36xf32, #tpu.memory_space<vmem>>, vector<1x4x36xf32>
    %141 = vector.shape_cast %140 : vector<1x4x36xf32> to vector<4x36xf32>
    %c0_103 = arith.constant 0 : index
    %c0_104 = arith.constant 0 : index
    %142 = vector.load %arg8[%c0_103, %c0_104] : memref<36x256xf32, #tpu.memory_space<vmem>>, vector<36x256xf32>
    %cst_105 = arith.constant dense<0.000000e+00> : vector<4x256xf32>
    %143 = tpu.matmul %141, %142, %cst_105 {dimension_numbers = #tpu.dot_dimension_numbers<[1], [0], [0], [1], [0, 0, 1, 1], [], []>} : vector<4x36xf32>, vector<36x256xf32>, vector<4x256xf32> -> vector<4x256xf32>
    %c1_106 = arith.constant 1 : index
    %c0_107 = arith.constant 0 : index
    %c0_108 = arith.constant 0 : index
    %144 = vector.load %arg3[%c1_106, %c0_107, %c0_108] : memref<14x4x1xf32, #tpu.memory_space<vmem>>, vector<1x4x1xf32>
    %145 = vector.shape_cast %144 : vector<1x4x1xf32> to vector<4x1xf32>
    %146 = vector.broadcast %145 : vector<4x1xf32> to vector<4x256xf32>
    %147 = arith.addf %143, %146 : vector<4x256xf32>
    %148 = arith.addf %147, %38 : vector<4x256xf32>
    %c0_109 = arith.constant 0 : index
    %c17_110 = arith.constant 17 : index
    %149 = vector.load %arg7[%c0_109, %c17_110] : memref<4x290xf32, #tpu.memory_space<vmem>>, vector<4x256xf32>
    tpu.vector_store %arg7[%c0_109, %c17_110], %148 {strides = array<i32>} : memref<4x290xf32, #tpu.memory_space<vmem>>, vector<4x256xf32>,
    %c0_111 = arith.constant 0 : index
    %c0_112 = arith.constant 0 : index
    %150 = vector.load %arg7[%c0_111, %c0_112] : memref<4x290xf32, #tpu.memory_space<vmem>>, vector<4x256xf32>
    %cst_113 = arith.constant 0.000000e+00 : f32
    %151 = vector.shape_cast %27 : vector<1x256xi1> to vector<1x256xi1>
    %152 = vector.broadcast %151 : vector<1x256xi1> to vector<4x256xi1>
    %153 = vector.broadcast %cst_113 : f32 to vector<4x256xf32>
    %154 = arith.select %152, %150, %153 : vector<4x256xi1>, vector<4x256xf32>
    %c0_114 = arith.constant 0 : index
    %c0_115 = arith.constant 0 : index
    %155 = vector.load %arg8[%c0_114, %c0_115] : memref<36x256xf32, #tpu.memory_space<vmem>>, vector<4x256xf32>
    tpu.vector_store %arg8[%c0_114, %c0_115], %154 {strides = array<i32>} : memref<36x256xf32, #tpu.memory_space<vmem>>, vector<4x256xf32>,
    %c0_116 = arith.constant 0 : index
    %c1_117 = arith.constant 1 : index
    %156 = vector.load %arg7[%c0_116, %c1_117] : memref<4x290xf32, #tpu.memory_space<vmem>>, vector<4x256xf32>
    %c4_118 = arith.constant 4 : index
    %c0_119 = arith.constant 0 : index
    %157 = vector.load %arg8[%c4_118, %c0_119] : memref<36x256xf32, #tpu.memory_space<vmem>>, vector<4x256xf32>
    tpu.vector_store %arg8[%c4_118, %c0_119], %156 {strides = array<i32>} : memref<36x256xf32, #tpu.memory_space<vmem>>, vector<4x256xf32>,
    %c0_120 = arith.constant 0 : index
    %c2_121 = arith.constant 2 : index
    %158 = vector.load %arg7[%c0_120, %c2_121] : memref<4x290xf32, #tpu.memory_space<vmem>>, vector<4x256xf32>
    %cst_122 = arith.constant 0.000000e+00 : f32
    %159 = vector.shape_cast %36 : vector<1x256xi1> to vector<1x256xi1>
    %160 = vector.broadcast %159 : vector<1x256xi1> to vector<4x256xi1>
    %161 = vector.broadcast %cst_122 : f32 to vector<4x256xf32>
    %162 = arith.select %160, %158, %161 : vector<4x256xi1>, vector<4x256xf32>
    %c8_123 = arith.constant 8 : index
    %c0_124 = arith.constant 0 : index
    %163 = vector.load %arg8[%c8_123, %c0_124] : memref<36x256xf32, #tpu.memory_space<vmem>>, vector<4x256xf32>
    tpu.vector_store %arg8[%c8_123, %c0_124], %162 {strides = array<i32>} : memref<36x256xf32, #tpu.memory_space<vmem>>, vector<4x256xf32>,
    %c0_125 = arith.constant 0 : index
    %c16_126 = arith.constant 16 : index
    %164 = vector.load %arg7[%c0_125, %c16_126] : memref<4x290xf32, #tpu.memory_space<vmem>>, vector<4x256xf32>
    %cst_127 = arith.constant 0.000000e+00 : f32
    %165 = vector.shape_cast %27 : vector<1x256xi1> to vector<1x256xi1>
    %166 = vector.broadcast %165 : vector<1x256xi1> to vector<4x256xi1>
    %167 = vector.broadcast %cst_127 : f32 to vector<4x256xf32>
    %168 = arith.select %166, %164, %167 : vector<4x256xi1>, vector<4x256xf32>
    %c12_128 = arith.constant 12 : index
    %c0_129 = arith.constant 0 : index
    %169 = vector.load %arg8[%c12_128, %c0_129] : memref<36x256xf32, #tpu.memory_space<vmem>>, vector<4x256xf32>
    tpu.vector_store %arg8[%c12_128, %c0_129], %168 {strides = array<i32>} : memref<36x256xf32, #tpu.memory_space<vmem>>, vector<4x256xf32>,
    %c0_130 = arith.constant 0 : index
    %c17_131 = arith.constant 17 : index
    %170 = vector.load %arg7[%c0_130, %c17_131] : memref<4x290xf32, #tpu.memory_space<vmem>>, vector<4x256xf32>
    %c16_132 = arith.constant 16 : index
    %c0_133 = arith.constant 0 : index
    %171 = vector.load %arg8[%c16_132, %c0_133] : memref<36x256xf32, #tpu.memory_space<vmem>>, vector<4x256xf32>
    tpu.vector_store %arg8[%c16_132, %c0_133], %170 {strides = array<i32>} : memref<36x256xf32, #tpu.memory_space<vmem>>, vector<4x256xf32>,
    %c0_134 = arith.constant 0 : index
    %c18_135 = arith.constant 18 : index
    %172 = vector.load %arg7[%c0_134, %c18_135] : memref<4x290xf32, #tpu.memory_space<vmem>>, vector<4x256xf32>
    %cst_136 = arith.constant 0.000000e+00 : f32
    %173 = vector.shape_cast %36 : vector<1x256xi1> to vector<1x256xi1>
    %174 = vector.broadcast %173 : vector<1x256xi1> to vector<4x256xi1>
    %175 = vector.broadcast %cst_136 : f32 to vector<4x256xf32>
    %176 = arith.select %174, %172, %175 : vector<4x256xi1>, vector<4x256xf32>
    %c20_137 = arith.constant 20 : index
    %c0_138 = arith.constant 0 : index
    %177 = vector.load %arg8[%c20_137, %c0_138] : memref<36x256xf32, #tpu.memory_space<vmem>>, vector<4x256xf32>
    tpu.vector_store %arg8[%c20_137, %c0_138], %176 {strides = array<i32>} : memref<36x256xf32, #tpu.memory_space<vmem>>, vector<4x256xf32>,
    %c0_139 = arith.constant 0 : index
    %c32_140 = arith.constant 32 : index
    %178 = vector.load %arg7[%c0_139, %c32_140] : memref<4x290xf32, #tpu.memory_space<vmem>>, vector<4x256xf32>
    %cst_141 = arith.constant 0.000000e+00 : f32
    %179 = vector.shape_cast %27 : vector<1x256xi1> to vector<1x256xi1>
    %180 = vector.broadcast %179 : vector<1x256xi1> to vector<4x256xi1>
    %181 = vector.broadcast %cst_141 : f32 to vector<4x256xf32>
    %182 = arith.select %180, %178, %181 : vector<4x256xi1>, vector<4x256xf32>
    %c24_142 = arith.constant 24 : index
    %c0_143 = arith.constant 0 : index
    %183 = vector.load %arg8[%c24_142, %c0_143] : memref<36x256xf32, #tpu.memory_space<vmem>>, vector<4x256xf32>
    tpu.vector_store %arg8[%c24_142, %c0_143], %182 {strides = array<i32>} : memref<36x256xf32, #tpu.memory_space<vmem>>, vector<4x256xf32>,
    %c0_144 = arith.constant 0 : index
    %c33_145 = arith.constant 33 : index
    %184 = vector.load %arg7[%c0_144, %c33_145] : memref<4x290xf32, #tpu.memory_space<vmem>>, vector<4x256xf32>
    %c28_146 = arith.constant 28 : index
    %c0_147 = arith.constant 0 : index
    %185 = vector.load %arg8[%c28_146, %c0_147] : memref<36x256xf32, #tpu.memory_space<vmem>>, vector<4x256xf32>
    tpu.vector_store %arg8[%c28_146, %c0_147], %184 {strides = array<i32>} : memref<36x256xf32, #tpu.memory_space<vmem>>, vector<4x256xf32>,
    %c0_148 = arith.constant 0 : index
    %c34_149 = arith.constant 34 : index
    %186 = vector.load %arg7[%c0_148, %c34_149] : memref<4x290xf32, #tpu.memory_space<vmem>>, vector<4x256xf32>
    %cst_150 = arith.constant 0.000000e+00 : f32
    %187 = vector.shape_cast %36 : vector<1x256xi1> to vector<1x256xi1>
    %188 = vector.broadcast %187 : vector<1x256xi1> to vector<4x256xi1>
    %189 = vector.broadcast %cst_150 : f32 to vector<4x256xf32>
    %190 = arith.select %188, %186, %189 : vector<4x256xi1>, vector<4x256xf32>
    %c32_151 = arith.constant 32 : index
    %c0_152 = arith.constant 0 : index
    %191 = vector.load %arg8[%c32_151, %c0_152] : memref<36x256xf32, #tpu.memory_space<vmem>>, vector<4x256xf32>
    tpu.vector_store %arg8[%c32_151, %c0_152], %190 {strides = array<i32>} : memref<36x256xf32, #tpu.memory_space<vmem>>, vector<4x256xf32>,
    %c2_153 = arith.constant 2 : index
    %c0_154 = arith.constant 0 : index
    %c0_155 = arith.constant 0 : index
    %192 = vector.load %arg2[%c2_153, %c0_154, %c0_155] : memref<14x4x36xf32, #tpu.memory_space<vmem>>, vector<1x4x36xf32>
    %193 = vector.shape_cast %192 : vector<1x4x36xf32> to vector<4x36xf32>
    %c0_156 = arith.constant 0 : index
    %c0_157 = arith.constant 0 : index
    %194 = vector.load %arg8[%c0_156, %c0_157] : memref<36x256xf32, #tpu.memory_space<vmem>>, vector<36x256xf32>
    %cst_158 = arith.constant dense<0.000000e+00> : vector<4x256xf32>
    %195 = tpu.matmul %193, %194, %cst_158 {dimension_numbers = #tpu.dot_dimension_numbers<[1], [0], [0], [1], [0, 0, 1, 1], [], []>} : vector<4x36xf32>, vector<36x256xf32>, vector<4x256xf32> -> vector<4x256xf32>
    %c2_159 = arith.constant 2 : index
    %c0_160 = arith.constant 0 : index
    %c0_161 = arith.constant 0 : index
    %196 = vector.load %arg3[%c2_159, %c0_160, %c0_161] : memref<14x4x1xf32, #tpu.memory_space<vmem>>, vector<1x4x1xf32>
    %197 = vector.shape_cast %196 : vector<1x4x1xf32> to vector<4x1xf32>
    %198 = vector.broadcast %197 : vector<4x1xf32> to vector<4x256xf32>
    %199 = arith.addf %195, %198 : vector<4x256xf32>
    %cst_162 = arith.constant 0.000000e+00 : f32
    %200 = vector.broadcast %cst_162 : f32 to vector<4x256xf32>
    %201 = arith.maximumf %199, %200 : vector<4x256xf32>
    %cst_163 = arith.constant 0.000000e+00 : f32
    %202 = vector.broadcast %cst_163 : f32 to vector<4x256xf32>
    %203 = arith.minimumf %199, %202 : vector<4x256xf32>
    %cst_164 = arith.constant 2.500000e-01 : f32
    %204 = vector.broadcast %cst_164 : f32 to vector<4x256xf32>
    %205 = arith.mulf %204, %203 : vector<4x256xf32>
    %206 = arith.addf %201, %205 : vector<4x256xf32>
    %c0_165 = arith.constant 0 : index
    %c17_166 = arith.constant 17 : index
    %207 = vector.load %arg7[%c0_165, %c17_166] : memref<4x290xf32, #tpu.memory_space<vmem>>, vector<4x256xf32>
    tpu.vector_store %arg7[%c0_165, %c17_166], %206 {strides = array<i32>} : memref<4x290xf32, #tpu.memory_space<vmem>>, vector<4x256xf32>,
    %c0_167 = arith.constant 0 : index
    %c0_168 = arith.constant 0 : index
    %208 = vector.load %arg7[%c0_167, %c0_168] : memref<4x290xf32, #tpu.memory_space<vmem>>, vector<4x256xf32>
    %cst_169 = arith.constant 0.000000e+00 : f32
    %209 = vector.shape_cast %27 : vector<1x256xi1> to vector<1x256xi1>
    %210 = vector.broadcast %209 : vector<1x256xi1> to vector<4x256xi1>
    %211 = vector.broadcast %cst_169 : f32 to vector<4x256xf32>
    %212 = arith.select %210, %208, %211 : vector<4x256xi1>, vector<4x256xf32>
    %c0_170 = arith.constant 0 : index
    %c0_171 = arith.constant 0 : index
    %213 = vector.load %arg8[%c0_170, %c0_171] : memref<36x256xf32, #tpu.memory_space<vmem>>, vector<4x256xf32>
    tpu.vector_store %arg8[%c0_170, %c0_171], %212 {strides = array<i32>} : memref<36x256xf32, #tpu.memory_space<vmem>>, vector<4x256xf32>,
    %c0_172 = arith.constant 0 : index
    %c1_173 = arith.constant 1 : index
    %214 = vector.load %arg7[%c0_172, %c1_173] : memref<4x290xf32, #tpu.memory_space<vmem>>, vector<4x256xf32>
    %c4_174 = arith.constant 4 : index
    %c0_175 = arith.constant 0 : index
    %215 = vector.load %arg8[%c4_174, %c0_175] : memref<36x256xf32, #tpu.memory_space<vmem>>, vector<4x256xf32>
    tpu.vector_store %arg8[%c4_174, %c0_175], %214 {strides = array<i32>} : memref<36x256xf32, #tpu.memory_space<vmem>>, vector<4x256xf32>,
    %c0_176 = arith.constant 0 : index
    %c2_177 = arith.constant 2 : index
    %216 = vector.load %arg7[%c0_176, %c2_177] : memref<4x290xf32, #tpu.memory_space<vmem>>, vector<4x256xf32>
    %cst_178 = arith.constant 0.000000e+00 : f32
    %217 = vector.shape_cast %36 : vector<1x256xi1> to vector<1x256xi1>
    %218 = vector.broadcast %217 : vector<1x256xi1> to vector<4x256xi1>
    %219 = vector.broadcast %cst_178 : f32 to vector<4x256xf32>
    %220 = arith.select %218, %216, %219 : vector<4x256xi1>, vector<4x256xf32>
    %c8_179 = arith.constant 8 : index
    %c0_180 = arith.constant 0 : index
    %221 = vector.load %arg8[%c8_179, %c0_180] : memref<36x256xf32, #tpu.memory_space<vmem>>, vector<4x256xf32>
    tpu.vector_store %arg8[%c8_179, %c0_180], %220 {strides = array<i32>} : memref<36x256xf32, #tpu.memory_space<vmem>>, vector<4x256xf32>,
    %c0_181 = arith.constant 0 : index
    %c16_182 = arith.constant 16 : index
    %222 = vector.load %arg7[%c0_181, %c16_182] : memref<4x290xf32, #tpu.memory_space<vmem>>, vector<4x256xf32>
    %cst_183 = arith.constant 0.000000e+00 : f32
    %223 = vector.shape_cast %27 : vector<1x256xi1> to vector<1x256xi1>
    %224 = vector.broadcast %223 : vector<1x256xi1> to vector<4x256xi1>
    %225 = vector.broadcast %cst_183 : f32 to vector<4x256xf32>
    %226 = arith.select %224, %222, %225 : vector<4x256xi1>, vector<4x256xf32>
    %c12_184 = arith.constant 12 : index
    %c0_185 = arith.constant 0 : index
    %227 = vector.load %arg8[%c12_184, %c0_185] : memref<36x256xf32, #tpu.memory_space<vmem>>, vector<4x256xf32>
    tpu.vector_store %arg8[%c12_184, %c0_185], %226 {strides = array<i32>} : memref<36x256xf32, #tpu.memory_space<vmem>>, vector<4x256xf32>,
    %c0_186 = arith.constant 0 : index
    %c17_187 = arith.constant 17 : index
    %228 = vector.load %arg7[%c0_186, %c17_187] : memref<4x290xf32, #tpu.memory_space<vmem>>, vector<4x256xf32>
    %c16_188 = arith.constant 16 : index
    %c0_189 = arith.constant 0 : index
    %229 = vector.load %arg8[%c16_188, %c0_189] : memref<36x256xf32, #tpu.memory_space<vmem>>, vector<4x256xf32>
    tpu.vector_store %arg8[%c16_188, %c0_189], %228 {strides = array<i32>} : memref<36x256xf32, #tpu.memory_space<vmem>>, vector<4x256xf32>,
    %c0_190 = arith.constant 0 : index
    %c18_191 = arith.constant 18 : index
    %230 = vector.load %arg7[%c0_190, %c18_191] : memref<4x290xf32, #tpu.memory_space<vmem>>, vector<4x256xf32>
    %cst_192 = arith.constant 0.000000e+00 : f32
    %231 = vector.shape_cast %36 : vector<1x256xi1> to vector<1x256xi1>
    %232 = vector.broadcast %231 : vector<1x256xi1> to vector<4x256xi1>
    %233 = vector.broadcast %cst_192 : f32 to vector<4x256xf32>
    %234 = arith.select %232, %230, %233 : vector<4x256xi1>, vector<4x256xf32>
    %c20_193 = arith.constant 20 : index
    %c0_194 = arith.constant 0 : index
    %235 = vector.load %arg8[%c20_193, %c0_194] : memref<36x256xf32, #tpu.memory_space<vmem>>, vector<4x256xf32>
    tpu.vector_store %arg8[%c20_193, %c0_194], %234 {strides = array<i32>} : memref<36x256xf32, #tpu.memory_space<vmem>>, vector<4x256xf32>,
    %c0_195 = arith.constant 0 : index
    %c32_196 = arith.constant 32 : index
    %236 = vector.load %arg7[%c0_195, %c32_196] : memref<4x290xf32, #tpu.memory_space<vmem>>, vector<4x256xf32>
    %cst_197 = arith.constant 0.000000e+00 : f32
    %237 = vector.shape_cast %27 : vector<1x256xi1> to vector<1x256xi1>
    %238 = vector.broadcast %237 : vector<1x256xi1> to vector<4x256xi1>
    %239 = vector.broadcast %cst_197 : f32 to vector<4x256xf32>
    %240 = arith.select %238, %236, %239 : vector<4x256xi1>, vector<4x256xf32>
    %c24_198 = arith.constant 24 : index
    %c0_199 = arith.constant 0 : index
    %241 = vector.load %arg8[%c24_198, %c0_199] : memref<36x256xf32, #tpu.memory_space<vmem>>, vector<4x256xf32>
    tpu.vector_store %arg8[%c24_198, %c0_199], %240 {strides = array<i32>} : memref<36x256xf32, #tpu.memory_space<vmem>>, vector<4x256xf32>,
    %c0_200 = arith.constant 0 : index
    %c33_201 = arith.constant 33 : index
    %242 = vector.load %arg7[%c0_200, %c33_201] : memref<4x290xf32, #tpu.memory_space<vmem>>, vector<4x256xf32>
    %c28_202 = arith.constant 28 : index
    %c0_203 = arith.constant 0 : index
    %243 = vector.load %arg8[%c28_202, %c0_203] : memref<36x256xf32, #tpu.memory_space<vmem>>, vector<4x256xf32>
    tpu.vector_store %arg8[%c28_202, %c0_203], %242 {strides = array<i32>} : memref<36x256xf32, #tpu.memory_space<vmem>>, vector<4x256xf32>,
    %c0_204 = arith.constant 0 : index
    %c34_205 = arith.constant 34 : index
    %244 = vector.load %arg7[%c0_204, %c34_205] : memref<4x290xf32, #tpu.memory_space<vmem>>, vector<4x256xf32>
    %cst_206 = arith.constant 0.000000e+00 : f32
    %245 = vector.shape_cast %36 : vector<1x256xi1> to vector<1x256xi1>
    %246 = vector.broadcast %245 : vector<1x256xi1> to vector<4x256xi1>
    %247 = vector.broadcast %cst_206 : f32 to vector<4x256xf32>
    %248 = arith.select %246, %244, %247 : vector<4x256xi1>, vector<4x256xf32>
    %c32_207 = arith.constant 32 : index
    %c0_208 = arith.constant 0 : index
    %249 = vector.load %arg8[%c32_207, %c0_208] : memref<36x256xf32, #tpu.memory_space<vmem>>, vector<4x256xf32>
    tpu.vector_store %arg8[%c32_207, %c0_208], %248 {strides = array<i32>} : memref<36x256xf32, #tpu.memory_space<vmem>>, vector<4x256xf32>,
    %c3 = arith.constant 3 : index
    %c0_209 = arith.constant 0 : index
    %c0_210 = arith.constant 0 : index
    %250 = vector.load %arg2[%c3, %c0_209, %c0_210] : memref<14x4x36xf32, #tpu.memory_space<vmem>>, vector<1x4x36xf32>
    %251 = vector.shape_cast %250 : vector<1x4x36xf32> to vector<4x36xf32>
    %c0_211 = arith.constant 0 : index
    %c0_212 = arith.constant 0 : index
    %252 = vector.load %arg8[%c0_211, %c0_212] : memref<36x256xf32, #tpu.memory_space<vmem>>, vector<36x256xf32>
    %cst_213 = arith.constant dense<0.000000e+00> : vector<4x256xf32>
    %253 = tpu.matmul %251, %252, %cst_213 {dimension_numbers = #tpu.dot_dimension_numbers<[1], [0], [0], [1], [0, 0, 1, 1], [], []>} : vector<4x36xf32>, vector<36x256xf32>, vector<4x256xf32> -> vector<4x256xf32>
    %c3_214 = arith.constant 3 : index
    %c0_215 = arith.constant 0 : index
    %c0_216 = arith.constant 0 : index
    %254 = vector.load %arg3[%c3_214, %c0_215, %c0_216] : memref<14x4x1xf32, #tpu.memory_space<vmem>>, vector<1x4x1xf32>
    %255 = vector.shape_cast %254 : vector<1x4x1xf32> to vector<4x1xf32>
    %256 = vector.broadcast %255 : vector<4x1xf32> to vector<4x256xf32>
    %257 = arith.addf %253, %256 : vector<4x256xf32>
    %258 = arith.addf %257, %148 : vector<4x256xf32>
    %c0_217 = arith.constant 0 : index
    %c17_218 = arith.constant 17 : index
    %259 = vector.load %arg7[%c0_217, %c17_218] : memref<4x290xf32, #tpu.memory_space<vmem>>, vector<4x256xf32>
    tpu.vector_store %arg7[%c0_217, %c17_218], %38 {strides = array<i32>} : memref<4x290xf32, #tpu.memory_space<vmem>>, vector<4x256xf32>,
    %c0_219 = arith.constant 0 : index
    %c0_220 = arith.constant 0 : index
    %260 = vector.load %arg7[%c0_219, %c0_220] : memref<4x290xf32, #tpu.memory_space<vmem>>, vector<4x256xf32>
    %cst_221 = arith.constant 0.000000e+00 : f32
    %261 = vector.shape_cast %27 : vector<1x256xi1> to vector<1x256xi1>
    %262 = vector.broadcast %261 : vector<1x256xi1> to vector<4x256xi1>
    %263 = vector.broadcast %cst_221 : f32 to vector<4x256xf32>
    %264 = arith.select %262, %260, %263 : vector<4x256xi1>, vector<4x256xf32>
    %c0_222 = arith.constant 0 : index
    %c0_223 = arith.constant 0 : index
    %265 = vector.load %arg8[%c0_222, %c0_223] : memref<36x256xf32, #tpu.memory_space<vmem>>, vector<4x256xf32>
    tpu.vector_store %arg8[%c0_222, %c0_223], %264 {strides = array<i32>} : memref<36x256xf32, #tpu.memory_space<vmem>>, vector<4x256xf32>,
    %c0_224 = arith.constant 0 : index
    %c1_225 = arith.constant 1 : index
    %266 = vector.load %arg7[%c0_224, %c1_225] : memref<4x290xf32, #tpu.memory_space<vmem>>, vector<4x256xf32>
    %c4_226 = arith.constant 4 : index
    %c0_227 = arith.constant 0 : index
    %267 = vector.load %arg8[%c4_226, %c0_227] : memref<36x256xf32, #tpu.memory_space<vmem>>, vector<4x256xf32>
    tpu.vector_store %arg8[%c4_226, %c0_227], %266 {strides = array<i32>} : memref<36x256xf32, #tpu.memory_space<vmem>>, vector<4x256xf32>,
    %c0_228 = arith.constant 0 : index
    %c2_229 = arith.constant 2 : index
    %268 = vector.load %arg7[%c0_228, %c2_229] : memref<4x290xf32, #tpu.memory_space<vmem>>, vector<4x256xf32>
    %cst_230 = arith.constant 0.000000e+00 : f32
    %269 = vector.shape_cast %36 : vector<1x256xi1> to vector<1x256xi1>
    %270 = vector.broadcast %269 : vector<1x256xi1> to vector<4x256xi1>
    %271 = vector.broadcast %cst_230 : f32 to vector<4x256xf32>
    %272 = arith.select %270, %268, %271 : vector<4x256xi1>, vector<4x256xf32>
    %c8_231 = arith.constant 8 : index
    %c0_232 = arith.constant 0 : index
    %273 = vector.load %arg8[%c8_231, %c0_232] : memref<36x256xf32, #tpu.memory_space<vmem>>, vector<4x256xf32>
    tpu.vector_store %arg8[%c8_231, %c0_232], %272 {strides = array<i32>} : memref<36x256xf32, #tpu.memory_space<vmem>>, vector<4x256xf32>,
    %c0_233 = arith.constant 0 : index
    %c16_234 = arith.constant 16 : index
    %274 = vector.load %arg7[%c0_233, %c16_234] : memref<4x290xf32, #tpu.memory_space<vmem>>, vector<4x256xf32>
    %cst_235 = arith.constant 0.000000e+00 : f32
    %275 = vector.shape_cast %27 : vector<1x256xi1> to vector<1x256xi1>
    %276 = vector.broadcast %275 : vector<1x256xi1> to vector<4x256xi1>
    %277 = vector.broadcast %cst_235 : f32 to vector<4x256xf32>
    %278 = arith.select %276, %274, %277 : vector<4x256xi1>, vector<4x256xf32>
    %c12_236 = arith.constant 12 : index
    %c0_237 = arith.constant 0 : index
    %279 = vector.load %arg8[%c12_236, %c0_237] : memref<36x256xf32, #tpu.memory_space<vmem>>, vector<4x256xf32>
    tpu.vector_store %arg8[%c12_236, %c0_237], %278 {strides = array<i32>} : memref<36x256xf32, #tpu.memory_space<vmem>>, vector<4x256xf32>,
    %c0_238 = arith.constant 0 : index
    %c17_239 = arith.constant 17 : index
    %280 = vector.load %arg7[%c0_238, %c17_239] : memref<4x290xf32, #tpu.memory_space<vmem>>, vector<4x256xf32>
    %c16_240 = arith.constant 16 : index
    %c0_241 = arith.constant 0 : index
    %281 = vector.load %arg8[%c16_240, %c0_241] : memref<36x256xf32, #tpu.memory_space<vmem>>, vector<4x256xf32>
    tpu.vector_store %arg8[%c16_240, %c0_241], %280 {strides = array<i32>} : memref<36x256xf32, #tpu.memory_space<vmem>>, vector<4x256xf32>,
    %c0_242 = arith.constant 0 : index
    %c18_243 = arith.constant 18 : index
    %282 = vector.load %arg7[%c0_242, %c18_243] : memref<4x290xf32, #tpu.memory_space<vmem>>, vector<4x256xf32>
    %cst_244 = arith.constant 0.000000e+00 : f32
    %283 = vector.shape_cast %36 : vector<1x256xi1> to vector<1x256xi1>
    %284 = vector.broadcast %283 : vector<1x256xi1> to vector<4x256xi1>
    %285 = vector.broadcast %cst_244 : f32 to vector<4x256xf32>
    %286 = arith.select %284, %282, %285 : vector<4x256xi1>, vector<4x256xf32>
    %c20_245 = arith.constant 20 : index
    %c0_246 = arith.constant 0 : index
    %287 = vector.load %arg8[%c20_245, %c0_246] : memref<36x256xf32, #tpu.memory_space<vmem>>, vector<4x256xf32>
    tpu.vector_store %arg8[%c20_245, %c0_246], %286 {strides = array<i32>} : memref<36x256xf32, #tpu.memory_space<vmem>>, vector<4x256xf32>,
    %c0_247 = arith.constant 0 : index
    %c32_248 = arith.constant 32 : index
    %288 = vector.load %arg7[%c0_247, %c32_248] : memref<4x290xf32, #tpu.memory_space<vmem>>, vector<4x256xf32>
    %cst_249 = arith.constant 0.000000e+00 : f32
    %289 = vector.shape_cast %27 : vector<1x256xi1> to vector<1x256xi1>
    %290 = vector.broadcast %289 : vector<1x256xi1> to vector<4x256xi1>
    %291 = vector.broadcast %cst_249 : f32 to vector<4x256xf32>
    %292 = arith.select %290, %288, %291 : vector<4x256xi1>, vector<4x256xf32>
    %c24_250 = arith.constant 24 : index
    %c0_251 = arith.constant 0 : index
    %293 = vector.load %arg8[%c24_250, %c0_251] : memref<36x256xf32, #tpu.memory_space<vmem>>, vector<4x256xf32>
    tpu.vector_store %arg8[%c24_250, %c0_251], %292 {strides = array<i32>} : memref<36x256xf32, #tpu.memory_space<vmem>>, vector<4x256xf32>,
    %c0_252 = arith.constant 0 : index
    %c33_253 = arith.constant 33 : index
    %294 = vector.load %arg7[%c0_252, %c33_253] : memref<4x290xf32, #tpu.memory_space<vmem>>, vector<4x256xf32>
    %c28_254 = arith.constant 28 : index
    %c0_255 = arith.constant 0 : index
    %295 = vector.load %arg8[%c28_254, %c0_255] : memref<36x256xf32, #tpu.memory_space<vmem>>, vector<4x256xf32>
    tpu.vector_store %arg8[%c28_254, %c0_255], %294 {strides = array<i32>} : memref<36x256xf32, #tpu.memory_space<vmem>>, vector<4x256xf32>,
    %c0_256 = arith.constant 0 : index
    %c34_257 = arith.constant 34 : index
    %296 = vector.load %arg7[%c0_256, %c34_257] : memref<4x290xf32, #tpu.memory_space<vmem>>, vector<4x256xf32>
    %cst_258 = arith.constant 0.000000e+00 : f32
    %297 = vector.shape_cast %36 : vector<1x256xi1> to vector<1x256xi1>
    %298 = vector.broadcast %297 : vector<1x256xi1> to vector<4x256xi1>
    %299 = vector.broadcast %cst_258 : f32 to vector<4x256xf32>
    %300 = arith.select %298, %296, %299 : vector<4x256xi1>, vector<4x256xf32>
    %c32_259 = arith.constant 32 : index
    %c0_260 = arith.constant 0 : index
    %301 = vector.load %arg8[%c32_259, %c0_260] : memref<36x256xf32, #tpu.memory_space<vmem>>, vector<4x256xf32>
    tpu.vector_store %arg8[%c32_259, %c0_260], %300 {strides = array<i32>} : memref<36x256xf32, #tpu.memory_space<vmem>>, vector<4x256xf32>,
    %c4_261 = arith.constant 4 : index
    %c0_262 = arith.constant 0 : index
    %c0_263 = arith.constant 0 : index
    %302 = vector.load %arg2[%c4_261, %c0_262, %c0_263] : memref<14x4x36xf32, #tpu.memory_space<vmem>>, vector<1x4x36xf32>
    %303 = vector.shape_cast %302 : vector<1x4x36xf32> to vector<4x36xf32>
    %c0_264 = arith.constant 0 : index
    %c0_265 = arith.constant 0 : index
    %304 = vector.load %arg8[%c0_264, %c0_265] : memref<36x256xf32, #tpu.memory_space<vmem>>, vector<36x256xf32>
    %cst_266 = arith.constant dense<0.000000e+00> : vector<4x256xf32>
    %305 = tpu.matmul %303, %304, %cst_266 {dimension_numbers = #tpu.dot_dimension_numbers<[1], [0], [0], [1], [0, 0, 1, 1], [], []>} : vector<4x36xf32>, vector<36x256xf32>, vector<4x256xf32> -> vector<4x256xf32>
    %c4_267 = arith.constant 4 : index
    %c0_268 = arith.constant 0 : index
    %c0_269 = arith.constant 0 : index
    %306 = vector.load %arg3[%c4_267, %c0_268, %c0_269] : memref<14x4x1xf32, #tpu.memory_space<vmem>>, vector<1x4x1xf32>
    %307 = vector.shape_cast %306 : vector<1x4x1xf32> to vector<4x1xf32>
    %308 = vector.broadcast %307 : vector<4x1xf32> to vector<4x256xf32>
    %309 = arith.addf %305, %308 : vector<4x256xf32>
    %cst_270 = arith.constant 0.000000e+00 : f32
    %310 = vector.broadcast %cst_270 : f32 to vector<4x256xf32>
    %311 = arith.maximumf %309, %310 : vector<4x256xf32>
    %cst_271 = arith.constant 0.000000e+00 : f32
    %312 = vector.broadcast %cst_271 : f32 to vector<4x256xf32>
    %313 = arith.minimumf %309, %312 : vector<4x256xf32>
    %cst_272 = arith.constant 2.500000e-01 : f32
    %314 = vector.broadcast %cst_272 : f32 to vector<4x256xf32>
    %315 = arith.mulf %314, %313 : vector<4x256xf32>
    %316 = arith.addf %311, %315 : vector<4x256xf32>
    %c0_273 = arith.constant 0 : index
    %c17_274 = arith.constant 17 : index
    %317 = vector.load %arg7[%c0_273, %c17_274] : memref<4x290xf32, #tpu.memory_space<vmem>>, vector<4x256xf32>
    tpu.vector_store %arg7[%c0_273, %c17_274], %316 {strides = array<i32>} : memref<4x290xf32, #tpu.memory_space<vmem>>, vector<4x256xf32>,
    %c0_275 = arith.constant 0 : index
    %c0_276 = arith.constant 0 : index
    %318 = vector.load %arg7[%c0_275, %c0_276] : memref<4x290xf32, #tpu.memory_space<vmem>>, vector<4x256xf32>
    %cst_277 = arith.constant 0.000000e+00 : f32
    %319 = vector.shape_cast %27 : vector<1x256xi1> to vector<1x256xi1>
    %320 = vector.broadcast %319 : vector<1x256xi1> to vector<4x256xi1>
    %321 = vector.broadcast %cst_277 : f32 to vector<4x256xf32>
    %322 = arith.select %320, %318, %321 : vector<4x256xi1>, vector<4x256xf32>
    %c0_278 = arith.constant 0 : index
    %c0_279 = arith.constant 0 : index
    %323 = vector.load %arg8[%c0_278, %c0_279] : memref<36x256xf32, #tpu.memory_space<vmem>>, vector<4x256xf32>
    tpu.vector_store %arg8[%c0_278, %c0_279], %322 {strides = array<i32>} : memref<36x256xf32, #tpu.memory_space<vmem>>, vector<4x256xf32>,
    %c0_280 = arith.constant 0 : index
    %c1_281 = arith.constant 1 : index
    %324 = vector.load %arg7[%c0_280, %c1_281] : memref<4x290xf32, #tpu.memory_space<vmem>>, vector<4x256xf32>
    %c4_282 = arith.constant 4 : index
    %c0_283 = arith.constant 0 : index
    %325 = vector.load %arg8[%c4_282, %c0_283] : memref<36x256xf32, #tpu.memory_space<vmem>>, vector<4x256xf32>
    tpu.vector_store %arg8[%c4_282, %c0_283], %324 {strides = array<i32>} : memref<36x256xf32, #tpu.memory_space<vmem>>, vector<4x256xf32>,
    %c0_284 = arith.constant 0 : index
    %c2_285 = arith.constant 2 : index
    %326 = vector.load %arg7[%c0_284, %c2_285] : memref<4x290xf32, #tpu.memory_space<vmem>>, vector<4x256xf32>
    %cst_286 = arith.constant 0.000000e+00 : f32
    %327 = vector.shape_cast %36 : vector<1x256xi1> to vector<1x256xi1>
    %328 = vector.broadcast %327 : vector<1x256xi1> to vector<4x256xi1>
    %329 = vector.broadcast %cst_286 : f32 to vector<4x256xf32>
    %330 = arith.select %328, %326, %329 : vector<4x256xi1>, vector<4x256xf32>
    %c8_287 = arith.constant 8 : index
    %c0_288 = arith.constant 0 : index
    %331 = vector.load %arg8[%c8_287, %c0_288] : memref<36x256xf32, #tpu.memory_space<vmem>>, vector<4x256xf32>
    tpu.vector_store %arg8[%c8_287, %c0_288], %330 {strides = array<i32>} : memref<36x256xf32, #tpu.memory_space<vmem>>, vector<4x256xf32>,
    %c0_289 = arith.constant 0 : index
    %c16_290 = arith.constant 16 : index
    %332 = vector.load %arg7[%c0_289, %c16_290] : memref<4x290xf32, #tpu.memory_space<vmem>>, vector<4x256xf32>
    %cst_291 = arith.constant 0.000000e+00 : f32
    %333 = vector.shape_cast %27 : vector<1x256xi1> to vector<1x256xi1>
    %334 = vector.broadcast %333 : vector<1x256xi1> to vector<4x256xi1>
    %335 = vector.broadcast %cst_291 : f32 to vector<4x256xf32>
    %336 = arith.select %334, %332, %335 : vector<4x256xi1>, vector<4x256xf32>
    %c12_292 = arith.constant 12 : index
    %c0_293 = arith.constant 0 : index
    %337 = vector.load %arg8[%c12_292, %c0_293] : memref<36x256xf32, #tpu.memory_space<vmem>>, vector<4x256xf32>
    tpu.vector_store %arg8[%c12_292, %c0_293], %336 {strides = array<i32>} : memref<36x256xf32, #tpu.memory_space<vmem>>, vector<4x256xf32>,
    %c0_294 = arith.constant 0 : index
    %c17_295 = arith.constant 17 : index
    %338 = vector.load %arg7[%c0_294, %c17_295] : memref<4x290xf32, #tpu.memory_space<vmem>>, vector<4x256xf32>
    %c16_296 = arith.constant 16 : index
    %c0_297 = arith.constant 0 : index
    %339 = vector.load %arg8[%c16_296, %c0_297] : memref<36x256xf32, #tpu.memory_space<vmem>>, vector<4x256xf32>
    tpu.vector_store %arg8[%c16_296, %c0_297], %338 {strides = array<i32>} : memref<36x256xf32, #tpu.memory_space<vmem>>, vector<4x256xf32>,
    %c0_298 = arith.constant 0 : index
    %c18_299 = arith.constant 18 : index
    %340 = vector.load %arg7[%c0_298, %c18_299] : memref<4x290xf32, #tpu.memory_space<vmem>>, vector<4x256xf32>
    %cst_300 = arith.constant 0.000000e+00 : f32
    %341 = vector.shape_cast %36 : vector<1x256xi1> to vector<1x256xi1>
    %342 = vector.broadcast %341 : vector<1x256xi1> to vector<4x256xi1>
    %343 = vector.broadcast %cst_300 : f32 to vector<4x256xf32>
    %344 = arith.select %342, %340, %343 : vector<4x256xi1>, vector<4x256xf32>
    %c20_301 = arith.constant 20 : index
    %c0_302 = arith.constant 0 : index
    %345 = vector.load %arg8[%c20_301, %c0_302] : memref<36x256xf32, #tpu.memory_space<vmem>>, vector<4x256xf32>
    tpu.vector_store %arg8[%c20_301, %c0_302], %344 {strides = array<i32>} : memref<36x256xf32, #tpu.memory_space<vmem>>, vector<4x256xf32>,
    %c0_303 = arith.constant 0 : index
    %c32_304 = arith.constant 32 : index
    %346 = vector.load %arg7[%c0_303, %c32_304] : memref<4x290xf32, #tpu.memory_space<vmem>>, vector<4x256xf32>
    %cst_305 = arith.constant 0.000000e+00 : f32
    %347 = vector.shape_cast %27 : vector<1x256xi1> to vector<1x256xi1>
    %348 = vector.broadcast %347 : vector<1x256xi1> to vector<4x256xi1>
    %349 = vector.broadcast %cst_305 : f32 to vector<4x256xf32>
    %350 = arith.select %348, %346, %349 : vector<4x256xi1>, vector<4x256xf32>
    %c24_306 = arith.constant 24 : index
    %c0_307 = arith.constant 0 : index
    %351 = vector.load %arg8[%c24_306, %c0_307] : memref<36x256xf32, #tpu.memory_space<vmem>>, vector<4x256xf32>
    tpu.vector_store %arg8[%c24_306, %c0_307], %350 {strides = array<i32>} : memref<36x256xf32, #tpu.memory_space<vmem>>, vector<4x256xf32>,
    %c0_308 = arith.constant 0 : index
    %c33_309 = arith.constant 33 : index
    %352 = vector.load %arg7[%c0_308, %c33_309] : memref<4x290xf32, #tpu.memory_space<vmem>>, vector<4x256xf32>
    %c28_310 = arith.constant 28 : index
    %c0_311 = arith.constant 0 : index
    %353 = vector.load %arg8[%c28_310, %c0_311] : memref<36x256xf32, #tpu.memory_space<vmem>>, vector<4x256xf32>
    tpu.vector_store %arg8[%c28_310, %c0_311], %352 {strides = array<i32>} : memref<36x256xf32, #tpu.memory_space<vmem>>, vector<4x256xf32>,
    %c0_312 = arith.constant 0 : index
    %c34_313 = arith.constant 34 : index
    %354 = vector.load %arg7[%c0_312, %c34_313] : memref<4x290xf32, #tpu.memory_space<vmem>>, vector<4x256xf32>
    %cst_314 = arith.constant 0.000000e+00 : f32
    %355 = vector.shape_cast %36 : vector<1x256xi1> to vector<1x256xi1>
    %356 = vector.broadcast %355 : vector<1x256xi1> to vector<4x256xi1>
    %357 = vector.broadcast %cst_314 : f32 to vector<4x256xf32>
    %358 = arith.select %356, %354, %357 : vector<4x256xi1>, vector<4x256xf32>
    %c32_315 = arith.constant 32 : index
    %c0_316 = arith.constant 0 : index
    %359 = vector.load %arg8[%c32_315, %c0_316] : memref<36x256xf32, #tpu.memory_space<vmem>>, vector<4x256xf32>
    tpu.vector_store %arg8[%c32_315, %c0_316], %358 {strides = array<i32>} : memref<36x256xf32, #tpu.memory_space<vmem>>, vector<4x256xf32>,
    %c5 = arith.constant 5 : index
    %c0_317 = arith.constant 0 : index
    %c0_318 = arith.constant 0 : index
    %360 = vector.load %arg2[%c5, %c0_317, %c0_318] : memref<14x4x36xf32, #tpu.memory_space<vmem>>, vector<1x4x36xf32>
    %361 = vector.shape_cast %360 : vector<1x4x36xf32> to vector<4x36xf32>
    %c0_319 = arith.constant 0 : index
    %c0_320 = arith.constant 0 : index
    %362 = vector.load %arg8[%c0_319, %c0_320] : memref<36x256xf32, #tpu.memory_space<vmem>>, vector<36x256xf32>
    %cst_321 = arith.constant dense<0.000000e+00> : vector<4x256xf32>
    %363 = tpu.matmul %361, %362, %cst_321 {dimension_numbers = #tpu.dot_dimension_numbers<[1], [0], [0], [1], [0, 0, 1, 1], [], []>} : vector<4x36xf32>, vector<36x256xf32>, vector<4x256xf32> -> vector<4x256xf32>
    %c5_322 = arith.constant 5 : index
    %c0_323 = arith.constant 0 : index
    %c0_324 = arith.constant 0 : index
    %364 = vector.load %arg3[%c5_322, %c0_323, %c0_324] : memref<14x4x1xf32, #tpu.memory_space<vmem>>, vector<1x4x1xf32>
    %365 = vector.shape_cast %364 : vector<1x4x1xf32> to vector<4x1xf32>
    %366 = vector.broadcast %365 : vector<4x1xf32> to vector<4x256xf32>
    %367 = arith.addf %363, %366 : vector<4x256xf32>
    %368 = arith.addf %367, %38 : vector<4x256xf32>
    %c0_325 = arith.constant 0 : index
    %c0_326 = arith.constant 0 : index
    %369 = vector.load %arg9[%c0_325, %c0_326] : memref<8x256xf32, #tpu.memory_space<vmem>>, vector<4x256xf32>
    tpu.vector_store %arg9[%c0_325, %c0_326], %258 {strides = array<i32>} : memref<8x256xf32, #tpu.memory_space<vmem>>, vector<4x256xf32>,
    %c4_327 = arith.constant 4 : index
    %c0_328 = arith.constant 0 : index
    %370 = vector.load %arg9[%c4_327, %c0_328] : memref<8x256xf32, #tpu.memory_space<vmem>>, vector<4x256xf32>
    tpu.vector_store %arg9[%c4_327, %c0_328], %368 {strides = array<i32>} : memref<8x256xf32, #tpu.memory_space<vmem>>, vector<4x256xf32>,
    %c0_329 = arith.constant 0 : index
    %c0_330 = arith.constant 0 : index
    %371 = vector.load %arg4[%c0_329, %c0_330] : memref<4x8xf32, #tpu.memory_space<vmem>>, vector<4x8xf32>
    %c0_331 = arith.constant 0 : index
    %c0_332 = arith.constant 0 : index
    %372 = vector.load %arg9[%c0_331, %c0_332] : memref<8x256xf32, #tpu.memory_space<vmem>>, vector<8x256xf32>
    %cst_333 = arith.constant dense<0.000000e+00> : vector<4x256xf32>
    %373 = tpu.matmul %371, %372, %cst_333 {dimension_numbers = #tpu.dot_dimension_numbers<[1], [0], [0], [1], [0, 0, 1, 1], [], []>} : vector<4x8xf32>, vector<8x256xf32>, vector<4x256xf32> -> vector<4x256xf32>
    %c0_334 = arith.constant 0 : index
    %c0_335 = arith.constant 0 : index
    %374 = vector.load %arg5[%c0_334, %c0_335] : memref<4x1xf32, #tpu.memory_space<vmem>>, vector<4x1xf32>
    %375 = vector.broadcast %374 : vector<4x1xf32> to vector<4x256xf32>
    %376 = arith.addf %373, %375 : vector<4x256xf32>
    %c0_336 = arith.constant 0 : index
    %c17_337 = arith.constant 17 : index
    %377 = vector.load %arg7[%c0_336, %c17_337] : memref<4x290xf32, #tpu.memory_space<vmem>>, vector<4x256xf32>
    tpu.vector_store %arg7[%c0_336, %c17_337], %376 {strides = array<i32>} : memref<4x290xf32, #tpu.memory_space<vmem>>, vector<4x256xf32>,
    %c0_338 = arith.constant 0 : index
    %c0_339 = arith.constant 0 : index
    %378 = vector.load %arg7[%c0_338, %c0_339] : memref<4x290xf32, #tpu.memory_space<vmem>>, vector<4x256xf32>
    %cst_340 = arith.constant 0.000000e+00 : f32
    %379 = vector.shape_cast %27 : vector<1x256xi1> to vector<1x256xi1>
    %380 = vector.broadcast %379 : vector<1x256xi1> to vector<4x256xi1>
    %381 = vector.broadcast %cst_340 : f32 to vector<4x256xf32>
    %382 = arith.select %380, %378, %381 : vector<4x256xi1>, vector<4x256xf32>
    %c0_341 = arith.constant 0 : index
    %c0_342 = arith.constant 0 : index
    %383 = vector.load %arg8[%c0_341, %c0_342] : memref<36x256xf32, #tpu.memory_space<vmem>>, vector<4x256xf32>
    tpu.vector_store %arg8[%c0_341, %c0_342], %382 {strides = array<i32>} : memref<36x256xf32, #tpu.memory_space<vmem>>, vector<4x256xf32>,
    %c0_343 = arith.constant 0 : index
    %c1_344 = arith.constant 1 : index
    %384 = vector.load %arg7[%c0_343, %c1_344] : memref<4x290xf32, #tpu.memory_space<vmem>>, vector<4x256xf32>
    %c4_345 = arith.constant 4 : index
    %c0_346 = arith.constant 0 : index
    %385 = vector.load %arg8[%c4_345, %c0_346] : memref<36x256xf32, #tpu.memory_space<vmem>>, vector<4x256xf32>
    tpu.vector_store %arg8[%c4_345, %c0_346], %384 {strides = array<i32>} : memref<36x256xf32, #tpu.memory_space<vmem>>, vector<4x256xf32>,
    %c0_347 = arith.constant 0 : index
    %c2_348 = arith.constant 2 : index
    %386 = vector.load %arg7[%c0_347, %c2_348] : memref<4x290xf32, #tpu.memory_space<vmem>>, vector<4x256xf32>
    %cst_349 = arith.constant 0.000000e+00 : f32
    %387 = vector.shape_cast %36 : vector<1x256xi1> to vector<1x256xi1>
    %388 = vector.broadcast %387 : vector<1x256xi1> to vector<4x256xi1>
    %389 = vector.broadcast %cst_349 : f32 to vector<4x256xf32>
    %390 = arith.select %388, %386, %389 : vector<4x256xi1>, vector<4x256xf32>
    %c8_350 = arith.constant 8 : index
    %c0_351 = arith.constant 0 : index
    %391 = vector.load %arg8[%c8_350, %c0_351] : memref<36x256xf32, #tpu.memory_space<vmem>>, vector<4x256xf32>
    tpu.vector_store %arg8[%c8_350, %c0_351], %390 {strides = array<i32>} : memref<36x256xf32, #tpu.memory_space<vmem>>, vector<4x256xf32>,
    %c0_352 = arith.constant 0 : index
    %c16_353 = arith.constant 16 : index
    %392 = vector.load %arg7[%c0_352, %c16_353] : memref<4x290xf32, #tpu.memory_space<vmem>>, vector<4x256xf32>
    %cst_354 = arith.constant 0.000000e+00 : f32
    %393 = vector.shape_cast %27 : vector<1x256xi1> to vector<1x256xi1>
    %394 = vector.broadcast %393 : vector<1x256xi1> to vector<4x256xi1>
    %395 = vector.broadcast %cst_354 : f32 to vector<4x256xf32>
    %396 = arith.select %394, %392, %395 : vector<4x256xi1>, vector<4x256xf32>
    %c12_355 = arith.constant 12 : index
    %c0_356 = arith.constant 0 : index
    %397 = vector.load %arg8[%c12_355, %c0_356] : memref<36x256xf32, #tpu.memory_space<vmem>>, vector<4x256xf32>
    tpu.vector_store %arg8[%c12_355, %c0_356], %396 {strides = array<i32>} : memref<36x256xf32, #tpu.memory_space<vmem>>, vector<4x256xf32>,
    %c0_357 = arith.constant 0 : index
    %c17_358 = arith.constant 17 : index
    %398 = vector.load %arg7[%c0_357, %c17_358] : memref<4x290xf32, #tpu.memory_space<vmem>>, vector<4x256xf32>
    %c16_359 = arith.constant 16 : index
    %c0_360 = arith.constant 0 : index
    %399 = vector.load %arg8[%c16_359, %c0_360] : memref<36x256xf32, #tpu.memory_space<vmem>>, vector<4x256xf32>
    tpu.vector_store %arg8[%c16_359, %c0_360], %398 {strides = array<i32>} : memref<36x256xf32, #tpu.memory_space<vmem>>, vector<4x256xf32>,
    %c0_361 = arith.constant 0 : index
    %c18_362 = arith.constant 18 : index
    %400 = vector.load %arg7[%c0_361, %c18_362] : memref<4x290xf32, #tpu.memory_space<vmem>>, vector<4x256xf32>
    %cst_363 = arith.constant 0.000000e+00 : f32
    %401 = vector.shape_cast %36 : vector<1x256xi1> to vector<1x256xi1>
    %402 = vector.broadcast %401 : vector<1x256xi1> to vector<4x256xi1>
    %403 = vector.broadcast %cst_363 : f32 to vector<4x256xf32>
    %404 = arith.select %402, %400, %403 : vector<4x256xi1>, vector<4x256xf32>
    %c20_364 = arith.constant 20 : index
    %c0_365 = arith.constant 0 : index
    %405 = vector.load %arg8[%c20_364, %c0_365] : memref<36x256xf32, #tpu.memory_space<vmem>>, vector<4x256xf32>
    tpu.vector_store %arg8[%c20_364, %c0_365], %404 {strides = array<i32>} : memref<36x256xf32, #tpu.memory_space<vmem>>, vector<4x256xf32>,
    %c0_366 = arith.constant 0 : index
    %c32_367 = arith.constant 32 : index
    %406 = vector.load %arg7[%c0_366, %c32_367] : memref<4x290xf32, #tpu.memory_space<vmem>>, vector<4x256xf32>
    %cst_368 = arith.constant 0.000000e+00 : f32
    %407 = vector.shape_cast %27 : vector<1x256xi1> to vector<1x256xi1>
    %408 = vector.broadcast %407 : vector<1x256xi1> to vector<4x256xi1>
    %409 = vector.broadcast %cst_368 : f32 to vector<4x256xf32>
    %410 = arith.select %408, %406, %409 : vector<4x256xi1>, vector<4x256xf32>
    %c24_369 = arith.constant 24 : index
    %c0_370 = arith.constant 0 : index
    %411 = vector.load %arg8[%c24_369, %c0_370] : memref<36x256xf32, #tpu.memory_space<vmem>>, vector<4x256xf32>
    tpu.vector_store %arg8[%c24_369, %c0_370], %410 {strides = array<i32>} : memref<36x256xf32, #tpu.memory_space<vmem>>, vector<4x256xf32>,
    %c0_371 = arith.constant 0 : index
    %c33_372 = arith.constant 33 : index
    %412 = vector.load %arg7[%c0_371, %c33_372] : memref<4x290xf32, #tpu.memory_space<vmem>>, vector<4x256xf32>
    %c28_373 = arith.constant 28 : index
    %c0_374 = arith.constant 0 : index
    %413 = vector.load %arg8[%c28_373, %c0_374] : memref<36x256xf32, #tpu.memory_space<vmem>>, vector<4x256xf32>
    tpu.vector_store %arg8[%c28_373, %c0_374], %412 {strides = array<i32>} : memref<36x256xf32, #tpu.memory_space<vmem>>, vector<4x256xf32>,
    %c0_375 = arith.constant 0 : index
    %c34_376 = arith.constant 34 : index
    %414 = vector.load %arg7[%c0_375, %c34_376] : memref<4x290xf32, #tpu.memory_space<vmem>>, vector<4x256xf32>
    %cst_377 = arith.constant 0.000000e+00 : f32
    %415 = vector.shape_cast %36 : vector<1x256xi1> to vector<1x256xi1>
    %416 = vector.broadcast %415 : vector<1x256xi1> to vector<4x256xi1>
    %417 = vector.broadcast %cst_377 : f32 to vector<4x256xf32>
    %418 = arith.select %416, %414, %417 : vector<4x256xi1>, vector<4x256xf32>
    %c32_378 = arith.constant 32 : index
    %c0_379 = arith.constant 0 : index
    %419 = vector.load %arg8[%c32_378, %c0_379] : memref<36x256xf32, #tpu.memory_space<vmem>>, vector<4x256xf32>
    tpu.vector_store %arg8[%c32_378, %c0_379], %418 {strides = array<i32>} : memref<36x256xf32, #tpu.memory_space<vmem>>, vector<4x256xf32>,
    %c6 = arith.constant 6 : index
    %c0_380 = arith.constant 0 : index
    %c0_381 = arith.constant 0 : index
    %420 = vector.load %arg2[%c6, %c0_380, %c0_381] : memref<14x4x36xf32, #tpu.memory_space<vmem>>, vector<1x4x36xf32>
    %421 = vector.shape_cast %420 : vector<1x4x36xf32> to vector<4x36xf32>
    %c0_382 = arith.constant 0 : index
    %c0_383 = arith.constant 0 : index
    %422 = vector.load %arg8[%c0_382, %c0_383] : memref<36x256xf32, #tpu.memory_space<vmem>>, vector<36x256xf32>
    %cst_384 = arith.constant dense<0.000000e+00> : vector<4x256xf32>
    %423 = tpu.matmul %421, %422, %cst_384 {dimension_numbers = #tpu.dot_dimension_numbers<[1], [0], [0], [1], [0, 0, 1, 1], [], []>} : vector<4x36xf32>, vector<36x256xf32>, vector<4x256xf32> -> vector<4x256xf32>
    %c6_385 = arith.constant 6 : index
    %c0_386 = arith.constant 0 : index
    %c0_387 = arith.constant 0 : index
    %424 = vector.load %arg3[%c6_385, %c0_386, %c0_387] : memref<14x4x1xf32, #tpu.memory_space<vmem>>, vector<1x4x1xf32>
    %425 = vector.shape_cast %424 : vector<1x4x1xf32> to vector<4x1xf32>
    %426 = vector.broadcast %425 : vector<4x1xf32> to vector<4x256xf32>
    %427 = arith.addf %423, %426 : vector<4x256xf32>
    %cst_388 = arith.constant 0.000000e+00 : f32
    %428 = vector.broadcast %cst_388 : f32 to vector<4x256xf32>
    %429 = arith.maximumf %427, %428 : vector<4x256xf32>
    %cst_389 = arith.constant 0.000000e+00 : f32
    %430 = vector.broadcast %cst_389 : f32 to vector<4x256xf32>
    %431 = arith.minimumf %427, %430 : vector<4x256xf32>
    %cst_390 = arith.constant 2.500000e-01 : f32
    %432 = vector.broadcast %cst_390 : f32 to vector<4x256xf32>
    %433 = arith.mulf %432, %431 : vector<4x256xf32>
    %434 = arith.addf %429, %433 : vector<4x256xf32>
    %c0_391 = arith.constant 0 : index
    %c17_392 = arith.constant 17 : index
    %435 = vector.load %arg7[%c0_391, %c17_392] : memref<4x290xf32, #tpu.memory_space<vmem>>, vector<4x256xf32>
    tpu.vector_store %arg7[%c0_391, %c17_392], %434 {strides = array<i32>} : memref<4x290xf32, #tpu.memory_space<vmem>>, vector<4x256xf32>,
    %c0_393 = arith.constant 0 : index
    %c0_394 = arith.constant 0 : index
    %436 = vector.load %arg7[%c0_393, %c0_394] : memref<4x290xf32, #tpu.memory_space<vmem>>, vector<4x256xf32>
    %cst_395 = arith.constant 0.000000e+00 : f32
    %437 = vector.shape_cast %27 : vector<1x256xi1> to vector<1x256xi1>
    %438 = vector.broadcast %437 : vector<1x256xi1> to vector<4x256xi1>
    %439 = vector.broadcast %cst_395 : f32 to vector<4x256xf32>
    %440 = arith.select %438, %436, %439 : vector<4x256xi1>, vector<4x256xf32>
    %c0_396 = arith.constant 0 : index
    %c0_397 = arith.constant 0 : index
    %441 = vector.load %arg8[%c0_396, %c0_397] : memref<36x256xf32, #tpu.memory_space<vmem>>, vector<4x256xf32>
    tpu.vector_store %arg8[%c0_396, %c0_397], %440 {strides = array<i32>} : memref<36x256xf32, #tpu.memory_space<vmem>>, vector<4x256xf32>,
    %c0_398 = arith.constant 0 : index
    %c1_399 = arith.constant 1 : index
    %442 = vector.load %arg7[%c0_398, %c1_399] : memref<4x290xf32, #tpu.memory_space<vmem>>, vector<4x256xf32>
    %c4_400 = arith.constant 4 : index
    %c0_401 = arith.constant 0 : index
    %443 = vector.load %arg8[%c4_400, %c0_401] : memref<36x256xf32, #tpu.memory_space<vmem>>, vector<4x256xf32>
    tpu.vector_store %arg8[%c4_400, %c0_401], %442 {strides = array<i32>} : memref<36x256xf32, #tpu.memory_space<vmem>>, vector<4x256xf32>,
    %c0_402 = arith.constant 0 : index
    %c2_403 = arith.constant 2 : index
    %444 = vector.load %arg7[%c0_402, %c2_403] : memref<4x290xf32, #tpu.memory_space<vmem>>, vector<4x256xf32>
    %cst_404 = arith.constant 0.000000e+00 : f32
    %445 = vector.shape_cast %36 : vector<1x256xi1> to vector<1x256xi1>
    %446 = vector.broadcast %445 : vector<1x256xi1> to vector<4x256xi1>
    %447 = vector.broadcast %cst_404 : f32 to vector<4x256xf32>
    %448 = arith.select %446, %444, %447 : vector<4x256xi1>, vector<4x256xf32>
    %c8_405 = arith.constant 8 : index
    %c0_406 = arith.constant 0 : index
    %449 = vector.load %arg8[%c8_405, %c0_406] : memref<36x256xf32, #tpu.memory_space<vmem>>, vector<4x256xf32>
    tpu.vector_store %arg8[%c8_405, %c0_406], %448 {strides = array<i32>} : memref<36x256xf32, #tpu.memory_space<vmem>>, vector<4x256xf32>,
    %c0_407 = arith.constant 0 : index
    %c16_408 = arith.constant 16 : index
    %450 = vector.load %arg7[%c0_407, %c16_408] : memref<4x290xf32, #tpu.memory_space<vmem>>, vector<4x256xf32>
    %cst_409 = arith.constant 0.000000e+00 : f32
    %451 = vector.shape_cast %27 : vector<1x256xi1> to vector<1x256xi1>
    %452 = vector.broadcast %451 : vector<1x256xi1> to vector<4x256xi1>
    %453 = vector.broadcast %cst_409 : f32 to vector<4x256xf32>
    %454 = arith.select %452, %450, %453 : vector<4x256xi1>, vector<4x256xf32>
    %c12_410 = arith.constant 12 : index
    %c0_411 = arith.constant 0 : index
    %455 = vector.load %arg8[%c12_410, %c0_411] : memref<36x256xf32, #tpu.memory_space<vmem>>, vector<4x256xf32>
    tpu.vector_store %arg8[%c12_410, %c0_411], %454 {strides = array<i32>} : memref<36x256xf32, #tpu.memory_space<vmem>>, vector<4x256xf32>,
    %c0_412 = arith.constant 0 : index
    %c17_413 = arith.constant 17 : index
    %456 = vector.load %arg7[%c0_412, %c17_413] : memref<4x290xf32, #tpu.memory_space<vmem>>, vector<4x256xf32>
    %c16_414 = arith.constant 16 : index
    %c0_415 = arith.constant 0 : index
    %457 = vector.load %arg8[%c16_414, %c0_415] : memref<36x256xf32, #tpu.memory_space<vmem>>, vector<4x256xf32>
    tpu.vector_store %arg8[%c16_414, %c0_415], %456 {strides = array<i32>} : memref<36x256xf32, #tpu.memory_space<vmem>>, vector<4x256xf32>,
    %c0_416 = arith.constant 0 : index
    %c18_417 = arith.constant 18 : index
    %458 = vector.load %arg7[%c0_416, %c18_417] : memref<4x290xf32, #tpu.memory_space<vmem>>, vector<4x256xf32>
    %cst_418 = arith.constant 0.000000e+00 : f32
    %459 = vector.shape_cast %36 : vector<1x256xi1> to vector<1x256xi1>
    %460 = vector.broadcast %459 : vector<1x256xi1> to vector<4x256xi1>
    %461 = vector.broadcast %cst_418 : f32 to vector<4x256xf32>
    %462 = arith.select %460, %458, %461 : vector<4x256xi1>, vector<4x256xf32>
    %c20_419 = arith.constant 20 : index
    %c0_420 = arith.constant 0 : index
    %463 = vector.load %arg8[%c20_419, %c0_420] : memref<36x256xf32, #tpu.memory_space<vmem>>, vector<4x256xf32>
    tpu.vector_store %arg8[%c20_419, %c0_420], %462 {strides = array<i32>} : memref<36x256xf32, #tpu.memory_space<vmem>>, vector<4x256xf32>,
    %c0_421 = arith.constant 0 : index
    %c32_422 = arith.constant 32 : index
    %464 = vector.load %arg7[%c0_421, %c32_422] : memref<4x290xf32, #tpu.memory_space<vmem>>, vector<4x256xf32>
    %cst_423 = arith.constant 0.000000e+00 : f32
    %465 = vector.shape_cast %27 : vector<1x256xi1> to vector<1x256xi1>
    %466 = vector.broadcast %465 : vector<1x256xi1> to vector<4x256xi1>
    %467 = vector.broadcast %cst_423 : f32 to vector<4x256xf32>
    %468 = arith.select %466, %464, %467 : vector<4x256xi1>, vector<4x256xf32>
    %c24_424 = arith.constant 24 : index
    %c0_425 = arith.constant 0 : index
    %469 = vector.load %arg8[%c24_424, %c0_425] : memref<36x256xf32, #tpu.memory_space<vmem>>, vector<4x256xf32>
    tpu.vector_store %arg8[%c24_424, %c0_425], %468 {strides = array<i32>} : memref<36x256xf32, #tpu.memory_space<vmem>>, vector<4x256xf32>,
    %c0_426 = arith.constant 0 : index
    %c33_427 = arith.constant 33 : index
    %470 = vector.load %arg7[%c0_426, %c33_427] : memref<4x290xf32, #tpu.memory_space<vmem>>, vector<4x256xf32>
    %c28_428 = arith.constant 28 : index
    %c0_429 = arith.constant 0 : index
    %471 = vector.load %arg8[%c28_428, %c0_429] : memref<36x256xf32, #tpu.memory_space<vmem>>, vector<4x256xf32>
    tpu.vector_store %arg8[%c28_428, %c0_429], %470 {strides = array<i32>} : memref<36x256xf32, #tpu.memory_space<vmem>>, vector<4x256xf32>,
    %c0_430 = arith.constant 0 : index
    %c34_431 = arith.constant 34 : index
    %472 = vector.load %arg7[%c0_430, %c34_431] : memref<4x290xf32, #tpu.memory_space<vmem>>, vector<4x256xf32>
    %cst_432 = arith.constant 0.000000e+00 : f32
    %473 = vector.shape_cast %36 : vector<1x256xi1> to vector<1x256xi1>
    %474 = vector.broadcast %473 : vector<1x256xi1> to vector<4x256xi1>
    %475 = vector.broadcast %cst_432 : f32 to vector<4x256xf32>
    %476 = arith.select %474, %472, %475 : vector<4x256xi1>, vector<4x256xf32>
    %c32_433 = arith.constant 32 : index
    %c0_434 = arith.constant 0 : index
    %477 = vector.load %arg8[%c32_433, %c0_434] : memref<36x256xf32, #tpu.memory_space<vmem>>, vector<4x256xf32>
    tpu.vector_store %arg8[%c32_433, %c0_434], %476 {strides = array<i32>} : memref<36x256xf32, #tpu.memory_space<vmem>>, vector<4x256xf32>,
    %c7 = arith.constant 7 : index
    %c0_435 = arith.constant 0 : index
    %c0_436 = arith.constant 0 : index
    %478 = vector.load %arg2[%c7, %c0_435, %c0_436] : memref<14x4x36xf32, #tpu.memory_space<vmem>>, vector<1x4x36xf32>
    %479 = vector.shape_cast %478 : vector<1x4x36xf32> to vector<4x36xf32>
    %c0_437 = arith.constant 0 : index
    %c0_438 = arith.constant 0 : index
    %480 = vector.load %arg8[%c0_437, %c0_438] : memref<36x256xf32, #tpu.memory_space<vmem>>, vector<36x256xf32>
    %cst_439 = arith.constant dense<0.000000e+00> : vector<4x256xf32>
    %481 = tpu.matmul %479, %480, %cst_439 {dimension_numbers = #tpu.dot_dimension_numbers<[1], [0], [0], [1], [0, 0, 1, 1], [], []>} : vector<4x36xf32>, vector<36x256xf32>, vector<4x256xf32> -> vector<4x256xf32>
    %c7_440 = arith.constant 7 : index
    %c0_441 = arith.constant 0 : index
    %c0_442 = arith.constant 0 : index
    %482 = vector.load %arg3[%c7_440, %c0_441, %c0_442] : memref<14x4x1xf32, #tpu.memory_space<vmem>>, vector<1x4x1xf32>
    %483 = vector.shape_cast %482 : vector<1x4x1xf32> to vector<4x1xf32>
    %484 = vector.broadcast %483 : vector<4x1xf32> to vector<4x256xf32>
    %485 = arith.addf %481, %484 : vector<4x256xf32>
    %486 = arith.addf %485, %376 : vector<4x256xf32>
    %c0_443 = arith.constant 0 : index
    %c17_444 = arith.constant 17 : index
    %487 = vector.load %arg7[%c0_443, %c17_444] : memref<4x290xf32, #tpu.memory_space<vmem>>, vector<4x256xf32>
    tpu.vector_store %arg7[%c0_443, %c17_444], %486 {strides = array<i32>} : memref<4x290xf32, #tpu.memory_space<vmem>>, vector<4x256xf32>,
    %c0_445 = arith.constant 0 : index
    %c0_446 = arith.constant 0 : index
    %488 = vector.load %arg7[%c0_445, %c0_446] : memref<4x290xf32, #tpu.memory_space<vmem>>, vector<4x256xf32>
    %cst_447 = arith.constant 0.000000e+00 : f32
    %489 = vector.shape_cast %27 : vector<1x256xi1> to vector<1x256xi1>
    %490 = vector.broadcast %489 : vector<1x256xi1> to vector<4x256xi1>
    %491 = vector.broadcast %cst_447 : f32 to vector<4x256xf32>
    %492 = arith.select %490, %488, %491 : vector<4x256xi1>, vector<4x256xf32>
    %c0_448 = arith.constant 0 : index
    %c0_449 = arith.constant 0 : index
    %493 = vector.load %arg8[%c0_448, %c0_449] : memref<36x256xf32, #tpu.memory_space<vmem>>, vector<4x256xf32>
    tpu.vector_store %arg8[%c0_448, %c0_449], %492 {strides = array<i32>} : memref<36x256xf32, #tpu.memory_space<vmem>>, vector<4x256xf32>,
    %c0_450 = arith.constant 0 : index
    %c1_451 = arith.constant 1 : index
    %494 = vector.load %arg7[%c0_450, %c1_451] : memref<4x290xf32, #tpu.memory_space<vmem>>, vector<4x256xf32>
    %c4_452 = arith.constant 4 : index
    %c0_453 = arith.constant 0 : index
    %495 = vector.load %arg8[%c4_452, %c0_453] : memref<36x256xf32, #tpu.memory_space<vmem>>, vector<4x256xf32>
    tpu.vector_store %arg8[%c4_452, %c0_453], %494 {strides = array<i32>} : memref<36x256xf32, #tpu.memory_space<vmem>>, vector<4x256xf32>,
    %c0_454 = arith.constant 0 : index
    %c2_455 = arith.constant 2 : index
    %496 = vector.load %arg7[%c0_454, %c2_455] : memref<4x290xf32, #tpu.memory_space<vmem>>, vector<4x256xf32>
    %cst_456 = arith.constant 0.000000e+00 : f32
    %497 = vector.shape_cast %36 : vector<1x256xi1> to vector<1x256xi1>
    %498 = vector.broadcast %497 : vector<1x256xi1> to vector<4x256xi1>
    %499 = vector.broadcast %cst_456 : f32 to vector<4x256xf32>
    %500 = arith.select %498, %496, %499 : vector<4x256xi1>, vector<4x256xf32>
    %c8_457 = arith.constant 8 : index
    %c0_458 = arith.constant 0 : index
    %501 = vector.load %arg8[%c8_457, %c0_458] : memref<36x256xf32, #tpu.memory_space<vmem>>, vector<4x256xf32>
    tpu.vector_store %arg8[%c8_457, %c0_458], %500 {strides = array<i32>} : memref<36x256xf32, #tpu.memory_space<vmem>>, vector<4x256xf32>,
    %c0_459 = arith.constant 0 : index
    %c16_460 = arith.constant 16 : index
    %502 = vector.load %arg7[%c0_459, %c16_460] : memref<4x290xf32, #tpu.memory_space<vmem>>, vector<4x256xf32>
    %cst_461 = arith.constant 0.000000e+00 : f32
    %503 = vector.shape_cast %27 : vector<1x256xi1> to vector<1x256xi1>
    %504 = vector.broadcast %503 : vector<1x256xi1> to vector<4x256xi1>
    %505 = vector.broadcast %cst_461 : f32 to vector<4x256xf32>
    %506 = arith.select %504, %502, %505 : vector<4x256xi1>, vector<4x256xf32>
    %c12_462 = arith.constant 12 : index
    %c0_463 = arith.constant 0 : index
    %507 = vector.load %arg8[%c12_462, %c0_463] : memref<36x256xf32, #tpu.memory_space<vmem>>, vector<4x256xf32>
    tpu.vector_store %arg8[%c12_462, %c0_463], %506 {strides = array<i32>} : memref<36x256xf32, #tpu.memory_space<vmem>>, vector<4x256xf32>,
    %c0_464 = arith.constant 0 : index
    %c17_465 = arith.constant 17 : index
    %508 = vector.load %arg7[%c0_464, %c17_465] : memref<4x290xf32, #tpu.memory_space<vmem>>, vector<4x256xf32>
    %c16_466 = arith.constant 16 : index
    %c0_467 = arith.constant 0 : index
    %509 = vector.load %arg8[%c16_466, %c0_467] : memref<36x256xf32, #tpu.memory_space<vmem>>, vector<4x256xf32>
    tpu.vector_store %arg8[%c16_466, %c0_467], %508 {strides = array<i32>} : memref<36x256xf32, #tpu.memory_space<vmem>>, vector<4x256xf32>,
    %c0_468 = arith.constant 0 : index
    %c18_469 = arith.constant 18 : index
    %510 = vector.load %arg7[%c0_468, %c18_469] : memref<4x290xf32, #tpu.memory_space<vmem>>, vector<4x256xf32>
    %cst_470 = arith.constant 0.000000e+00 : f32
    %511 = vector.shape_cast %36 : vector<1x256xi1> to vector<1x256xi1>
    %512 = vector.broadcast %511 : vector<1x256xi1> to vector<4x256xi1>
    %513 = vector.broadcast %cst_470 : f32 to vector<4x256xf32>
    %514 = arith.select %512, %510, %513 : vector<4x256xi1>, vector<4x256xf32>
    %c20_471 = arith.constant 20 : index
    %c0_472 = arith.constant 0 : index
    %515 = vector.load %arg8[%c20_471, %c0_472] : memref<36x256xf32, #tpu.memory_space<vmem>>, vector<4x256xf32>
    tpu.vector_store %arg8[%c20_471, %c0_472], %514 {strides = array<i32>} : memref<36x256xf32, #tpu.memory_space<vmem>>, vector<4x256xf32>,
    %c0_473 = arith.constant 0 : index
    %c32_474 = arith.constant 32 : index
    %516 = vector.load %arg7[%c0_473, %c32_474] : memref<4x290xf32, #tpu.memory_space<vmem>>, vector<4x256xf32>
    %cst_475 = arith.constant 0.000000e+00 : f32
    %517 = vector.shape_cast %27 : vector<1x256xi1> to vector<1x256xi1>
    %518 = vector.broadcast %517 : vector<1x256xi1> to vector<4x256xi1>
    %519 = vector.broadcast %cst_475 : f32 to vector<4x256xf32>
    %520 = arith.select %518, %516, %519 : vector<4x256xi1>, vector<4x256xf32>
    %c24_476 = arith.constant 24 : index
    %c0_477 = arith.constant 0 : index
    %521 = vector.load %arg8[%c24_476, %c0_477] : memref<36x256xf32, #tpu.memory_space<vmem>>, vector<4x256xf32>
    tpu.vector_store %arg8[%c24_476, %c0_477], %520 {strides = array<i32>} : memref<36x256xf32, #tpu.memory_space<vmem>>, vector<4x256xf32>,
    %c0_478 = arith.constant 0 : index
    %c33_479 = arith.constant 33 : index
    %522 = vector.load %arg7[%c0_478, %c33_479] : memref<4x290xf32, #tpu.memory_space<vmem>>, vector<4x256xf32>
    %c28_480 = arith.constant 28 : index
    %c0_481 = arith.constant 0 : index
    %523 = vector.load %arg8[%c28_480, %c0_481] : memref<36x256xf32, #tpu.memory_space<vmem>>, vector<4x256xf32>
    tpu.vector_store %arg8[%c28_480, %c0_481], %522 {strides = array<i32>} : memref<36x256xf32, #tpu.memory_space<vmem>>, vector<4x256xf32>,
    %c0_482 = arith.constant 0 : index
    %c34_483 = arith.constant 34 : index
    %524 = vector.load %arg7[%c0_482, %c34_483] : memref<4x290xf32, #tpu.memory_space<vmem>>, vector<4x256xf32>
    %cst_484 = arith.constant 0.000000e+00 : f32
    %525 = vector.shape_cast %36 : vector<1x256xi1> to vector<1x256xi1>
    %526 = vector.broadcast %525 : vector<1x256xi1> to vector<4x256xi1>
    %527 = vector.broadcast %cst_484 : f32 to vector<4x256xf32>
    %528 = arith.select %526, %524, %527 : vector<4x256xi1>, vector<4x256xf32>
    %c32_485 = arith.constant 32 : index
    %c0_486 = arith.constant 0 : index
    %529 = vector.load %arg8[%c32_485, %c0_486] : memref<36x256xf32, #tpu.memory_space<vmem>>, vector<4x256xf32>
    tpu.vector_store %arg8[%c32_485, %c0_486], %528 {strides = array<i32>} : memref<36x256xf32, #tpu.memory_space<vmem>>, vector<4x256xf32>,
    %c8_487 = arith.constant 8 : index
    %c0_488 = arith.constant 0 : index
    %c0_489 = arith.constant 0 : index
    %530 = vector.load %arg2[%c8_487, %c0_488, %c0_489] : memref<14x4x36xf32, #tpu.memory_space<vmem>>, vector<1x4x36xf32>
    %531 = vector.shape_cast %530 : vector<1x4x36xf32> to vector<4x36xf32>
    %c0_490 = arith.constant 0 : index
    %c0_491 = arith.constant 0 : index
    %532 = vector.load %arg8[%c0_490, %c0_491] : memref<36x256xf32, #tpu.memory_space<vmem>>, vector<36x256xf32>
    %cst_492 = arith.constant dense<0.000000e+00> : vector<4x256xf32>
    %533 = tpu.matmul %531, %532, %cst_492 {dimension_numbers = #tpu.dot_dimension_numbers<[1], [0], [0], [1], [0, 0, 1, 1], [], []>} : vector<4x36xf32>, vector<36x256xf32>, vector<4x256xf32> -> vector<4x256xf32>
    %c8_493 = arith.constant 8 : index
    %c0_494 = arith.constant 0 : index
    %c0_495 = arith.constant 0 : index
    %534 = vector.load %arg3[%c8_493, %c0_494, %c0_495] : memref<14x4x1xf32, #tpu.memory_space<vmem>>, vector<1x4x1xf32>
    %535 = vector.shape_cast %534 : vector<1x4x1xf32> to vector<4x1xf32>
    %536 = vector.broadcast %535 : vector<4x1xf32> to vector<4x256xf32>
    %537 = arith.addf %533, %536 : vector<4x256xf32>
    %cst_496 = arith.constant 0.000000e+00 : f32
    %538 = vector.broadcast %cst_496 : f32 to vector<4x256xf32>
    %539 = arith.maximumf %537, %538 : vector<4x256xf32>
    %cst_497 = arith.constant 0.000000e+00 : f32
    %540 = vector.broadcast %cst_497 : f32 to vector<4x256xf32>
    %541 = arith.minimumf %537, %540 : vector<4x256xf32>
    %cst_498 = arith.constant 2.500000e-01 : f32
    %542 = vector.broadcast %cst_498 : f32 to vector<4x256xf32>
    %543 = arith.mulf %542, %541 : vector<4x256xf32>
    %544 = arith.addf %539, %543 : vector<4x256xf32>
    %c0_499 = arith.constant 0 : index
    %c17_500 = arith.constant 17 : index
    %545 = vector.load %arg7[%c0_499, %c17_500] : memref<4x290xf32, #tpu.memory_space<vmem>>, vector<4x256xf32>
    tpu.vector_store %arg7[%c0_499, %c17_500], %544 {strides = array<i32>} : memref<4x290xf32, #tpu.memory_space<vmem>>, vector<4x256xf32>,
    %c0_501 = arith.constant 0 : index
    %c0_502 = arith.constant 0 : index
    %546 = vector.load %arg7[%c0_501, %c0_502] : memref<4x290xf32, #tpu.memory_space<vmem>>, vector<4x256xf32>
    %cst_503 = arith.constant 0.000000e+00 : f32
    %547 = vector.shape_cast %27 : vector<1x256xi1> to vector<1x256xi1>
    %548 = vector.broadcast %547 : vector<1x256xi1> to vector<4x256xi1>
    %549 = vector.broadcast %cst_503 : f32 to vector<4x256xf32>
    %550 = arith.select %548, %546, %549 : vector<4x256xi1>, vector<4x256xf32>
    %c0_504 = arith.constant 0 : index
    %c0_505 = arith.constant 0 : index
    %551 = vector.load %arg8[%c0_504, %c0_505] : memref<36x256xf32, #tpu.memory_space<vmem>>, vector<4x256xf32>
    tpu.vector_store %arg8[%c0_504, %c0_505], %550 {strides = array<i32>} : memref<36x256xf32, #tpu.memory_space<vmem>>, vector<4x256xf32>,
    %c0_506 = arith.constant 0 : index
    %c1_507 = arith.constant 1 : index
    %552 = vector.load %arg7[%c0_506, %c1_507] : memref<4x290xf32, #tpu.memory_space<vmem>>, vector<4x256xf32>
    %c4_508 = arith.constant 4 : index
    %c0_509 = arith.constant 0 : index
    %553 = vector.load %arg8[%c4_508, %c0_509] : memref<36x256xf32, #tpu.memory_space<vmem>>, vector<4x256xf32>
    tpu.vector_store %arg8[%c4_508, %c0_509], %552 {strides = array<i32>} : memref<36x256xf32, #tpu.memory_space<vmem>>, vector<4x256xf32>,
    %c0_510 = arith.constant 0 : index
    %c2_511 = arith.constant 2 : index
    %554 = vector.load %arg7[%c0_510, %c2_511] : memref<4x290xf32, #tpu.memory_space<vmem>>, vector<4x256xf32>
    %cst_512 = arith.constant 0.000000e+00 : f32
    %555 = vector.shape_cast %36 : vector<1x256xi1> to vector<1x256xi1>
    %556 = vector.broadcast %555 : vector<1x256xi1> to vector<4x256xi1>
    %557 = vector.broadcast %cst_512 : f32 to vector<4x256xf32>
    %558 = arith.select %556, %554, %557 : vector<4x256xi1>, vector<4x256xf32>
    %c8_513 = arith.constant 8 : index
    %c0_514 = arith.constant 0 : index
    %559 = vector.load %arg8[%c8_513, %c0_514] : memref<36x256xf32, #tpu.memory_space<vmem>>, vector<4x256xf32>
    tpu.vector_store %arg8[%c8_513, %c0_514], %558 {strides = array<i32>} : memref<36x256xf32, #tpu.memory_space<vmem>>, vector<4x256xf32>,
    %c0_515 = arith.constant 0 : index
    %c16_516 = arith.constant 16 : index
    %560 = vector.load %arg7[%c0_515, %c16_516] : memref<4x290xf32, #tpu.memory_space<vmem>>, vector<4x256xf32>
    %cst_517 = arith.constant 0.000000e+00 : f32
    %561 = vector.shape_cast %27 : vector<1x256xi1> to vector<1x256xi1>
    %562 = vector.broadcast %561 : vector<1x256xi1> to vector<4x256xi1>
    %563 = vector.broadcast %cst_517 : f32 to vector<4x256xf32>
    %564 = arith.select %562, %560, %563 : vector<4x256xi1>, vector<4x256xf32>
    %c12_518 = arith.constant 12 : index
    %c0_519 = arith.constant 0 : index
    %565 = vector.load %arg8[%c12_518, %c0_519] : memref<36x256xf32, #tpu.memory_space<vmem>>, vector<4x256xf32>
    tpu.vector_store %arg8[%c12_518, %c0_519], %564 {strides = array<i32>} : memref<36x256xf32, #tpu.memory_space<vmem>>, vector<4x256xf32>,
    %c0_520 = arith.constant 0 : index
    %c17_521 = arith.constant 17 : index
    %566 = vector.load %arg7[%c0_520, %c17_521] : memref<4x290xf32, #tpu.memory_space<vmem>>, vector<4x256xf32>
    %c16_522 = arith.constant 16 : index
    %c0_523 = arith.constant 0 : index
    %567 = vector.load %arg8[%c16_522, %c0_523] : memref<36x256xf32, #tpu.memory_space<vmem>>, vector<4x256xf32>
    tpu.vector_store %arg8[%c16_522, %c0_523], %566 {strides = array<i32>} : memref<36x256xf32, #tpu.memory_space<vmem>>, vector<4x256xf32>,
    %c0_524 = arith.constant 0 : index
    %c18_525 = arith.constant 18 : index
    %568 = vector.load %arg7[%c0_524, %c18_525] : memref<4x290xf32, #tpu.memory_space<vmem>>, vector<4x256xf32>
    %cst_526 = arith.constant 0.000000e+00 : f32
    %569 = vector.shape_cast %36 : vector<1x256xi1> to vector<1x256xi1>
    %570 = vector.broadcast %569 : vector<1x256xi1> to vector<4x256xi1>
    %571 = vector.broadcast %cst_526 : f32 to vector<4x256xf32>
    %572 = arith.select %570, %568, %571 : vector<4x256xi1>, vector<4x256xf32>
    %c20_527 = arith.constant 20 : index
    %c0_528 = arith.constant 0 : index
    %573 = vector.load %arg8[%c20_527, %c0_528] : memref<36x256xf32, #tpu.memory_space<vmem>>, vector<4x256xf32>
    tpu.vector_store %arg8[%c20_527, %c0_528], %572 {strides = array<i32>} : memref<36x256xf32, #tpu.memory_space<vmem>>, vector<4x256xf32>,
    %c0_529 = arith.constant 0 : index
    %c32_530 = arith.constant 32 : index
    %574 = vector.load %arg7[%c0_529, %c32_530] : memref<4x290xf32, #tpu.memory_space<vmem>>, vector<4x256xf32>
    %cst_531 = arith.constant 0.000000e+00 : f32
    %575 = vector.shape_cast %27 : vector<1x256xi1> to vector<1x256xi1>
    %576 = vector.broadcast %575 : vector<1x256xi1> to vector<4x256xi1>
    %577 = vector.broadcast %cst_531 : f32 to vector<4x256xf32>
    %578 = arith.select %576, %574, %577 : vector<4x256xi1>, vector<4x256xf32>
    %c24_532 = arith.constant 24 : index
    %c0_533 = arith.constant 0 : index
    %579 = vector.load %arg8[%c24_532, %c0_533] : memref<36x256xf32, #tpu.memory_space<vmem>>, vector<4x256xf32>
    tpu.vector_store %arg8[%c24_532, %c0_533], %578 {strides = array<i32>} : memref<36x256xf32, #tpu.memory_space<vmem>>, vector<4x256xf32>,
    %c0_534 = arith.constant 0 : index
    %c33_535 = arith.constant 33 : index
    %580 = vector.load %arg7[%c0_534, %c33_535] : memref<4x290xf32, #tpu.memory_space<vmem>>, vector<4x256xf32>
    %c28_536 = arith.constant 28 : index
    %c0_537 = arith.constant 0 : index
    %581 = vector.load %arg8[%c28_536, %c0_537] : memref<36x256xf32, #tpu.memory_space<vmem>>, vector<4x256xf32>
    tpu.vector_store %arg8[%c28_536, %c0_537], %580 {strides = array<i32>} : memref<36x256xf32, #tpu.memory_space<vmem>>, vector<4x256xf32>,
    %c0_538 = arith.constant 0 : index
    %c34_539 = arith.constant 34 : index
    %582 = vector.load %arg7[%c0_538, %c34_539] : memref<4x290xf32, #tpu.memory_space<vmem>>, vector<4x256xf32>
    %cst_540 = arith.constant 0.000000e+00 : f32
    %583 = vector.shape_cast %36 : vector<1x256xi1> to vector<1x256xi1>
    %584 = vector.broadcast %583 : vector<1x256xi1> to vector<4x256xi1>
    %585 = vector.broadcast %cst_540 : f32 to vector<4x256xf32>
    %586 = arith.select %584, %582, %585 : vector<4x256xi1>, vector<4x256xf32>
    %c32_541 = arith.constant 32 : index
    %c0_542 = arith.constant 0 : index
    %587 = vector.load %arg8[%c32_541, %c0_542] : memref<36x256xf32, #tpu.memory_space<vmem>>, vector<4x256xf32>
    tpu.vector_store %arg8[%c32_541, %c0_542], %586 {strides = array<i32>} : memref<36x256xf32, #tpu.memory_space<vmem>>, vector<4x256xf32>,
    %c9 = arith.constant 9 : index
    %c0_543 = arith.constant 0 : index
    %c0_544 = arith.constant 0 : index
    %588 = vector.load %arg2[%c9, %c0_543, %c0_544] : memref<14x4x36xf32, #tpu.memory_space<vmem>>, vector<1x4x36xf32>
    %589 = vector.shape_cast %588 : vector<1x4x36xf32> to vector<4x36xf32>
    %c0_545 = arith.constant 0 : index
    %c0_546 = arith.constant 0 : index
    %590 = vector.load %arg8[%c0_545, %c0_546] : memref<36x256xf32, #tpu.memory_space<vmem>>, vector<36x256xf32>
    %cst_547 = arith.constant dense<0.000000e+00> : vector<4x256xf32>
    %591 = tpu.matmul %589, %590, %cst_547 {dimension_numbers = #tpu.dot_dimension_numbers<[1], [0], [0], [1], [0, 0, 1, 1], [], []>} : vector<4x36xf32>, vector<36x256xf32>, vector<4x256xf32> -> vector<4x256xf32>
    %c9_548 = arith.constant 9 : index
    %c0_549 = arith.constant 0 : index
    %c0_550 = arith.constant 0 : index
    %592 = vector.load %arg3[%c9_548, %c0_549, %c0_550] : memref<14x4x1xf32, #tpu.memory_space<vmem>>, vector<1x4x1xf32>
    %593 = vector.shape_cast %592 : vector<1x4x1xf32> to vector<4x1xf32>
    %594 = vector.broadcast %593 : vector<4x1xf32> to vector<4x256xf32>
    %595 = arith.addf %591, %594 : vector<4x256xf32>
    %596 = arith.addf %595, %486 : vector<4x256xf32>
    %c0_551 = arith.constant 0 : index
    %c17_552 = arith.constant 17 : index
    %597 = vector.load %arg7[%c0_551, %c17_552] : memref<4x290xf32, #tpu.memory_space<vmem>>, vector<4x256xf32>
    tpu.vector_store %arg7[%c0_551, %c17_552], %376 {strides = array<i32>} : memref<4x290xf32, #tpu.memory_space<vmem>>, vector<4x256xf32>,
    %c0_553 = arith.constant 0 : index
    %c0_554 = arith.constant 0 : index
    %598 = vector.load %arg7[%c0_553, %c0_554] : memref<4x290xf32, #tpu.memory_space<vmem>>, vector<4x256xf32>
    %cst_555 = arith.constant 0.000000e+00 : f32
    %599 = vector.shape_cast %27 : vector<1x256xi1> to vector<1x256xi1>
    %600 = vector.broadcast %599 : vector<1x256xi1> to vector<4x256xi1>
    %601 = vector.broadcast %cst_555 : f32 to vector<4x256xf32>
    %602 = arith.select %600, %598, %601 : vector<4x256xi1>, vector<4x256xf32>
    %c0_556 = arith.constant 0 : index
    %c0_557 = arith.constant 0 : index
    %603 = vector.load %arg8[%c0_556, %c0_557] : memref<36x256xf32, #tpu.memory_space<vmem>>, vector<4x256xf32>
    tpu.vector_store %arg8[%c0_556, %c0_557], %602 {strides = array<i32>} : memref<36x256xf32, #tpu.memory_space<vmem>>, vector<4x256xf32>,
    %c0_558 = arith.constant 0 : index
    %c1_559 = arith.constant 1 : index
    %604 = vector.load %arg7[%c0_558, %c1_559] : memref<4x290xf32, #tpu.memory_space<vmem>>, vector<4x256xf32>
    %c4_560 = arith.constant 4 : index
    %c0_561 = arith.constant 0 : index
    %605 = vector.load %arg8[%c4_560, %c0_561] : memref<36x256xf32, #tpu.memory_space<vmem>>, vector<4x256xf32>
    tpu.vector_store %arg8[%c4_560, %c0_561], %604 {strides = array<i32>} : memref<36x256xf32, #tpu.memory_space<vmem>>, vector<4x256xf32>,
    %c0_562 = arith.constant 0 : index
    %c2_563 = arith.constant 2 : index
    %606 = vector.load %arg7[%c0_562, %c2_563] : memref<4x290xf32, #tpu.memory_space<vmem>>, vector<4x256xf32>
    %cst_564 = arith.constant 0.000000e+00 : f32
    %607 = vector.shape_cast %36 : vector<1x256xi1> to vector<1x256xi1>
    %608 = vector.broadcast %607 : vector<1x256xi1> to vector<4x256xi1>
    %609 = vector.broadcast %cst_564 : f32 to vector<4x256xf32>
    %610 = arith.select %608, %606, %609 : vector<4x256xi1>, vector<4x256xf32>
    %c8_565 = arith.constant 8 : index
    %c0_566 = arith.constant 0 : index
    %611 = vector.load %arg8[%c8_565, %c0_566] : memref<36x256xf32, #tpu.memory_space<vmem>>, vector<4x256xf32>
    tpu.vector_store %arg8[%c8_565, %c0_566], %610 {strides = array<i32>} : memref<36x256xf32, #tpu.memory_space<vmem>>, vector<4x256xf32>,
    %c0_567 = arith.constant 0 : index
    %c16_568 = arith.constant 16 : index
    %612 = vector.load %arg7[%c0_567, %c16_568] : memref<4x290xf32, #tpu.memory_space<vmem>>, vector<4x256xf32>
    %cst_569 = arith.constant 0.000000e+00 : f32
    %613 = vector.shape_cast %27 : vector<1x256xi1> to vector<1x256xi1>
    %614 = vector.broadcast %613 : vector<1x256xi1> to vector<4x256xi1>
    %615 = vector.broadcast %cst_569 : f32 to vector<4x256xf32>
    %616 = arith.select %614, %612, %615 : vector<4x256xi1>, vector<4x256xf32>
    %c12_570 = arith.constant 12 : index
    %c0_571 = arith.constant 0 : index
    %617 = vector.load %arg8[%c12_570, %c0_571] : memref<36x256xf32, #tpu.memory_space<vmem>>, vector<4x256xf32>
    tpu.vector_store %arg8[%c12_570, %c0_571], %616 {strides = array<i32>} : memref<36x256xf32, #tpu.memory_space<vmem>>, vector<4x256xf32>,
    %c0_572 = arith.constant 0 : index
    %c17_573 = arith.constant 17 : index
    %618 = vector.load %arg7[%c0_572, %c17_573] : memref<4x290xf32, #tpu.memory_space<vmem>>, vector<4x256xf32>
    %c16_574 = arith.constant 16 : index
    %c0_575 = arith.constant 0 : index
    %619 = vector.load %arg8[%c16_574, %c0_575] : memref<36x256xf32, #tpu.memory_space<vmem>>, vector<4x256xf32>
    tpu.vector_store %arg8[%c16_574, %c0_575], %618 {strides = array<i32>} : memref<36x256xf32, #tpu.memory_space<vmem>>, vector<4x256xf32>,
    %c0_576 = arith.constant 0 : index
    %c18_577 = arith.constant 18 : index
    %620 = vector.load %arg7[%c0_576, %c18_577] : memref<4x290xf32, #tpu.memory_space<vmem>>, vector<4x256xf32>
    %cst_578 = arith.constant 0.000000e+00 : f32
    %621 = vector.shape_cast %36 : vector<1x256xi1> to vector<1x256xi1>
    %622 = vector.broadcast %621 : vector<1x256xi1> to vector<4x256xi1>
    %623 = vector.broadcast %cst_578 : f32 to vector<4x256xf32>
    %624 = arith.select %622, %620, %623 : vector<4x256xi1>, vector<4x256xf32>
    %c20_579 = arith.constant 20 : index
    %c0_580 = arith.constant 0 : index
    %625 = vector.load %arg8[%c20_579, %c0_580] : memref<36x256xf32, #tpu.memory_space<vmem>>, vector<4x256xf32>
    tpu.vector_store %arg8[%c20_579, %c0_580], %624 {strides = array<i32>} : memref<36x256xf32, #tpu.memory_space<vmem>>, vector<4x256xf32>,
    %c0_581 = arith.constant 0 : index
    %c32_582 = arith.constant 32 : index
    %626 = vector.load %arg7[%c0_581, %c32_582] : memref<4x290xf32, #tpu.memory_space<vmem>>, vector<4x256xf32>
    %cst_583 = arith.constant 0.000000e+00 : f32
    %627 = vector.shape_cast %27 : vector<1x256xi1> to vector<1x256xi1>
    %628 = vector.broadcast %627 : vector<1x256xi1> to vector<4x256xi1>
    %629 = vector.broadcast %cst_583 : f32 to vector<4x256xf32>
    %630 = arith.select %628, %626, %629 : vector<4x256xi1>, vector<4x256xf32>
    %c24_584 = arith.constant 24 : index
    %c0_585 = arith.constant 0 : index
    %631 = vector.load %arg8[%c24_584, %c0_585] : memref<36x256xf32, #tpu.memory_space<vmem>>, vector<4x256xf32>
    tpu.vector_store %arg8[%c24_584, %c0_585], %630 {strides = array<i32>} : memref<36x256xf32, #tpu.memory_space<vmem>>, vector<4x256xf32>,
    %c0_586 = arith.constant 0 : index
    %c33_587 = arith.constant 33 : index
    %632 = vector.load %arg7[%c0_586, %c33_587] : memref<4x290xf32, #tpu.memory_space<vmem>>, vector<4x256xf32>
    %c28_588 = arith.constant 28 : index
    %c0_589 = arith.constant 0 : index
    %633 = vector.load %arg8[%c28_588, %c0_589] : memref<36x256xf32, #tpu.memory_space<vmem>>, vector<4x256xf32>
    tpu.vector_store %arg8[%c28_588, %c0_589], %632 {strides = array<i32>} : memref<36x256xf32, #tpu.memory_space<vmem>>, vector<4x256xf32>,
    %c0_590 = arith.constant 0 : index
    %c34_591 = arith.constant 34 : index
    %634 = vector.load %arg7[%c0_590, %c34_591] : memref<4x290xf32, #tpu.memory_space<vmem>>, vector<4x256xf32>
    %cst_592 = arith.constant 0.000000e+00 : f32
    %635 = vector.shape_cast %36 : vector<1x256xi1> to vector<1x256xi1>
    %636 = vector.broadcast %635 : vector<1x256xi1> to vector<4x256xi1>
    %637 = vector.broadcast %cst_592 : f32 to vector<4x256xf32>
    %638 = arith.select %636, %634, %637 : vector<4x256xi1>, vector<4x256xf32>
    %c32_593 = arith.constant 32 : index
    %c0_594 = arith.constant 0 : index
    %639 = vector.load %arg8[%c32_593, %c0_594] : memref<36x256xf32, #tpu.memory_space<vmem>>, vector<4x256xf32>
    tpu.vector_store %arg8[%c32_593, %c0_594], %638 {strides = array<i32>} : memref<36x256xf32, #tpu.memory_space<vmem>>, vector<4x256xf32>,
    %c10 = arith.constant 10 : index
    %c0_595 = arith.constant 0 : index
    %c0_596 = arith.constant 0 : index
    %640 = vector.load %arg2[%c10, %c0_595, %c0_596] : memref<14x4x36xf32, #tpu.memory_space<vmem>>, vector<1x4x36xf32>
    %641 = vector.shape_cast %640 : vector<1x4x36xf32> to vector<4x36xf32>
    %c0_597 = arith.constant 0 : index
    %c0_598 = arith.constant 0 : index
    %642 = vector.load %arg8[%c0_597, %c0_598] : memref<36x256xf32, #tpu.memory_space<vmem>>, vector<36x256xf32>
    %cst_599 = arith.constant dense<0.000000e+00> : vector<4x256xf32>
    %643 = tpu.matmul %641, %642, %cst_599 {dimension_numbers = #tpu.dot_dimension_numbers<[1], [0], [0], [1], [0, 0, 1, 1], [], []>} : vector<4x36xf32>, vector<36x256xf32>, vector<4x256xf32> -> vector<4x256xf32>
    %c10_600 = arith.constant 10 : index
    %c0_601 = arith.constant 0 : index
    %c0_602 = arith.constant 0 : index
    %644 = vector.load %arg3[%c10_600, %c0_601, %c0_602] : memref<14x4x1xf32, #tpu.memory_space<vmem>>, vector<1x4x1xf32>
    %645 = vector.shape_cast %644 : vector<1x4x1xf32> to vector<4x1xf32>
    %646 = vector.broadcast %645 : vector<4x1xf32> to vector<4x256xf32>
    %647 = arith.addf %643, %646 : vector<4x256xf32>
    %cst_603 = arith.constant 0.000000e+00 : f32
    %648 = vector.broadcast %cst_603 : f32 to vector<4x256xf32>
    %649 = arith.maximumf %647, %648 : vector<4x256xf32>
    %cst_604 = arith.constant 0.000000e+00 : f32
    %650 = vector.broadcast %cst_604 : f32 to vector<4x256xf32>
    %651 = arith.minimumf %647, %650 : vector<4x256xf32>
    %cst_605 = arith.constant 2.500000e-01 : f32
    %652 = vector.broadcast %cst_605 : f32 to vector<4x256xf32>
    %653 = arith.mulf %652, %651 : vector<4x256xf32>
    %654 = arith.addf %649, %653 : vector<4x256xf32>
    %c0_606 = arith.constant 0 : index
    %c17_607 = arith.constant 17 : index
    %655 = vector.load %arg7[%c0_606, %c17_607] : memref<4x290xf32, #tpu.memory_space<vmem>>, vector<4x256xf32>
    tpu.vector_store %arg7[%c0_606, %c17_607], %654 {strides = array<i32>} : memref<4x290xf32, #tpu.memory_space<vmem>>, vector<4x256xf32>,
    %c0_608 = arith.constant 0 : index
    %c0_609 = arith.constant 0 : index
    %656 = vector.load %arg7[%c0_608, %c0_609] : memref<4x290xf32, #tpu.memory_space<vmem>>, vector<4x256xf32>
    %cst_610 = arith.constant 0.000000e+00 : f32
    %657 = vector.shape_cast %27 : vector<1x256xi1> to vector<1x256xi1>
    %658 = vector.broadcast %657 : vector<1x256xi1> to vector<4x256xi1>
    %659 = vector.broadcast %cst_610 : f32 to vector<4x256xf32>
    %660 = arith.select %658, %656, %659 : vector<4x256xi1>, vector<4x256xf32>
    %c0_611 = arith.constant 0 : index
    %c0_612 = arith.constant 0 : index
    %661 = vector.load %arg8[%c0_611, %c0_612] : memref<36x256xf32, #tpu.memory_space<vmem>>, vector<4x256xf32>
    tpu.vector_store %arg8[%c0_611, %c0_612], %660 {strides = array<i32>} : memref<36x256xf32, #tpu.memory_space<vmem>>, vector<4x256xf32>,
    %c0_613 = arith.constant 0 : index
    %c1_614 = arith.constant 1 : index
    %662 = vector.load %arg7[%c0_613, %c1_614] : memref<4x290xf32, #tpu.memory_space<vmem>>, vector<4x256xf32>
    %c4_615 = arith.constant 4 : index
    %c0_616 = arith.constant 0 : index
    %663 = vector.load %arg8[%c4_615, %c0_616] : memref<36x256xf32, #tpu.memory_space<vmem>>, vector<4x256xf32>
    tpu.vector_store %arg8[%c4_615, %c0_616], %662 {strides = array<i32>} : memref<36x256xf32, #tpu.memory_space<vmem>>, vector<4x256xf32>,
    %c0_617 = arith.constant 0 : index
    %c2_618 = arith.constant 2 : index
    %664 = vector.load %arg7[%c0_617, %c2_618] : memref<4x290xf32, #tpu.memory_space<vmem>>, vector<4x256xf32>
    %cst_619 = arith.constant 0.000000e+00 : f32
    %665 = vector.shape_cast %36 : vector<1x256xi1> to vector<1x256xi1>
    %666 = vector.broadcast %665 : vector<1x256xi1> to vector<4x256xi1>
    %667 = vector.broadcast %cst_619 : f32 to vector<4x256xf32>
    %668 = arith.select %666, %664, %667 : vector<4x256xi1>, vector<4x256xf32>
    %c8_620 = arith.constant 8 : index
    %c0_621 = arith.constant 0 : index
    %669 = vector.load %arg8[%c8_620, %c0_621] : memref<36x256xf32, #tpu.memory_space<vmem>>, vector<4x256xf32>
    tpu.vector_store %arg8[%c8_620, %c0_621], %668 {strides = array<i32>} : memref<36x256xf32, #tpu.memory_space<vmem>>, vector<4x256xf32>,
    %c0_622 = arith.constant 0 : index
    %c16_623 = arith.constant 16 : index
    %670 = vector.load %arg7[%c0_622, %c16_623] : memref<4x290xf32, #tpu.memory_space<vmem>>, vector<4x256xf32>
    %cst_624 = arith.constant 0.000000e+00 : f32
    %671 = vector.shape_cast %27 : vector<1x256xi1> to vector<1x256xi1>
    %672 = vector.broadcast %671 : vector<1x256xi1> to vector<4x256xi1>
    %673 = vector.broadcast %cst_624 : f32 to vector<4x256xf32>
    %674 = arith.select %672, %670, %673 : vector<4x256xi1>, vector<4x256xf32>
    %c12_625 = arith.constant 12 : index
    %c0_626 = arith.constant 0 : index
    %675 = vector.load %arg8[%c12_625, %c0_626] : memref<36x256xf32, #tpu.memory_space<vmem>>, vector<4x256xf32>
    tpu.vector_store %arg8[%c12_625, %c0_626], %674 {strides = array<i32>} : memref<36x256xf32, #tpu.memory_space<vmem>>, vector<4x256xf32>,
    %c0_627 = arith.constant 0 : index
    %c17_628 = arith.constant 17 : index
    %676 = vector.load %arg7[%c0_627, %c17_628] : memref<4x290xf32, #tpu.memory_space<vmem>>, vector<4x256xf32>
    %c16_629 = arith.constant 16 : index
    %c0_630 = arith.constant 0 : index
    %677 = vector.load %arg8[%c16_629, %c0_630] : memref<36x256xf32, #tpu.memory_space<vmem>>, vector<4x256xf32>
    tpu.vector_store %arg8[%c16_629, %c0_630], %676 {strides = array<i32>} : memref<36x256xf32, #tpu.memory_space<vmem>>, vector<4x256xf32>,
    %c0_631 = arith.constant 0 : index
    %c18_632 = arith.constant 18 : index
    %678 = vector.load %arg7[%c0_631, %c18_632] : memref<4x290xf32, #tpu.memory_space<vmem>>, vector<4x256xf32>
    %cst_633 = arith.constant 0.000000e+00 : f32
    %679 = vector.shape_cast %36 : vector<1x256xi1> to vector<1x256xi1>
    %680 = vector.broadcast %679 : vector<1x256xi1> to vector<4x256xi1>
    %681 = vector.broadcast %cst_633 : f32 to vector<4x256xf32>
    %682 = arith.select %680, %678, %681 : vector<4x256xi1>, vector<4x256xf32>
    %c20_634 = arith.constant 20 : index
    %c0_635 = arith.constant 0 : index
    %683 = vector.load %arg8[%c20_634, %c0_635] : memref<36x256xf32, #tpu.memory_space<vmem>>, vector<4x256xf32>
    tpu.vector_store %arg8[%c20_634, %c0_635], %682 {strides = array<i32>} : memref<36x256xf32, #tpu.memory_space<vmem>>, vector<4x256xf32>,
    %c0_636 = arith.constant 0 : index
    %c32_637 = arith.constant 32 : index
    %684 = vector.load %arg7[%c0_636, %c32_637] : memref<4x290xf32, #tpu.memory_space<vmem>>, vector<4x256xf32>
    %cst_638 = arith.constant 0.000000e+00 : f32
    %685 = vector.shape_cast %27 : vector<1x256xi1> to vector<1x256xi1>
    %686 = vector.broadcast %685 : vector<1x256xi1> to vector<4x256xi1>
    %687 = vector.broadcast %cst_638 : f32 to vector<4x256xf32>
    %688 = arith.select %686, %684, %687 : vector<4x256xi1>, vector<4x256xf32>
    %c24_639 = arith.constant 24 : index
    %c0_640 = arith.constant 0 : index
    %689 = vector.load %arg8[%c24_639, %c0_640] : memref<36x256xf32, #tpu.memory_space<vmem>>, vector<4x256xf32>
    tpu.vector_store %arg8[%c24_639, %c0_640], %688 {strides = array<i32>} : memref<36x256xf32, #tpu.memory_space<vmem>>, vector<4x256xf32>,
    %c0_641 = arith.constant 0 : index
    %c33_642 = arith.constant 33 : index
    %690 = vector.load %arg7[%c0_641, %c33_642] : memref<4x290xf32, #tpu.memory_space<vmem>>, vector<4x256xf32>
    %c28_643 = arith.constant 28 : index
    %c0_644 = arith.constant 0 : index
    %691 = vector.load %arg8[%c28_643, %c0_644] : memref<36x256xf32, #tpu.memory_space<vmem>>, vector<4x256xf32>
    tpu.vector_store %arg8[%c28_643, %c0_644], %690 {strides = array<i32>} : memref<36x256xf32, #tpu.memory_space<vmem>>, vector<4x256xf32>,
    %c0_645 = arith.constant 0 : index
    %c34_646 = arith.constant 34 : index
    %692 = vector.load %arg7[%c0_645, %c34_646] : memref<4x290xf32, #tpu.memory_space<vmem>>, vector<4x256xf32>
    %cst_647 = arith.constant 0.000000e+00 : f32
    %693 = vector.shape_cast %36 : vector<1x256xi1> to vector<1x256xi1>
    %694 = vector.broadcast %693 : vector<1x256xi1> to vector<4x256xi1>
    %695 = vector.broadcast %cst_647 : f32 to vector<4x256xf32>
    %696 = arith.select %694, %692, %695 : vector<4x256xi1>, vector<4x256xf32>
    %c32_648 = arith.constant 32 : index
    %c0_649 = arith.constant 0 : index
    %697 = vector.load %arg8[%c32_648, %c0_649] : memref<36x256xf32, #tpu.memory_space<vmem>>, vector<4x256xf32>
    tpu.vector_store %arg8[%c32_648, %c0_649], %696 {strides = array<i32>} : memref<36x256xf32, #tpu.memory_space<vmem>>, vector<4x256xf32>,
    %c11 = arith.constant 11 : index
    %c0_650 = arith.constant 0 : index
    %c0_651 = arith.constant 0 : index
    %698 = vector.load %arg2[%c11, %c0_650, %c0_651] : memref<14x4x36xf32, #tpu.memory_space<vmem>>, vector<1x4x36xf32>
    %699 = vector.shape_cast %698 : vector<1x4x36xf32> to vector<4x36xf32>
    %c0_652 = arith.constant 0 : index
    %c0_653 = arith.constant 0 : index
    %700 = vector.load %arg8[%c0_652, %c0_653] : memref<36x256xf32, #tpu.memory_space<vmem>>, vector<36x256xf32>
    %cst_654 = arith.constant dense<0.000000e+00> : vector<4x256xf32>
    %701 = tpu.matmul %699, %700, %cst_654 {dimension_numbers = #tpu.dot_dimension_numbers<[1], [0], [0], [1], [0, 0, 1, 1], [], []>} : vector<4x36xf32>, vector<36x256xf32>, vector<4x256xf32> -> vector<4x256xf32>
    %c11_655 = arith.constant 11 : index
    %c0_656 = arith.constant 0 : index
    %c0_657 = arith.constant 0 : index
    %702 = vector.load %arg3[%c11_655, %c0_656, %c0_657] : memref<14x4x1xf32, #tpu.memory_space<vmem>>, vector<1x4x1xf32>
    %703 = vector.shape_cast %702 : vector<1x4x1xf32> to vector<4x1xf32>
    %704 = vector.broadcast %703 : vector<4x1xf32> to vector<4x256xf32>
    %705 = arith.addf %701, %704 : vector<4x256xf32>
    %706 = arith.addf %705, %376 : vector<4x256xf32>
    %c0_658 = arith.constant 0 : index
    %c17_659 = arith.constant 17 : index
    %707 = vector.load %arg7[%c0_658, %c17_659] : memref<4x290xf32, #tpu.memory_space<vmem>>, vector<4x256xf32>
    tpu.vector_store %arg7[%c0_658, %c17_659], %38 {strides = array<i32>} : memref<4x290xf32, #tpu.memory_space<vmem>>, vector<4x256xf32>,
    %c0_660 = arith.constant 0 : index
    %c0_661 = arith.constant 0 : index
    %708 = vector.load %arg7[%c0_660, %c0_661] : memref<4x290xf32, #tpu.memory_space<vmem>>, vector<4x256xf32>
    %cst_662 = arith.constant 0.000000e+00 : f32
    %709 = vector.shape_cast %27 : vector<1x256xi1> to vector<1x256xi1>
    %710 = vector.broadcast %709 : vector<1x256xi1> to vector<4x256xi1>
    %711 = vector.broadcast %cst_662 : f32 to vector<4x256xf32>
    %712 = arith.select %710, %708, %711 : vector<4x256xi1>, vector<4x256xf32>
    %c0_663 = arith.constant 0 : index
    %c0_664 = arith.constant 0 : index
    %713 = vector.load %arg8[%c0_663, %c0_664] : memref<36x256xf32, #tpu.memory_space<vmem>>, vector<4x256xf32>
    tpu.vector_store %arg8[%c0_663, %c0_664], %712 {strides = array<i32>} : memref<36x256xf32, #tpu.memory_space<vmem>>, vector<4x256xf32>,
    %c0_665 = arith.constant 0 : index
    %c1_666 = arith.constant 1 : index
    %714 = vector.load %arg7[%c0_665, %c1_666] : memref<4x290xf32, #tpu.memory_space<vmem>>, vector<4x256xf32>
    %c4_667 = arith.constant 4 : index
    %c0_668 = arith.constant 0 : index
    %715 = vector.load %arg8[%c4_667, %c0_668] : memref<36x256xf32, #tpu.memory_space<vmem>>, vector<4x256xf32>
    tpu.vector_store %arg8[%c4_667, %c0_668], %714 {strides = array<i32>} : memref<36x256xf32, #tpu.memory_space<vmem>>, vector<4x256xf32>,
    %c0_669 = arith.constant 0 : index
    %c2_670 = arith.constant 2 : index
    %716 = vector.load %arg7[%c0_669, %c2_670] : memref<4x290xf32, #tpu.memory_space<vmem>>, vector<4x256xf32>
    %cst_671 = arith.constant 0.000000e+00 : f32
    %717 = vector.shape_cast %36 : vector<1x256xi1> to vector<1x256xi1>
    %718 = vector.broadcast %717 : vector<1x256xi1> to vector<4x256xi1>
    %719 = vector.broadcast %cst_671 : f32 to vector<4x256xf32>
    %720 = arith.select %718, %716, %719 : vector<4x256xi1>, vector<4x256xf32>
    %c8_672 = arith.constant 8 : index
    %c0_673 = arith.constant 0 : index
    %721 = vector.load %arg8[%c8_672, %c0_673] : memref<36x256xf32, #tpu.memory_space<vmem>>, vector<4x256xf32>
    tpu.vector_store %arg8[%c8_672, %c0_673], %720 {strides = array<i32>} : memref<36x256xf32, #tpu.memory_space<vmem>>, vector<4x256xf32>,
    %c0_674 = arith.constant 0 : index
    %c16_675 = arith.constant 16 : index
    %722 = vector.load %arg7[%c0_674, %c16_675] : memref<4x290xf32, #tpu.memory_space<vmem>>, vector<4x256xf32>
    %cst_676 = arith.constant 0.000000e+00 : f32
    %723 = vector.shape_cast %27 : vector<1x256xi1> to vector<1x256xi1>
    %724 = vector.broadcast %723 : vector<1x256xi1> to vector<4x256xi1>
    %725 = vector.broadcast %cst_676 : f32 to vector<4x256xf32>
    %726 = arith.select %724, %722, %725 : vector<4x256xi1>, vector<4x256xf32>
    %c12_677 = arith.constant 12 : index
    %c0_678 = arith.constant 0 : index
    %727 = vector.load %arg8[%c12_677, %c0_678] : memref<36x256xf32, #tpu.memory_space<vmem>>, vector<4x256xf32>
    tpu.vector_store %arg8[%c12_677, %c0_678], %726 {strides = array<i32>} : memref<36x256xf32, #tpu.memory_space<vmem>>, vector<4x256xf32>,
    %c0_679 = arith.constant 0 : index
    %c17_680 = arith.constant 17 : index
    %728 = vector.load %arg7[%c0_679, %c17_680] : memref<4x290xf32, #tpu.memory_space<vmem>>, vector<4x256xf32>
    %c16_681 = arith.constant 16 : index
    %c0_682 = arith.constant 0 : index
    %729 = vector.load %arg8[%c16_681, %c0_682] : memref<36x256xf32, #tpu.memory_space<vmem>>, vector<4x256xf32>
    tpu.vector_store %arg8[%c16_681, %c0_682], %728 {strides = array<i32>} : memref<36x256xf32, #tpu.memory_space<vmem>>, vector<4x256xf32>,
    %c0_683 = arith.constant 0 : index
    %c18_684 = arith.constant 18 : index
    %730 = vector.load %arg7[%c0_683, %c18_684] : memref<4x290xf32, #tpu.memory_space<vmem>>, vector<4x256xf32>
    %cst_685 = arith.constant 0.000000e+00 : f32
    %731 = vector.shape_cast %36 : vector<1x256xi1> to vector<1x256xi1>
    %732 = vector.broadcast %731 : vector<1x256xi1> to vector<4x256xi1>
    %733 = vector.broadcast %cst_685 : f32 to vector<4x256xf32>
    %734 = arith.select %732, %730, %733 : vector<4x256xi1>, vector<4x256xf32>
    %c20_686 = arith.constant 20 : index
    %c0_687 = arith.constant 0 : index
    %735 = vector.load %arg8[%c20_686, %c0_687] : memref<36x256xf32, #tpu.memory_space<vmem>>, vector<4x256xf32>
    tpu.vector_store %arg8[%c20_686, %c0_687], %734 {strides = array<i32>} : memref<36x256xf32, #tpu.memory_space<vmem>>, vector<4x256xf32>,
    %c0_688 = arith.constant 0 : index
    %c32_689 = arith.constant 32 : index
    %736 = vector.load %arg7[%c0_688, %c32_689] : memref<4x290xf32, #tpu.memory_space<vmem>>, vector<4x256xf32>
    %cst_690 = arith.constant 0.000000e+00 : f32
    %737 = vector.shape_cast %27 : vector<1x256xi1> to vector<1x256xi1>
    %738 = vector.broadcast %737 : vector<1x256xi1> to vector<4x256xi1>
    %739 = vector.broadcast %cst_690 : f32 to vector<4x256xf32>
    %740 = arith.select %738, %736, %739 : vector<4x256xi1>, vector<4x256xf32>
    %c24_691 = arith.constant 24 : index
    %c0_692 = arith.constant 0 : index
    %741 = vector.load %arg8[%c24_691, %c0_692] : memref<36x256xf32, #tpu.memory_space<vmem>>, vector<4x256xf32>
    tpu.vector_store %arg8[%c24_691, %c0_692], %740 {strides = array<i32>} : memref<36x256xf32, #tpu.memory_space<vmem>>, vector<4x256xf32>,
    %c0_693 = arith.constant 0 : index
    %c33_694 = arith.constant 33 : index
    %742 = vector.load %arg7[%c0_693, %c33_694] : memref<4x290xf32, #tpu.memory_space<vmem>>, vector<4x256xf32>
    %c28_695 = arith.constant 28 : index
    %c0_696 = arith.constant 0 : index
    %743 = vector.load %arg8[%c28_695, %c0_696] : memref<36x256xf32, #tpu.memory_space<vmem>>, vector<4x256xf32>
    tpu.vector_store %arg8[%c28_695, %c0_696], %742 {strides = array<i32>} : memref<36x256xf32, #tpu.memory_space<vmem>>, vector<4x256xf32>,
    %c0_697 = arith.constant 0 : index
    %c34_698 = arith.constant 34 : index
    %744 = vector.load %arg7[%c0_697, %c34_698] : memref<4x290xf32, #tpu.memory_space<vmem>>, vector<4x256xf32>
    %cst_699 = arith.constant 0.000000e+00 : f32
    %745 = vector.shape_cast %36 : vector<1x256xi1> to vector<1x256xi1>
    %746 = vector.broadcast %745 : vector<1x256xi1> to vector<4x256xi1>
    %747 = vector.broadcast %cst_699 : f32 to vector<4x256xf32>
    %748 = arith.select %746, %744, %747 : vector<4x256xi1>, vector<4x256xf32>
    %c32_700 = arith.constant 32 : index
    %c0_701 = arith.constant 0 : index
    %749 = vector.load %arg8[%c32_700, %c0_701] : memref<36x256xf32, #tpu.memory_space<vmem>>, vector<4x256xf32>
    tpu.vector_store %arg8[%c32_700, %c0_701], %748 {strides = array<i32>} : memref<36x256xf32, #tpu.memory_space<vmem>>, vector<4x256xf32>,
    %c12_702 = arith.constant 12 : index
    %c0_703 = arith.constant 0 : index
    %c0_704 = arith.constant 0 : index
    %750 = vector.load %arg2[%c12_702, %c0_703, %c0_704] : memref<14x4x36xf32, #tpu.memory_space<vmem>>, vector<1x4x36xf32>
    %751 = vector.shape_cast %750 : vector<1x4x36xf32> to vector<4x36xf32>
    %c0_705 = arith.constant 0 : index
    %c0_706 = arith.constant 0 : index
    %752 = vector.load %arg8[%c0_705, %c0_706] : memref<36x256xf32, #tpu.memory_space<vmem>>, vector<36x256xf32>
    %cst_707 = arith.constant dense<0.000000e+00> : vector<4x256xf32>
    %753 = tpu.matmul %751, %752, %cst_707 {dimension_numbers = #tpu.dot_dimension_numbers<[1], [0], [0], [1], [0, 0, 1, 1], [], []>} : vector<4x36xf32>, vector<36x256xf32>, vector<4x256xf32> -> vector<4x256xf32>
    %c12_708 = arith.constant 12 : index
    %c0_709 = arith.constant 0 : index
    %c0_710 = arith.constant 0 : index
    %754 = vector.load %arg3[%c12_708, %c0_709, %c0_710] : memref<14x4x1xf32, #tpu.memory_space<vmem>>, vector<1x4x1xf32>
    %755 = vector.shape_cast %754 : vector<1x4x1xf32> to vector<4x1xf32>
    %756 = vector.broadcast %755 : vector<4x1xf32> to vector<4x256xf32>
    %757 = arith.addf %753, %756 : vector<4x256xf32>
    %cst_711 = arith.constant 0.000000e+00 : f32
    %758 = vector.broadcast %cst_711 : f32 to vector<4x256xf32>
    %759 = arith.maximumf %757, %758 : vector<4x256xf32>
    %cst_712 = arith.constant 0.000000e+00 : f32
    %760 = vector.broadcast %cst_712 : f32 to vector<4x256xf32>
    %761 = arith.minimumf %757, %760 : vector<4x256xf32>
    %cst_713 = arith.constant 2.500000e-01 : f32
    %762 = vector.broadcast %cst_713 : f32 to vector<4x256xf32>
    %763 = arith.mulf %762, %761 : vector<4x256xf32>
    %764 = arith.addf %759, %763 : vector<4x256xf32>
    %c0_714 = arith.constant 0 : index
    %c17_715 = arith.constant 17 : index
    %765 = vector.load %arg7[%c0_714, %c17_715] : memref<4x290xf32, #tpu.memory_space<vmem>>, vector<4x256xf32>
    tpu.vector_store %arg7[%c0_714, %c17_715], %764 {strides = array<i32>} : memref<4x290xf32, #tpu.memory_space<vmem>>, vector<4x256xf32>,
    %c0_716 = arith.constant 0 : index
    %c0_717 = arith.constant 0 : index
    %766 = vector.load %arg7[%c0_716, %c0_717] : memref<4x290xf32, #tpu.memory_space<vmem>>, vector<4x256xf32>
    %cst_718 = arith.constant 0.000000e+00 : f32
    %767 = vector.shape_cast %27 : vector<1x256xi1> to vector<1x256xi1>
    %768 = vector.broadcast %767 : vector<1x256xi1> to vector<4x256xi1>
    %769 = vector.broadcast %cst_718 : f32 to vector<4x256xf32>
    %770 = arith.select %768, %766, %769 : vector<4x256xi1>, vector<4x256xf32>
    %c0_719 = arith.constant 0 : index
    %c0_720 = arith.constant 0 : index
    %771 = vector.load %arg8[%c0_719, %c0_720] : memref<36x256xf32, #tpu.memory_space<vmem>>, vector<4x256xf32>
    tpu.vector_store %arg8[%c0_719, %c0_720], %770 {strides = array<i32>} : memref<36x256xf32, #tpu.memory_space<vmem>>, vector<4x256xf32>,
    %c0_721 = arith.constant 0 : index
    %c1_722 = arith.constant 1 : index
    %772 = vector.load %arg7[%c0_721, %c1_722] : memref<4x290xf32, #tpu.memory_space<vmem>>, vector<4x256xf32>
    %c4_723 = arith.constant 4 : index
    %c0_724 = arith.constant 0 : index
    %773 = vector.load %arg8[%c4_723, %c0_724] : memref<36x256xf32, #tpu.memory_space<vmem>>, vector<4x256xf32>
    tpu.vector_store %arg8[%c4_723, %c0_724], %772 {strides = array<i32>} : memref<36x256xf32, #tpu.memory_space<vmem>>, vector<4x256xf32>,
    %c0_725 = arith.constant 0 : index
    %c2_726 = arith.constant 2 : index
    %774 = vector.load %arg7[%c0_725, %c2_726] : memref<4x290xf32, #tpu.memory_space<vmem>>, vector<4x256xf32>
    %cst_727 = arith.constant 0.000000e+00 : f32
    %775 = vector.shape_cast %36 : vector<1x256xi1> to vector<1x256xi1>
    %776 = vector.broadcast %775 : vector<1x256xi1> to vector<4x256xi1>
    %777 = vector.broadcast %cst_727 : f32 to vector<4x256xf32>
    %778 = arith.select %776, %774, %777 : vector<4x256xi1>, vector<4x256xf32>
    %c8_728 = arith.constant 8 : index
    %c0_729 = arith.constant 0 : index
    %779 = vector.load %arg8[%c8_728, %c0_729] : memref<36x256xf32, #tpu.memory_space<vmem>>, vector<4x256xf32>
    tpu.vector_store %arg8[%c8_728, %c0_729], %778 {strides = array<i32>} : memref<36x256xf32, #tpu.memory_space<vmem>>, vector<4x256xf32>,
    %c0_730 = arith.constant 0 : index
    %c16_731 = arith.constant 16 : index
    %780 = vector.load %arg7[%c0_730, %c16_731] : memref<4x290xf32, #tpu.memory_space<vmem>>, vector<4x256xf32>
    %cst_732 = arith.constant 0.000000e+00 : f32
    %781 = vector.shape_cast %27 : vector<1x256xi1> to vector<1x256xi1>
    %782 = vector.broadcast %781 : vector<1x256xi1> to vector<4x256xi1>
    %783 = vector.broadcast %cst_732 : f32 to vector<4x256xf32>
    %784 = arith.select %782, %780, %783 : vector<4x256xi1>, vector<4x256xf32>
    %c12_733 = arith.constant 12 : index
    %c0_734 = arith.constant 0 : index
    %785 = vector.load %arg8[%c12_733, %c0_734] : memref<36x256xf32, #tpu.memory_space<vmem>>, vector<4x256xf32>
    tpu.vector_store %arg8[%c12_733, %c0_734], %784 {strides = array<i32>} : memref<36x256xf32, #tpu.memory_space<vmem>>, vector<4x256xf32>,
    %c0_735 = arith.constant 0 : index
    %c17_736 = arith.constant 17 : index
    %786 = vector.load %arg7[%c0_735, %c17_736] : memref<4x290xf32, #tpu.memory_space<vmem>>, vector<4x256xf32>
    %c16_737 = arith.constant 16 : index
    %c0_738 = arith.constant 0 : index
    %787 = vector.load %arg8[%c16_737, %c0_738] : memref<36x256xf32, #tpu.memory_space<vmem>>, vector<4x256xf32>
    tpu.vector_store %arg8[%c16_737, %c0_738], %786 {strides = array<i32>} : memref<36x256xf32, #tpu.memory_space<vmem>>, vector<4x256xf32>,
    %c0_739 = arith.constant 0 : index
    %c18_740 = arith.constant 18 : index
    %788 = vector.load %arg7[%c0_739, %c18_740] : memref<4x290xf32, #tpu.memory_space<vmem>>, vector<4x256xf32>
    %cst_741 = arith.constant 0.000000e+00 : f32
    %789 = vector.shape_cast %36 : vector<1x256xi1> to vector<1x256xi1>
    %790 = vector.broadcast %789 : vector<1x256xi1> to vector<4x256xi1>
    %791 = vector.broadcast %cst_741 : f32 to vector<4x256xf32>
    %792 = arith.select %790, %788, %791 : vector<4x256xi1>, vector<4x256xf32>
    %c20_742 = arith.constant 20 : index
    %c0_743 = arith.constant 0 : index
    %793 = vector.load %arg8[%c20_742, %c0_743] : memref<36x256xf32, #tpu.memory_space<vmem>>, vector<4x256xf32>
    tpu.vector_store %arg8[%c20_742, %c0_743], %792 {strides = array<i32>} : memref<36x256xf32, #tpu.memory_space<vmem>>, vector<4x256xf32>,
    %c0_744 = arith.constant 0 : index
    %c32_745 = arith.constant 32 : index
    %794 = vector.load %arg7[%c0_744, %c32_745] : memref<4x290xf32, #tpu.memory_space<vmem>>, vector<4x256xf32>
    %cst_746 = arith.constant 0.000000e+00 : f32
    %795 = vector.shape_cast %27 : vector<1x256xi1> to vector<1x256xi1>
    %796 = vector.broadcast %795 : vector<1x256xi1> to vector<4x256xi1>
    %797 = vector.broadcast %cst_746 : f32 to vector<4x256xf32>
    %798 = arith.select %796, %794, %797 : vector<4x256xi1>, vector<4x256xf32>
    %c24_747 = arith.constant 24 : index
    %c0_748 = arith.constant 0 : index
    %799 = vector.load %arg8[%c24_747, %c0_748] : memref<36x256xf32, #tpu.memory_space<vmem>>, vector<4x256xf32>
    tpu.vector_store %arg8[%c24_747, %c0_748], %798 {strides = array<i32>} : memref<36x256xf32, #tpu.memory_space<vmem>>, vector<4x256xf32>,
    %c0_749 = arith.constant 0 : index
    %c33_750 = arith.constant 33 : index
    %800 = vector.load %arg7[%c0_749, %c33_750] : memref<4x290xf32, #tpu.memory_space<vmem>>, vector<4x256xf32>
    %c28_751 = arith.constant 28 : index
    %c0_752 = arith.constant 0 : index
    %801 = vector.load %arg8[%c28_751, %c0_752] : memref<36x256xf32, #tpu.memory_space<vmem>>, vector<4x256xf32>
    tpu.vector_store %arg8[%c28_751, %c0_752], %800 {strides = array<i32>} : memref<36x256xf32, #tpu.memory_space<vmem>>, vector<4x256xf32>,
    %c0_753 = arith.constant 0 : index
    %c34_754 = arith.constant 34 : index
    %802 = vector.load %arg7[%c0_753, %c34_754] : memref<4x290xf32, #tpu.memory_space<vmem>>, vector<4x256xf32>
    %cst_755 = arith.constant 0.000000e+00 : f32
    %803 = vector.shape_cast %36 : vector<1x256xi1> to vector<1x256xi1>
    %804 = vector.broadcast %803 : vector<1x256xi1> to vector<4x256xi1>
    %805 = vector.broadcast %cst_755 : f32 to vector<4x256xf32>
    %806 = arith.select %804, %802, %805 : vector<4x256xi1>, vector<4x256xf32>
    %c32_756 = arith.constant 32 : index
    %c0_757 = arith.constant 0 : index
    %807 = vector.load %arg8[%c32_756, %c0_757] : memref<36x256xf32, #tpu.memory_space<vmem>>, vector<4x256xf32>
    tpu.vector_store %arg8[%c32_756, %c0_757], %806 {strides = array<i32>} : memref<36x256xf32, #tpu.memory_space<vmem>>, vector<4x256xf32>,
    %c13 = arith.constant 13 : index
    %c0_758 = arith.constant 0 : index
    %c0_759 = arith.constant 0 : index
    %808 = vector.load %arg2[%c13, %c0_758, %c0_759] : memref<14x4x36xf32, #tpu.memory_space<vmem>>, vector<1x4x36xf32>
    %809 = vector.shape_cast %808 : vector<1x4x36xf32> to vector<4x36xf32>
    %c0_760 = arith.constant 0 : index
    %c0_761 = arith.constant 0 : index
    %810 = vector.load %arg8[%c0_760, %c0_761] : memref<36x256xf32, #tpu.memory_space<vmem>>, vector<36x256xf32>
    %cst_762 = arith.constant dense<0.000000e+00> : vector<4x256xf32>
    %811 = tpu.matmul %809, %810, %cst_762 {dimension_numbers = #tpu.dot_dimension_numbers<[1], [0], [0], [1], [0, 0, 1, 1], [], []>} : vector<4x36xf32>, vector<36x256xf32>, vector<4x256xf32> -> vector<4x256xf32>
    %c13_763 = arith.constant 13 : index
    %c0_764 = arith.constant 0 : index
    %c0_765 = arith.constant 0 : index
    %812 = vector.load %arg3[%c13_763, %c0_764, %c0_765] : memref<14x4x1xf32, #tpu.memory_space<vmem>>, vector<1x4x1xf32>
    %813 = vector.shape_cast %812 : vector<1x4x1xf32> to vector<4x1xf32>
    %814 = vector.broadcast %813 : vector<4x1xf32> to vector<4x256xf32>
    %815 = arith.addf %811, %814 : vector<4x256xf32>
    %816 = arith.addf %815, %38 : vector<4x256xf32>
    %c0_766 = arith.constant 0 : index
    %c0_767 = arith.constant 0 : index
    %c0_768 = arith.constant 0 : index
    %817 = vector.load %arg6[%c0_766, %c0_767, %c0_768] : memref<1x12x256xf32, #tpu.memory_space<vmem>>, vector<1x4x256xf32>
    %818 = vector.shape_cast %817 : vector<1x4x256xf32> to vector<4x256xf32>
    %819 = vector.shape_cast %596 : vector<4x256xf32> to vector<1x4x256xf32>
    tpu.vector_store %arg6[%c0_766, %c0_767, %c0_768], %819 {strides = array<i32>} : memref<1x12x256xf32, #tpu.memory_space<vmem>>, vector<1x4x256xf32>,
    %c0_769 = arith.constant 0 : index
    %c4_770 = arith.constant 4 : index
    %c0_771 = arith.constant 0 : index
    %820 = vector.load %arg6[%c0_769, %c4_770, %c0_771] : memref<1x12x256xf32, #tpu.memory_space<vmem>>, vector<1x4x256xf32>
    %821 = vector.shape_cast %820 : vector<1x4x256xf32> to vector<4x256xf32>
    %822 = vector.shape_cast %706 : vector<4x256xf32> to vector<1x4x256xf32>
    tpu.vector_store %arg6[%c0_769, %c4_770, %c0_771], %822 {strides = array<i32>} : memref<1x12x256xf32, #tpu.memory_space<vmem>>, vector<1x4x256xf32>,
    %c0_772 = arith.constant 0 : index
    %c8_773 = arith.constant 8 : index
    %c0_774 = arith.constant 0 : index
    %823 = vector.load %arg6[%c0_772, %c8_773, %c0_774] : memref<1x12x256xf32, #tpu.memory_space<vmem>>, vector<1x4x256xf32>
    %824 = vector.shape_cast %823 : vector<1x4x256xf32> to vector<4x256xf32>
    %825 = vector.shape_cast %816 : vector<4x256xf32> to vector<1x4x256xf32>
    tpu.vector_store %arg6[%c0_772, %c8_773, %c0_774], %825 {strides = array<i32>} : memref<1x12x256xf32, #tpu.memory_space<vmem>>, vector<1x4x256xf32>,
    return
  }
  func.func @transform_0(%arg0: i32) -> (i32, i32, i32) {
    %c0_i32 = arith.constant 0 : i32
    %c0_i32_0 = arith.constant 0 : i32
    %c0_i32_1 = arith.constant 0 : i32
    return %arg0, %c0_i32, %c0_i32_0 : i32, i32, i32
  }
  func.func @transform_1(%arg0: i32) -> (i32, i32, i32) {
    %c0_i32 = arith.constant 0 : i32
    %c0_i32_0 = arith.constant 0 : i32
    %c0_i32_1 = arith.constant 0 : i32
    %c0_i32_2 = arith.constant 0 : i32
    return %c0_i32, %c0_i32_0, %c0_i32_1 : i32, i32, i32
  }
  func.func @transform_2(%arg0: i32) -> (i32, i32, i32) {
    %c0_i32 = arith.constant 0 : i32
    %c0_i32_0 = arith.constant 0 : i32
    %c0_i32_1 = arith.constant 0 : i32
    %c0_i32_2 = arith.constant 0 : i32
    return %c0_i32, %c0_i32_0, %c0_i32_1 : i32, i32, i32
  }
  func.func @transform_3(%arg0: i32) -> (i32, i32) {
    %c0_i32 = arith.constant 0 : i32
    %c0_i32_0 = arith.constant 0 : i32
    %c0_i32_1 = arith.constant 0 : i32
    return %c0_i32, %c0_i32_0 : i32, i32
  }
  func.func @transform_4(%arg0: i32) -> (i32, i32) {
    %c0_i32 = arith.constant 0 : i32
    %c0_i32_0 = arith.constant 0 : i32
    %c0_i32_1 = arith.constant 0 : i32
    return %c0_i32, %c0_i32_0 : i32, i32
  }
  func.func @transform_5(%arg0: i32) -> (i32, i32, i32) {
    %c0_i32 = arith.constant 0 : i32
    %c0_i32_0 = arith.constant 0 : i32
    %c0_i32_1 = arith.constant 0 : i32
    return %arg0, %c0_i32, %c0_i32_0 : i32, i32, i32
  }
}

</mosaic_0001>

<bundles_post_ra>
// kernel: fract_in4_forward.1
= control target key start
LH: loop header
LB: loop body
LE: loop exit
PB: predicated region body
PF: predicated region fallthrough
CT: control target
= control target key end

     0   :  { %s4708_s18 = smov 0   ;;  %s6015_s0 = inlined_call_operand.vmem [shape: f32[2,4,256], index: 0, kind: input, shape index: {}]   ;;  %s6016_s1 = inlined_call_operand.vmem [shape: f32[14,4,36], index: 1, kind: input, shape index: {}]   ;;  %s6017_s2 = inlined_call_operand.vmem [shape: f32[14,4,1], index: 2, kind: input, shape index: {}]   ;;  %s6018_s3 = inlined_call_operand.vmem [shape: f32[4,8], index: 3, kind: input, shape index: {}]   ;;  %s6019_s4 = inlined_call_operand.vmem [shape: f32[4,1], index: 4, kind: input, shape index: {}]   ;;  %s6020_s5 = inlined_call_operand.vmem [shape: f32[2,12,256], index: 5, kind: output, shape index: {}]  }
   0x1 LB: > { %s4389_s19 = sadd.s32 4294967295, %s4665_s18   ;;  %p4393_p0 = scmp.ge.s32.totalorder %s4665_s18, 1  ;;  %s4665_s18 = sphi %s4708_s18, %s15_s18  }
   0x2   : > { %p187_p1 = scmp.lt.s32.totalorder %s4665_s18, 3 }
   0x4   : > { %p188_p2 = pnand %p4393_p0, %p187_p1 }
   0x5   : > { %p215_p3 = scmp.lt.s32.totalorder (!%p188_p2), %s4389_s19, 1  ;;  %vm226_vm0 = vcmask (!%p188_p2), 273408   ;;  %v4667_v0 = vmov (!%p188_p2), 0.0   ;;  %s4668_s24 = smov (!%p188_p2), 17   ;;  %v228_v2 = vlaneseq (!%p188_p2)  ;;  %vm280_vm1 = vcmask (!%p188_p2), 1043592  }
   0x6   : > { %191 = sbr.rel (%p188_p2) target bundleno = 6090 (0x17ca), region = 40  ;;  %225 = vst [vmem:[#allocation2] sm:$0xff] (!%p188_p2), %v4667_v0  ;;  %227 = vst.msk [vmem:[#allocation2 + $0x8] sm:$0xf] (!%p188_p2), %vm226_vm0, %v4667_v0  ;;  %562 = vmatprep.mubr.f32.mxu0 (!%p188_p2), %v4667_v0  ;;  %848 = vmatprep.mubr.f32.mxu1 (!%p188_p2), %v4667_v0  ;;  %vm281_vm2 = vcmask (!%p188_p2), 1047556   ;;  %vm6025_vm3 = vcmask (!%p188_p2), 138240  }
   0x7   : > { %v4733_v3 = vand.u32 (!%p188_p2), 127, %v228_v2  ;;  %vm6024_vm4 = vcmask (!%p188_p2), 134144   ;;  %vm4739_vm5 = vmor (!%p188_p2), %vm281_vm2, %vm280_vm1  ;;  %s4669_s25 = smov (!%p188_p2), 112   ;;  %s4670_s26 = smov (!%p188_p2), 96   ;;  %v4677_v26 = vmov (!%p188_p2), 0   ;;  %vm310_vm8 = vcmask (!%p188_p2), 1039360  }
   0x8   : > { %s4671_s27 = smov (!%p188_p2), 126   ;;  %s4672_s28 = smov (!%p188_p2), 111   ;;  %4602 = vset.pattern.permute.xlu1 (!%p188_p2), %v4677_v26  ;;  %v481_v27 = vld [vmem:[%s6017_s2] sm:$0xf] (!%p188_p2)  ;;  %4603 = vset.pattern.permute.xlu0 (!%p188_p2), %v4677_v26  ;;  %vm443_vm9 = vcmask (!%p188_p2), 777216   ;;  %vm352_vm10 = vcmask (!%p188_p2), 916480  }
   0x9   : > { %v4736_v4 = vadd.s32 (!%p188_p2), 128, %v4733_v3  ;;  %v235_v6 = vand.u32 (!%p188_p2), 15, %v4733_v3  ;;  %s4673_s29 = smov (!%p188_p2), 110   ;;  %s4674_s30 = smov (!%p188_p2), 127   ;;  %vm332_vm12 = vcmask (!%p188_p2), 1031168   ;;  %vm6022_vm14 = vcmask (!%p188_p2), 785408  }
   0xa   : > { %s4675_s6 = smov (!%p188_p2), 95   ;;  %s4676_s7 = smov (!%p188_p2), 94   ;;  %vm396_vm15 = vcmask (!%p188_p2), 900096   ;;  %vm6023_vm0 = vcmask (!%p188_p2), 908288   ;;  %vm6021_vm1 = vcmask (!%p188_p2), 769024   ;;  %vm491_vm2 = vcmask (!%p188_p2), 1043456  }
   0xb   : > { %v242_v9 = vand.u32 (!%p188_p2), 15, %v4736_v4  ;;  %v4757_v11 = vadd.s32 (!%p188_p2), 4294967295, %v235_v6  ;;  %v4799_v42 = vadd.s32 (!%p188_p2), 1, %v235_v6 }
   0xd   : > { %s6111_s19 = smov (!%p215_p3, %s4389_s19), 1  ;;  %v4761_v12 = vadd.s32 4294967295, %v242_v9  ;;  %vm257_vm6 = vcmp.ge.s32.totalorder %v4757_v11, 0  ;;  %v4804_v44 = vadd.s32 1, %v242_v9  ;;  %vm267_vm11 = vcmp.lt.s32.totalorder %v4799_v42, 16 }
   0xe   : > { %s4469_s20 = sshll.u32 %s6111_s19, 3 }
   0xf   : > { %s4726_s23 = scalar_lea.vmem %s6015_s0, %s4469_s20  ;;  %vm258_vm7 = vcmp.ge.s32.totalorder %v4761_v12, 0  ;;  %vm268_vm13 = vcmp.lt.s32.totalorder %v4804_v44, 16 }
  0x10   : > { %v4729_v1 = vld [vmem:[%s4726_s23] sm:$0xff] }
  0x11   : > { %273 = vrot.lane.b32.xlu0 %v4729_v1, %s4668_s24 }
  0x83   : > { %v274_v5 = vpop.permute.xlu0 %273 }
  0x84   : > { %v4743_v8 = vrot.slane %v274_v5, 4 }
  0x86   : > { %v4748_v10 = vsel %vm6025_vm3, %v4743_v8, %v274_v5  ;;  %285 = vst.msk [vmem:[#allocation2 + $0x8] sm:$0xf] %vm6024_vm4, %v4743_v8 }
  0x87   : > { %283 = vst.msk [vmem:[#allocation2] sm:$0xff] %vm4739_vm5, %v4748_v10 }
  0x8d   : > { %v342_v13 = vld [vmem:[#allocation2 + $0x8] sm:$0xf] }
  0x8e   : > { %v286_v14 = vld [vmem:[#allocation2] sm:$0xff]  ;;  %350 = vrot.lane.b32.xlu1 %v342_v13, %s4669_s25  ;;  %v412_v17 = vld [vmem:[#allocation2 + $0x8] sm:$0xf] }
  0x8f   : > { %v292_v15 = vcombine.high %v286_v14, %v286_v14  ;;  %v294_v16 = vsel %vm257_vm6, %v286_v14, 0.0  ;;  %420 = vrot.lane.b32.xlu0 %v412_v17, %s4670_s26  ;;  %v318_v19 = vld [vmem:[#allocation2 + $0x8] sm:$0xf]  ;;  %v302_v24 = vcombine.low %v286_v14, %v286_v14 }
  0x90   : > { %296 = vst [vmem:[#allocation3] sm:$0xf] %v294_v16  ;;  %v368_v20 = vld [vmem:[#allocation2 + $0x8] sm:$0xf] }
  0x91   : > { %v295_v18 = vsel %vm258_vm7, %v292_v15, 0.0  ;;  %v386_v21 = vld [vmem:[#allocation2 + $0x8] sm:$0xf] }
  0x92   : > { %297 = vst [vmem:[#allocation3 + $0x8] sm:$0xf] %v295_v18  ;;  %330 = vrot.lane.b32.xlu1 %v318_v19, %s4671_s27  ;;  %v4605_v22 = vld [vmem:[#allocation2 + $0x8] ss:$0 sps:$4 sm:$0xff]  }
  0x93   : > { %376 = vrot.lane.b32.xlu0 %v368_v20, %s4672_s28  ;;  %v4606_v23 = vld [vmem:[#allocation2 + $0x8] ss:$0 sps:$4 sm:$0xff]  }
  0x94   : > { %v451_v25 = vld [vmem:[#allocation2 + $0x8] sm:$0xf] }
  0x96   : > { %394 = vrot.lane.b32.xlu1 %v386_v21, %s4673_s29 }
  0x97   : > { %306 = vrot.lane.b32.xlu0 %v286_v14, %s4674_s30 }
  0x9a   : > { %346 = vrot.lane.b32.xlu1 %v286_v14, %s4669_s25 }
  0x9b   : > { %326 = vrot.lane.b32.xlu0 %v286_v14, %s4671_s27 }
  0x9e   : > { %416 = vrot.lane.b32.xlu1 %v286_v14, %s4670_s26 }
  0x9f   : > { %390 = vrot.lane.b32.xlu0 %v286_v14, %s4673_s29 }
  0xa2   : > { %308 = vrot.lane.b32.xlu1 %v4605_v22, %s4674_s30 }
  0xa3   : > { %439 = vrot.lane.b32.xlu0 %v286_v14, %s4675_s6 }
  0xa6   : > { %441 = vrot.lane.b32.xlu1 %v4606_v23, %s4675_s6 }
  0xa7   : > { %348 = vrot.lane.b32.xlu0 %v292_v15, %s4669_s25 }
  0xaa   : > { %304 = vrot.lane.b32.xlu1 %v302_v24, %s4674_s30 }
  0xab   : > { %328 = vrot.lane.b32.xlu0 %v292_v15, %s4671_s27 }
  0xae   : > { %418 = vrot.lane.b32.xlu1 %v292_v15, %s4670_s26 }
  0xaf   : > { %392 = vrot.lane.b32.xlu0 %v292_v15, %s4673_s29 }
  0xb2   : > { %374 = vrot.lane.b32.xlu1 %v292_v15, %s4672_s28 }
  0xb3   : > { %372 = vrot.lane.b32.xlu0 %v286_v14, %s4672_s28 }
  0xb6   : > { %437 = vrot.lane.b32.xlu1 %v302_v24, %s4675_s6 }
  0xb7   : > { %457 = vrot.lane.b32.xlu0 %v292_v15, %s4676_s7 }
  0xba   : > { %459 = vrot.lane.b32.xlu1 %v451_v25, %s4676_s7 }
  0xbb   : > { %455 = vrot.lane.b32.xlu0 %v286_v14, %s4676_s7 }
  0xbe   : > { %484 = vperm.xlu1 %4602, %v481_v27  }
 0x100   : > { %v351_v28 = vpop.permute.xlu1 %350 }
 0x101   : > { %v421_v29 = vpop.permute.xlu0 %420 }
 0x104   : > { %v331_v30 = vpop.permute.xlu1 %330 }
 0x105   : > { %v377_v31 = vpop.permute.xlu0 %376 }
 0x108   : > { %v395_v32 = vpop.permute.xlu1 %394 }
 0x109   : > { %v307_v33 = vpop.permute.xlu0 %306 }
 0x10c   : > { %v347_v34 = vpop.permute.xlu1 %346 }
 0x10d   : > { %v327_v35 = vpop.permute.xlu0 %326 }
 0x110   : > { %v417_v36 = vpop.permute.xlu1 %416 }
 0x111   : > { %v391_v37 = vpop.permute.xlu0 %390 }
 0x114   : > { %v309_v38 = vpop.permute.xlu1 %308 }
 0x115   : > { %v312_v39 = vsel %vm310_vm8, %v307_v33, %v309_v38  ;;  %v440_v40 = vpop.permute.xlu0 %439 }
 0x116   : > { %316 = vst [vmem:[#allocation3 + $0x8] sm:$0xf0] %v312_v39 }
 0x118   : > { %v442_v41 = vpop.permute.xlu1 %441 }
 0x119   : > { %v445_v43 = vsel %vm443_vm9, %v440_v40, %v442_v41  ;;  %v349_v45 = vpop.permute.xlu0 %348 }
 0x11a   : > { %449 = vst [vmem:[#allocation3 + $0x38] sm:$0xf0] %v445_v43  ;;  %v353_v46 = vsel %vm352_vm10, %v347_v34, %v349_v45  ;;  %v354_v47 = vsel %vm352_vm10, %v349_v45, %v351_v28 }
 0x11b   : > { %v357_v48 = vsel %vm257_vm6, %v353_v46, 0.0  ;;  %v358_v49 = vsel %vm258_vm7, %v354_v47, 0.0 }
 0x11c   : > { %v305_v50 = vpop.permute.xlu1 %304  ;;  %v361_v51 = vrot.slane %v357_v48, 4  ;;  %v362_v52 = vrot.slane %v358_v49, 4 }
 0x11d   : > { %v311_v53 = vsel %vm310_vm8, %v305_v50, %v307_v33  ;;  %v329_v54 = vpop.permute.xlu0 %328  ;;  %v472_v19 = vld [vmem:[#allocation3 + $0x8] sm:$0xff] }
 0x11e   : > { %315 = vst [vmem:[#allocation3] sm:$0xf0] %v311_v53  ;;  %365 = vst [vmem:[#allocation3 + $0x10] sm:$0xf0] %v361_v51  ;;  %v333_v55 = vsel %vm332_vm12, %v327_v35, %v329_v54  ;;  %v334_v56 = vsel %vm332_vm12, %v329_v54, %v331_v30 }
 0x11f   : > { %366 = vst [vmem:[#allocation3 + $0x18] sm:$0xf0] %v362_v52  ;;  %v337_v57 = vsel %vm267_vm11, %v333_v55, 0.0  ;;  %v338_v58 = vsel %vm268_vm13, %v334_v56, 0.0 }
 0x120   : > { %v419_v59 = vpop.permute.xlu1 %418  ;;  %339 = vst [vmem:[#allocation3 + $0x10] sm:$0xf] %v337_v57  ;;  %340 = vst [vmem:[#allocation3 + $0x18] sm:$0xf] %v338_v58 }
 0x121   : > { %v423_v60 = vsel %vm6022_vm14, %v417_v36, %v419_v59  ;;  %v424_v61 = vsel %vm6022_vm14, %v419_v59, %v421_v29  ;;  %v393_v62 = vpop.permute.xlu0 %392 }
 0x122   : > { %v427_v63 = vsel %vm257_vm6, %v423_v60, 0.0  ;;  %v428_v2 = vsel %vm258_vm7, %v424_v61, 0.0  ;;  %v397_v3 = vsel %vm396_vm15, %v391_v37, %v393_v62  ;;  %v398_v4 = vsel %vm396_vm15, %v393_v62, %v395_v32 }
 0x123   : > { %429 = vst [vmem:[#allocation3 + $0x30] sm:$0xf] %v427_v63  ;;  %430 = vst [vmem:[#allocation3 + $0x38] sm:$0xf] %v428_v2  ;;  %v401_v5 = vsel %vm267_vm11, %v397_v3, 0.0  ;;  %v402_v6 = vsel %vm268_vm13, %v398_v4, 0.0 }
 0x124   : > { %v375_v9 = vpop.permute.xlu1 %374  ;;  %v405_v13 = vrot.slane %v401_v5, 4  ;;  %v406_v14 = vrot.slane %v402_v6, 4 }
 0x125   : > { %v380_v15 = vsel %vm6023_vm0, %v375_v9, %v377_v31  ;;  %v471_v16 = vld [vmem:[#allocation3] sm:$0xff]  ;;  %v373_v17 = vpop.permute.xlu0 %372 }
 0x126   : > { %384 = vst [vmem:[#allocation3 + $0x28] sm:$0xf] %v380_v15  ;;  %409 = vst [vmem:[#allocation3 + $0x20] sm:$0xf0] %v405_v13  ;;  %v379_v18 = vsel %vm6023_vm0, %v373_v17, %v375_v9  ;;  %v4402_v17 = vld [vmem:[%s6017_s2 + $0x4] sm:$0xf] }
 0x127   : > { %410 = vst [vmem:[#allocation3 + $0x28] sm:$0xf0] %v406_v14  ;;  %v473_v20 = vld [vmem:[#allocation3 + $0x10] sm:$0xff]  ;;  %v474_v21 = vld [vmem:[#allocation3 + $0x18] sm:$0xff]  ;;  %383 = vst [vmem:[#allocation3 + $0x20] sm:$0xf] %v379_v18 }
 0x128   : > { %v438_v22 = vpop.permute.xlu1 %437  ;;  %v4471_v24 = vpack.c.bf16 %v474_v21, %v472_v19  ;;  %v4473_v25 = vpack.c.bf16 %v473_v20, %v471_v16 }
 0x129   : > { %v444_v23 = vsel %vm443_vm9, %v438_v22, %v440_v40  ;;  %v458_v26 = vpop.permute.xlu0 %457  ;;  %v470_v40 = vld [vmem:[%s6016_s1] sm:$0xf] }
 0x12a   : > { %448 = vst [vmem:[#allocation3 + $0x30] sm:$0xf0] %v444_v23  ;;  %4472 = vmatprep.subr.bf16.mxu0 %v4471_v24  ;;  %v478_v29 = vld [vmem:[#allocation3 + $0x38] sm:$0xff] }
 0x12b   : > { %4474 = vmatpush1.bf16.msra.mxu0 %v4473_v25 }
 0x12c   : > { %v460_v27 = vpop.permute.xlu1 %459 }
 0x12d   : > { %v463_v28 = vsel %vm6021_vm1, %v458_v26, %v460_v27  ;;  %v456_v31 = vpop.permute.xlu0 %455 }
 0x12e   : > { %v476_v30 = vld [vmem:[#allocation3 + $0x28] sm:$0xff]  ;;  %v467_v32 = vsel %vm268_vm13, %v463_v28, 0.0  ;;  %v462_v33 = vsel %vm6021_vm1, %v456_v31, %v458_v26  ;;  %v475_v36 = vld [vmem:[#allocation3 + $0x20] sm:$0xff]  ;;  %vm487_vm1 = vcmask 293888  }
 0x12f   : > { %469 = vst [vmem:[#allocation3 + $0x48] sm:$0xf] %v467_v32  ;;  %v4475_v34 = vpack.c.bf16 %v478_v29, %v476_v30  ;;  %v466_v35 = vsel %vm267_vm11, %v462_v33, 0.0 }
 0x130   : > { %468 = vst [vmem:[#allocation3 + $0x40] sm:$0xf] %v466_v35 }
 0x131   : > { %v477_v37 = vld [vmem:[#allocation3 + $0x30] sm:$0xff]  ;;  %4476 = vmatprep.subr.bf16.mxu0 %v4475_v34 }
 0x132   : > { %v4477_v38 = vpack.c.bf16 %v477_v37, %v475_v36 }
 0x134   : > { %4478 = vmatpush1.bf16.msra.mxu0 %v4477_v38 }
 0x136   : > { %v480_v39 = vld [vmem:[#allocation3 + $0x48] sm:$0xf] }
 0x137   : > { %4398 = vmatprep.subr.msk.mxu0 %vm491_vm2, %v480_v39  ;;  %v479_v41 = vld [vmem:[#allocation3 + $0x40] sm:$0xf] }
 0x138   : > { %4399 = vmatpush1.msk.msra.mxu0 %vm491_vm2, %v479_v41 }
 0x139   : > { %4400 = vmatmul.mubr.msk.f32.vlgmr.msra.gmra.mrb[0].mxu0 %vm487_vm1, %v470_v40 }
 0x13a   : > { %1130 = vmatprep.mubr.f32.mxu0 %v4667_v0 }
 0x13d   : > { %v485_v43 = vpop.permute.xlu1 %484 }
 0x20c   : > { %v564_v45 = vpop.f32.mrb[0].mxu0 }
 0x20d   : > { %v565_v46 = vadd.f32 %v564_v45, %v485_v43  ;;  %v566_v47 = vpop.f32.mrb[1].mxu0 }
 0x20e   : > { %v567_v48 = vadd.f32 %v566_v47, %v485_v43 }
 0x20f   : > { %v571_v49 = vmin.f32 %v565_v46, 0.0  ;;  %v569_v51 = vmax.f32 %v565_v46, 0.0 }
 0x210   : > { %v572_v50 = vmin.f32 %v567_v48, 0.0  ;;  %v570_v53 = vmax.f32 %v567_v48, 0.0 }
 0x211   : > { %v573_v52 = vmul.f32 0.25, %v571_v49 }
 0x212   : > { %v574_v54 = vmul.f32 0.25, %v572_v50 }
 0x213   : > { %v575_v55 = vadd.f32 %v573_v52, %v569_v51 }
 0x214   : > { %v576_v56 = vadd.f32 %v574_v54, %v570_v53 }
 0x216   : > { %v579_v57 = vcombine.low %v575_v55, %v576_v56 }
 0x218   : > { %580 = vrot.lane.b32.xlu0 %v579_v57, %s4668_s24 }
 0x28a   : > { %v581_v58 = vpop.permute.xlu0 %580 }
 0x28b   : > { %v582_v59 = vrot.slane %v581_v58, 4 }
 0x28d   : > { %v583_v60 = vsel %vm6025_vm3, %v582_v59, %v581_v58  ;;  %587 = vst.msk [vmem:[#allocation2 + $0x8] sm:$0xf] %vm6024_vm4, %v582_v59 }
 0x28e   : > { %586 = vst.msk [vmem:[#allocation2] sm:$0xff] %vm4739_vm5, %v583_v60 }
 0x294   : > { %v634_v61 = vld [vmem:[#allocation2 + $0x8] sm:$0xf] }
 0x295   : > { %v615_v62 = vld [vmem:[#allocation2 + $0x8] sm:$0xf]  ;;  %642 = vrot.lane.b32.xlu0 %v634_v61, %s4669_s25  ;;  %v633_v63 = vld [vmem:[#allocation2] sm:$0xff] }
 0x296   : > { %623 = vrot.lane.b32.xlu1 %v615_v62, %s4671_s27  ;;  %v590_v2 = vcombine.high %v633_v63, %v633_v63  ;;  %v592_v3 = vsel %vm257_vm6, %v633_v63, 0.0  ;;  %v701_v4 = vld [vmem:[#allocation2 + $0x8] sm:$0xf]  ;;  %v600_v15 = vcombine.low %v633_v63, %v633_v63 }
 0x297   : > { %594 = vst [vmem:[#allocation3] sm:$0xf] %v592_v3  ;;  %v676_v5 = vld [vmem:[#allocation2 + $0x8] sm:$0xf] }
 0x298   : > { %v593_v6 = vsel %vm258_vm7, %v590_v2, 0.0  ;;  %v659_v9 = vld [vmem:[#allocation2 + $0x8] sm:$0xf] }
 0x299   : > { %709 = vrot.lane.b32.xlu0 %v701_v4, %s4670_s26  ;;  %595 = vst [vmem:[#allocation3 + $0x8] sm:$0xf] %v593_v6  ;;  %v4609_v13 = vld [vmem:[#allocation2 + $0x8] ss:$0 sps:$4 sm:$0xff]  }
 0x29a   : > { %684 = vrot.lane.b32.xlu1 %v676_v5, %s4673_s29  ;;  %v4610_v14 = vld [vmem:[#allocation2 + $0x8] ss:$0 sps:$4 sm:$0xff]  }
 0x29b   : > { %v738_v16 = vld [vmem:[#allocation2 + $0x8] sm:$0xf] }
 0x29d   : > { %667 = vrot.lane.b32.xlu0 %v659_v9, %s4672_s28 }
 0x29e   : > { %638 = vrot.lane.b32.xlu1 %v633_v63, %s4669_s25 }
 0x2a1   : > { %604 = vrot.lane.b32.xlu0 %v633_v63, %s4674_s30 }
 0x2a2   : > { %705 = vrot.lane.b32.xlu1 %v633_v63, %s4670_s26 }
 0x2a5   : > { %619 = vrot.lane.b32.xlu0 %v633_v63, %s4671_s27 }
 0x2a6   : > { %606 = vrot.lane.b32.xlu1 %v4609_v13, %s4674_s30 }
 0x2a9   : > { %680 = vrot.lane.b32.xlu0 %v633_v63, %s4673_s29 }
 0x2aa   : > { %729 = vrot.lane.b32.xlu1 %v4610_v14, %s4675_s6 }
 0x2ad   : > { %727 = vrot.lane.b32.xlu0 %v633_v63, %s4675_s6 }
 0x2ae   : > { %640 = vrot.lane.b32.xlu1 %v590_v2, %s4669_s25 }
 0x2b1   : > { %621 = vrot.lane.b32.xlu0 %v590_v2, %s4671_s27 }
 0x2b2   : > { %602 = vrot.lane.b32.xlu1 %v600_v15, %s4674_s30 }
 0x2b5   : > { %682 = vrot.lane.b32.xlu0 %v590_v2, %s4673_s29 }
 0x2b6   : > { %707 = vrot.lane.b32.xlu1 %v590_v2, %s4670_s26 }
 0x2b9   : > { %663 = vrot.lane.b32.xlu0 %v633_v63, %s4672_s28 }
 0x2ba   : > { %665 = vrot.lane.b32.xlu1 %v590_v2, %s4672_s28 }
 0x2bd   : > { %744 = vrot.lane.b32.xlu0 %v590_v2, %s4676_s7 }
 0x2be   : > { %725 = vrot.lane.b32.xlu1 %v600_v15, %s4675_s6 }
 0x2c1   : > { %742 = vrot.lane.b32.xlu0 %v633_v63, %s4676_s7 }
 0x2c2   : > { %746 = vrot.lane.b32.xlu1 %v738_v16, %s4676_s7 }
 0x2c6   : > { %772 = vperm.xlu1 %4602, %v4402_v17  }
 0x307   : > { %v643_v18 = vpop.permute.xlu0 %642 }
 0x308   : > { %v624_v19 = vpop.permute.xlu1 %623 }
 0x30b   : > { %v710_v20 = vpop.permute.xlu0 %709 }
 0x30c   : > { %v685_v21 = vpop.permute.xlu1 %684 }
 0x30f   : > { %v668_v22 = vpop.permute.xlu0 %667 }
 0x310   : > { %v639_v23 = vpop.permute.xlu1 %638 }
 0x313   : > { %v605_v25 = vpop.permute.xlu0 %604 }
 0x314   : > { %v706_v24 = vpop.permute.xlu1 %705 }
 0x317   : > { %v620_v27 = vpop.permute.xlu0 %619 }
 0x318   : > { %v607_v26 = vpop.permute.xlu1 %606 }
 0x319   : > { %v609_v28 = vsel %vm310_vm8, %v605_v25, %v607_v26 }
 0x31a   : > { %613 = vst [vmem:[#allocation3 + $0x8] sm:$0xf0] %v609_v28 }
 0x31b   : > { %v681_v30 = vpop.permute.xlu0 %680 }
 0x31c   : > { %v730_v29 = vpop.permute.xlu1 %729 }
 0x31f   : > { %v728_v32 = vpop.permute.xlu0 %727 }
 0x320   : > { %v641_v31 = vpop.permute.xlu1 %640  ;;  %v732_v35 = vsel %vm443_vm9, %v728_v32, %v730_v29 }
 0x321   : > { %v644_v33 = vsel %vm352_vm10, %v639_v23, %v641_v31  ;;  %v645_v34 = vsel %vm352_vm10, %v641_v31, %v643_v18  ;;  %736 = vst [vmem:[#allocation3 + $0x38] sm:$0xf0] %v732_v35  ;;  %v759_v4 = vld [vmem:[#allocation3 + $0x8] sm:$0xff]  ;;  %v4401_v31 = vld [vmem:[%s6016_s1 + $0x4] sm:$0xf] }
 0x322   : > { %v648_v36 = vsel %vm257_vm6, %v644_v33, 0.0  ;;  %v649_v37 = vsel %vm258_vm7, %v645_v34, 0.0  ;;  %v4930_v34 = vcombine.high %v4729_v1, %v4729_v1 }
 0x323   : > { %v652_v38 = vrot.slane %v648_v36, 4  ;;  %v653_v39 = vrot.slane %v649_v37, 4  ;;  %v622_v40 = vpop.permute.xlu0 %621 }
 0x324   : > { %v603_v41 = vpop.permute.xlu1 %602  ;;  %v625_v43 = vsel %vm332_vm12, %v620_v27, %v622_v40  ;;  %v626_v45 = vsel %vm332_vm12, %v622_v40, %v624_v19 }
 0x325   : > { %656 = vst [vmem:[#allocation3 + $0x10] sm:$0xf0] %v652_v38  ;;  %657 = vst [vmem:[#allocation3 + $0x18] sm:$0xf0] %v653_v39  ;;  %v608_v46 = vsel %vm310_vm8, %v603_v41, %v605_v25  ;;  %v629_v47 = vsel %vm267_vm11, %v625_v43, 0.0  ;;  %v630_v48 = vsel %vm268_vm13, %v626_v45, 0.0 }
 0x326   : > { %612 = vst [vmem:[#allocation3] sm:$0xf0] %v608_v46  ;;  %631 = vst [vmem:[#allocation3 + $0x10] sm:$0xf] %v629_v47 }
 0x327   : > { %632 = vst [vmem:[#allocation3 + $0x18] sm:$0xf] %v630_v48  ;;  %v683_v49 = vpop.permute.xlu0 %682 }
 0x328   : > { %v708_v50 = vpop.permute.xlu1 %707  ;;  %v686_v51 = vsel %vm396_vm15, %v681_v30, %v683_v49  ;;  %v687_v52 = vsel %vm396_vm15, %v683_v49, %v685_v21 }
 0x329   : > { %v711_v53 = vsel %vm6022_vm14, %v706_v24, %v708_v50  ;;  %v712_v54 = vsel %vm6022_vm14, %v708_v50, %v710_v20  ;;  %v690_v55 = vsel %vm267_vm11, %v686_v51, 0.0  ;;  %v691_v56 = vsel %vm268_vm13, %v687_v52, 0.0 }
 0x32a   : > { %v715_v57 = vsel %vm257_vm6, %v711_v53, 0.0  ;;  %v716_v58 = vsel %vm258_vm7, %v712_v54, 0.0  ;;  %v694_v59 = vrot.slane %v690_v55, 4  ;;  %v695_v60 = vrot.slane %v691_v56, 4 }
 0x32b   : > { %717 = vst [vmem:[#allocation3 + $0x30] sm:$0xf] %v715_v57  ;;  %718 = vst [vmem:[#allocation3 + $0x38] sm:$0xf] %v716_v58  ;;  %v664_v61 = vpop.permute.xlu0 %663  ;;  %vm6028_vm14 = vcmask 769024  }
 0x32c   : > { %v666_v62 = vpop.permute.xlu1 %665  ;;  %698 = vst [vmem:[#allocation3 + $0x20] sm:$0xf0] %v694_v59  ;;  %699 = vst [vmem:[#allocation3 + $0x28] sm:$0xf0] %v695_v60  ;;  %v4407_v58 = vld [vmem:[%s6017_s2 + $0x8] sm:$0xf] }
 0x32d   : > { %v758_v63 = vld [vmem:[#allocation3] sm:$0xff]  ;;  %v669_v2 = vsel %vm6023_vm0, %v664_v61, %v666_v62  ;;  %v670_v3 = vsel %vm6023_vm0, %v666_v62, %v668_v22  ;;  %v760_v5 = vld [vmem:[#allocation3 + $0x10] sm:$0xff]  ;;  %vm6029_vm0 = vmmov %vm6028_vm14 }
 0x32e   : > { %v761_v6 = vld [vmem:[#allocation3 + $0x18] sm:$0xff]  ;;  %673 = vst [vmem:[#allocation3 + $0x20] sm:$0xf] %v669_v2  ;;  %674 = vst [vmem:[#allocation3 + $0x28] sm:$0xf] %v670_v3  ;;  %v4481_v13 = vpack.c.bf16 %v760_v5, %v758_v63 }
 0x32f   : > { %v4479_v9 = vpack.c.bf16 %v761_v6, %v759_v4  ;;  %v745_v14 = vpop.permute.xlu0 %744 }
 0x330   : > { %v726_v15 = vpop.permute.xlu1 %725 }
 0x331   : > { %v731_v16 = vsel %vm443_vm9, %v726_v15, %v728_v32  ;;  %4480 = vmatprep.subr.bf16.mxu1 %v4479_v9 }
 0x332   : > { %735 = vst [vmem:[#allocation3 + $0x30] sm:$0xf0] %v731_v16  ;;  %4482 = vmatpush1.bf16.msra.mxu1 %v4481_v13  ;;  %v765_v19 = vld [vmem:[#allocation3 + $0x38] sm:$0xff] }
 0x333   : > { %v743_v17 = vpop.permute.xlu0 %742 }
 0x334   : > { %v747_v18 = vpop.permute.xlu1 %746  ;;  %v748_v21 = vsel %vm6028_vm14, %v743_v17, %v745_v14  ;;  %vm6030_vm14 = vcmask 785408  }
 0x335   : > { %v763_v20 = vld [vmem:[#allocation3 + $0x28] sm:$0xff]  ;;  %v749_v22 = vsel %vm6029_vm0, %v745_v14, %v747_v18  ;;  %v752_v23 = vsel %vm267_vm11, %v748_v21, 0.0  ;;  %v762_v26 = vld [vmem:[#allocation3 + $0x20] sm:$0xff]  ;;  %vm6031_vm0 = vmmov %vm6030_vm14 }
 0x336   : > { %v753_v24 = vsel %vm268_vm13, %v749_v22, 0.0  ;;  %v4483_v25 = vpack.c.bf16 %v765_v19, %v763_v20  ;;  %754 = vst [vmem:[#allocation3 + $0x40] sm:$0xf] %v752_v23 }
 0x337   : > { %755 = vst [vmem:[#allocation3 + $0x48] sm:$0xf] %v753_v24 }
 0x338   : > { %4484 = vmatprep.subr.bf16.mxu1 %v4483_v25 }
 0x339   : > { %v764_v27 = vld [vmem:[#allocation3 + $0x30] sm:$0xff] }
 0x33a   : > { %v4485_v28 = vpack.c.bf16 %v764_v27, %v762_v26 }
 0x33c   : > { %4486 = vmatpush1.bf16.msra.mxu1 %v4485_v28 }
 0x33d   : > { %v766_v29 = vld [vmem:[#allocation3 + $0x40] sm:$0xf] }
 0x33e   : > { %v767_v30 = vld [vmem:[#allocation3 + $0x48] sm:$0xf] }
 0x33f   : > { %4403 = vmatprep.subr.msk.mxu1 %vm491_vm2, %v767_v30 }
 0x340   : > { %4404 = vmatpush1.msk.msra.mxu1 %vm491_vm2, %v766_v29 }
 0x341   : > { %4405 = vmatmul.mubr.msk.f32.vlgmr.msra.gmra.mrb[0].mxu1 %vm487_vm1, %v4401_v31 }
 0x342   : > { %1416 = vmatprep.mubr.f32.mxu1 %v4667_v0 }
 0x345   : > { %v773_v32 = vpop.permute.xlu1 %772 }
 0x414   : > { %v850_v33 = vpop.f32.mrb[0].mxu1 }
 0x415   : > { %v851_v35 = vadd.f32 %v850_v33, %v773_v32  ;;  %v852_v36 = vpop.f32.mrb[1].mxu1 }
 0x416   : > { %v853_v37 = vadd.f32 %v852_v36, %v773_v32 }
 0x417   : > { %v4933_v38 = vadd.f32 %v851_v35, %v4729_v1 }
 0x418   : > { %v4936_v39 = vadd.f32 %v4930_v34, %v853_v37 }
 0x41a   : > { %v861_v40 = vcombine.low %v4933_v38, %v4936_v39 }
 0x41c   : > { %862 = vrot.lane.b32.xlu0 %v861_v40, %s4668_s24 }
 0x48e   : > { %v863_v41 = vpop.permute.xlu0 %862 }
 0x48f   : > { %v864_v43 = vrot.slane %v863_v41, 4 }
 0x491   : > { %v865_v45 = vsel %vm6025_vm3, %v864_v43, %v863_v41  ;;  %869 = vst.msk [vmem:[#allocation2 + $0x8] sm:$0xf] %vm6024_vm4, %v864_v43 }
 0x492   : > { %868 = vst.msk [vmem:[#allocation2] sm:$0xff] %vm4739_vm5, %v865_v45 }
 0x498   : > { %v916_v46 = vld [vmem:[#allocation2 + $0x8] sm:$0xf] }
 0x499   : > { %v897_v1 = vld [vmem:[#allocation2 + $0x8] sm:$0xf]  ;;  %924 = vrot.lane.b32.xlu0 %v916_v46, %s4669_s25  ;;  %v915_v47 = vld [vmem:[#allocation2] sm:$0xff] }
 0x49a   : > { %905 = vrot.lane.b32.xlu1 %v897_v1, %s4671_s27  ;;  %v872_v48 = vcombine.high %v915_v47, %v915_v47  ;;  %v874_v49 = vsel %vm257_vm6, %v915_v47, 0.0  ;;  %v983_v50 = vld [vmem:[#allocation2 + $0x8] sm:$0xf]  ;;  %v882_v56 = vcombine.low %v915_v47, %v915_v47 }
 0x49b   : > { %876 = vst [vmem:[#allocation3] sm:$0xf] %v874_v49  ;;  %v958_v51 = vld [vmem:[#allocation2 + $0x8] sm:$0xf] }
 0x49c   : > { %v875_v52 = vsel %vm258_vm7, %v872_v48, 0.0  ;;  %v941_v53 = vld [vmem:[#allocation2 + $0x8] sm:$0xf] }
 0x49d   : > { %991 = vrot.lane.b32.xlu0 %v983_v50, %s4670_s26  ;;  %877 = vst [vmem:[#allocation3 + $0x8] sm:$0xf] %v875_v52  ;;  %v4613_v54 = vld [vmem:[#allocation2 + $0x8] ss:$0 sps:$4 sm:$0xff]  }
 0x49e   : > { %966 = vrot.lane.b32.xlu1 %v958_v51, %s4673_s29  ;;  %v4614_v55 = vld [vmem:[#allocation2 + $0x8] ss:$0 sps:$4 sm:$0xff]  }
 0x49f   : > { %v1020_v57 = vld [vmem:[#allocation2 + $0x8] sm:$0xf] }
 0x4a1   : > { %949 = vrot.lane.b32.xlu0 %v941_v53, %s4672_s28 }
 0x4a2   : > { %920 = vrot.lane.b32.xlu1 %v915_v47, %s4669_s25 }
 0x4a5   : > { %886 = vrot.lane.b32.xlu0 %v915_v47, %s4674_s30 }
 0x4a6   : > { %987 = vrot.lane.b32.xlu1 %v915_v47, %s4670_s26 }
 0x4a9   : > { %901 = vrot.lane.b32.xlu0 %v915_v47, %s4671_s27 }
 0x4aa   : > { %888 = vrot.lane.b32.xlu1 %v4613_v54, %s4674_s30 }
 0x4ad   : > { %962 = vrot.lane.b32.xlu0 %v915_v47, %s4673_s29 }
 0x4ae   : > { %1011 = vrot.lane.b32.xlu1 %v4614_v55, %s4675_s6 }
 0x4b1   : > { %1009 = vrot.lane.b32.xlu0 %v915_v47, %s4675_s6 }
 0x4b2   : > { %922 = vrot.lane.b32.xlu1 %v872_v48, %s4669_s25 }
 0x4b5   : > { %903 = vrot.lane.b32.xlu0 %v872_v48, %s4671_s27 }
 0x4b6   : > { %884 = vrot.lane.b32.xlu1 %v882_v56, %s4674_s30 }
 0x4b9   : > { %964 = vrot.lane.b32.xlu0 %v872_v48, %s4673_s29 }
 0x4ba   : > { %989 = vrot.lane.b32.xlu1 %v872_v48, %s4670_s26 }
 0x4bd   : > { %945 = vrot.lane.b32.xlu0 %v915_v47, %s4672_s28 }
 0x4be   : > { %947 = vrot.lane.b32.xlu1 %v872_v48, %s4672_s28 }
 0x4c1   : > { %1026 = vrot.lane.b32.xlu0 %v872_v48, %s4676_s7 }
 0x4c2   : > { %1007 = vrot.lane.b32.xlu1 %v882_v56, %s4675_s6 }
 0x4c5   : > { %1024 = vrot.lane.b32.xlu0 %v915_v47, %s4676_s7 }
 0x4c6   : > { %1028 = vrot.lane.b32.xlu1 %v1020_v57, %s4676_s7 }
 0x4ca   : > { %1054 = vperm.xlu1 %4602, %v4407_v58  }
 0x50b   : > { %v925_v59 = vpop.permute.xlu0 %924 }
 0x50c   : > { %v906_v60 = vpop.permute.xlu1 %905 }
 0x50f   : > { %v992_v61 = vpop.permute.xlu0 %991 }
 0x510   : > { %v967_v62 = vpop.permute.xlu1 %966 }
 0x513   : > { %v950_v63 = vpop.permute.xlu0 %949 }
 0x514   : > { %v921_v2 = vpop.permute.xlu1 %920 }
 0x517   : > { %v887_v4 = vpop.permute.xlu0 %886 }
 0x518   : > { %v988_v3 = vpop.permute.xlu1 %987 }
 0x51b   : > { %v902_v6 = vpop.permute.xlu0 %901 }
 0x51c   : > { %v889_v5 = vpop.permute.xlu1 %888 }
 0x51d   : > { %v891_v9 = vsel %vm310_vm8, %v887_v4, %v889_v5 }
 0x51e   : > { %895 = vst [vmem:[#allocation3 + $0x8] sm:$0xf0] %v891_v9 }
 0x51f   : > { %v963_v14 = vpop.permute.xlu0 %962 }
 0x520   : > { %v1012_v13 = vpop.permute.xlu1 %1011 }
 0x523   : > { %v1010_v16 = vpop.permute.xlu0 %1009 }
 0x524   : > { %v923_v15 = vpop.permute.xlu1 %922  ;;  %v1014_v19 = vsel %vm443_vm9, %v1010_v16, %v1012_v13 }
 0x525   : > { %v926_v17 = vsel %vm352_vm10, %v921_v2, %v923_v15  ;;  %v927_v18 = vsel %vm352_vm10, %v923_v15, %v925_v59  ;;  %1018 = vst [vmem:[#allocation3 + $0x38] sm:$0xf0] %v1014_v19  ;;  %v1041_v52 = vld [vmem:[#allocation3 + $0x8] sm:$0xff] }
 0x526   : > { %v930_v20 = vsel %vm257_vm6, %v926_v17, 0.0  ;;  %v931_v21 = vsel %vm258_vm7, %v927_v18, 0.0  ;;  %v4406_v17 = vld [vmem:[%s6016_s1 + $0x8] sm:$0xf] }
 0x527   : > { %v934_v22 = vrot.slane %v930_v20, 4  ;;  %v935_v23 = vrot.slane %v931_v21, 4  ;;  %v904_v24 = vpop.permute.xlu0 %903 }
 0x528   : > { %v885_v25 = vpop.permute.xlu1 %884  ;;  %v907_v26 = vsel %vm332_vm12, %v902_v6, %v904_v24  ;;  %v908_v27 = vsel %vm332_vm12, %v904_v24, %v906_v60 }
 0x529   : > { %938 = vst [vmem:[#allocation3 + $0x10] sm:$0xf0] %v934_v22  ;;  %939 = vst [vmem:[#allocation3 + $0x18] sm:$0xf0] %v935_v23  ;;  %v890_v28 = vsel %vm310_vm8, %v885_v25, %v887_v4  ;;  %v911_v29 = vsel %vm267_vm11, %v907_v26, 0.0  ;;  %v912_v30 = vsel %vm268_vm13, %v908_v27, 0.0 }
 0x52a   : > { %894 = vst [vmem:[#allocation3] sm:$0xf0] %v890_v28  ;;  %913 = vst [vmem:[#allocation3 + $0x10] sm:$0xf] %v911_v29 }
 0x52b   : > { %914 = vst [vmem:[#allocation3 + $0x18] sm:$0xf] %v912_v30  ;;  %v965_v31 = vpop.permute.xlu0 %964 }
 0x52c   : > { %v990_v32 = vpop.permute.xlu1 %989  ;;  %v968_v33 = vsel %vm396_vm15, %v963_v14, %v965_v31  ;;  %v969_v35 = vsel %vm396_vm15, %v965_v31, %v967_v62 }
 0x52d   : > { %v993_v36 = vsel %vm6030_vm14, %v988_v3, %v990_v32  ;;  %v994_v37 = vsel %vm6031_vm0, %v990_v32, %v992_v61  ;;  %v972_v40 = vsel %vm267_vm11, %v968_v33, 0.0  ;;  %v973_v41 = vsel %vm268_vm13, %v969_v35, 0.0 }
 0x52e   : > { %v997_v43 = vsel %vm257_vm6, %v993_v36, 0.0  ;;  %v998_v45 = vsel %vm258_vm7, %v994_v37, 0.0  ;;  %v976_v46 = vrot.slane %v972_v40, 4  ;;  %v977_v1 = vrot.slane %v973_v41, 4 }
 0x52f   : > { %999 = vst [vmem:[#allocation3 + $0x30] sm:$0xf] %v997_v43  ;;  %1000 = vst [vmem:[#allocation3 + $0x38] sm:$0xf] %v998_v45  ;;  %v946_v47 = vpop.permute.xlu0 %945  ;;  %vm6032_vm14 = vcmask 908288  }
 0x530   : > { %v948_v48 = vpop.permute.xlu1 %947  ;;  %980 = vst [vmem:[#allocation3 + $0x20] sm:$0xf0] %v976_v46  ;;  %981 = vst [vmem:[#allocation3 + $0x28] sm:$0xf0] %v977_v1 }
 0x531   : > { %v1040_v49 = vld [vmem:[#allocation3] sm:$0xff]  ;;  %v951_v50 = vsel %vm6032_vm14, %v946_v47, %v948_v48  ;;  %vm6033_vm0 = vmmov %vm6032_vm14  ;;  %v1042_v53 = vld [vmem:[#allocation3 + $0x10] sm:$0xff]  ;;  %vm6034_vm14 = vcmask 769024  }
 0x532   : > { %v952_v51 = vsel %vm6033_vm0, %v948_v48, %v950_v63  ;;  %v1043_v54 = vld [vmem:[#allocation3 + $0x18] sm:$0xff]  ;;  %955 = vst [vmem:[#allocation3 + $0x20] sm:$0xf] %v951_v50  ;;  %v4489_v56 = vpack.c.bf16 %v1042_v53, %v1040_v49  ;;  %vm6035_vm0 = vmmov %vm6034_vm14 }
 0x533   : > { %956 = vst [vmem:[#allocation3 + $0x28] sm:$0xf] %v952_v51  ;;  %v4487_v55 = vpack.c.bf16 %v1043_v54, %v1041_v52  ;;  %v1027_v57 = vpop.permute.xlu0 %1026 }
 0x534   : > { %v1008_v58 = vpop.permute.xlu1 %1007 }
 0x535   : > { %v1013_v59 = vsel %vm443_vm9, %v1008_v58, %v1010_v16  ;;  %4488 = vmatprep.subr.bf16.mxu0 %v4487_v55 }
 0x536   : > { %1017 = vst [vmem:[#allocation3 + $0x30] sm:$0xf0] %v1013_v59  ;;  %4490 = vmatpush1.bf16.msra.mxu0 %v4489_v56  ;;  %v1047_v62 = vld [vmem:[#allocation3 + $0x38] sm:$0xff] }
 0x537   : > { %v1025_v60 = vpop.permute.xlu0 %1024 }
 0x538   : > { %v1029_v61 = vpop.permute.xlu1 %1028  ;;  %v1030_v63 = vsel %vm6034_vm14, %v1025_v60, %v1027_v57  ;;  %vm6036_vm14 = vmmov %vm6035_vm0 }
 0x539   : > { %v1031_v3 = vsel %vm6035_vm0, %v1027_v57, %v1029_v61  ;;  %v1034_v4 = vsel %vm267_vm11, %v1030_v63, 0.0  ;;  %v1044_v9 = vld [vmem:[#allocation3 + $0x20] sm:$0xff] }
 0x53a   : > { %v1045_v2 = vld [vmem:[#allocation3 + $0x28] sm:$0xff]  ;;  %v1035_v5 = vsel %vm268_vm13, %v1031_v3, 0.0  ;;  %1036 = vst [vmem:[#allocation3 + $0x40] sm:$0xf] %v1034_v4 }
 0x53b   : > { %v4491_v6 = vpack.c.bf16 %v1047_v62, %v1045_v2  ;;  %1037 = vst [vmem:[#allocation3 + $0x48] sm:$0xf] %v1035_v5  ;;  %v4417_v2 = vld [vmem:[%s6017_s2 + $0x10] sm:$0xf] }
 0x53d   : > { %4492 = vmatprep.subr.bf16.mxu0 %v4491_v6  ;;  %v1046_v13 = vld [vmem:[#allocation3 + $0x30] sm:$0xff] }
 0x53e   : > { %v4493_v14 = vpack.c.bf16 %v1046_v13, %v1044_v9 }
 0x540   : > { %4494 = vmatpush1.bf16.msra.mxu0 %v4493_v14 }
 0x541   : > { %v1048_v16 = vld [vmem:[#allocation3 + $0x40] sm:$0xf] }
 0x542   : > { %v1049_v15 = vld [vmem:[#allocation3 + $0x48] sm:$0xf] }
 0x543   : > { %4408 = vmatprep.subr.msk.mxu0 %vm491_vm2, %v1049_v15 }
 0x544   : > { %4409 = vmatpush1.msk.msra.mxu0 %vm491_vm2, %v1048_v16 }
 0x545   : > { %4410 = vmatmul.mubr.msk.f32.vlgmr.msra.gmra.mrb[2].mxu0 %vm487_vm1, %v4406_v17 }
 0x546   : > { %1687 = vmatprep.mubr.f32.mxu0 %v4667_v0 }
 0x549   : > { %v1055_v18 = vpop.permute.xlu1 %1054 }
 0x618   : > { %v1132_v19 = vpop.f32.mrb[2].mxu0 }
 0x619   : > { %v1133_v20 = vadd.f32 %v1132_v19, %v1055_v18  ;;  %v1134_v21 = vpop.f32.mrb[3].mxu0 }
 0x61a   : > { %v1135_v22 = vadd.f32 %v1134_v21, %v1055_v18 }
 0x61b   : > { %v1139_v23 = vmin.f32 %v1133_v20, 0.0  ;;  %v1137_v25 = vmax.f32 %v1133_v20, 0.0 }
 0x61c   : > { %v1140_v24 = vmin.f32 %v1135_v22, 0.0  ;;  %v1138_v27 = vmax.f32 %v1135_v22, 0.0 }
 0x61d   : > { %v1141_v26 = vmul.f32 0.25, %v1139_v23 }
 0x61e   : > { %v1142_v28 = vmul.f32 0.25, %v1140_v24 }
 0x61f   : > { %v1143_v29 = vadd.f32 %v1141_v26, %v1137_v25 }
 0x620   : > { %v1144_v30 = vadd.f32 %v1142_v28, %v1138_v27 }
 0x622   : > { %v1147_v31 = vcombine.low %v1143_v29, %v1144_v30 }
 0x624   : > { %1148 = vrot.lane.b32.xlu0 %v1147_v31, %s4668_s24 }
 0x696   : > { %v1149_v32 = vpop.permute.xlu0 %1148 }
 0x697   : > { %v1150_v33 = vrot.slane %v1149_v32, 4 }
 0x699   : > { %v1151_v35 = vsel %vm6025_vm3, %v1150_v33, %v1149_v32  ;;  %1155 = vst.msk [vmem:[#allocation2 + $0x8] sm:$0xf] %vm6024_vm4, %v1150_v33 }
 0x69a   : > { %1154 = vst.msk [vmem:[#allocation2] sm:$0xff] %vm4739_vm5, %v1151_v35 }
 0x6a0   : > { %v1202_v36 = vld [vmem:[#allocation2 + $0x8] sm:$0xf] }
 0x6a1   : > { %v1183_v37 = vld [vmem:[#allocation2 + $0x8] sm:$0xf]  ;;  %1210 = vrot.lane.b32.xlu0 %v1202_v36, %s4669_s25  ;;  %v1201_v46 = vld [vmem:[#allocation2] sm:$0xff] }
 0x6a2   : > { %v1269_v40 = vld [vmem:[#allocation2 + $0x8] sm:$0xf]  ;;  %1191 = vrot.lane.b32.xlu1 %v1183_v37, %s4671_s27  ;;  %v1158_v47 = vcombine.high %v1201_v46, %v1201_v46  ;;  %v1160_v48 = vsel %vm257_vm6, %v1201_v46, 0.0  ;;  %1425 = vst.msk [vmem:[#allocation2] sm:$0xff] %vm4739_vm5, %v4748_v10  ;;  %v1291_v51 = vcombine.low %v1201_v46, %v1201_v46 }
 0x6a3   : > { %v1244_v41 = vld [vmem:[#allocation2 + $0x8] sm:$0xf]  ;;  %1162 = vst [vmem:[#allocation3] sm:$0xf] %v1160_v48 }
 0x6a4   : > { %v1227_v43 = vld [vmem:[#allocation2 + $0x8] sm:$0xf]  ;;  %v1161_v50 = vsel %vm258_vm7, %v1158_v47, 0.0 }
 0x6a5   : > { %v1306_v45 = vld [vmem:[#allocation2 + $0x8] sm:$0xf]  ;;  %1277 = vrot.lane.b32.xlu0 %v1269_v40, %s4670_s26  ;;  %1163 = vst [vmem:[#allocation3 + $0x8] sm:$0xf] %v1161_v50 }
 0x6a6   : > { %v4617_v1 = vld [vmem:[#allocation2 + $0x8] ss:$0 sps:$4 sm:$0xff]   ;;  %1252 = vrot.lane.b32.xlu1 %v1244_v41, %s4673_s29 }
 0x6a7   : > { %v4619_v49 = vld [vmem:[#allocation2 + $0x8] ss:$0 sps:$4 sm:$0xff]  }
 0x6a8   : > { %1426 = vst.msk [vmem:[#allocation2 + $0x8] sm:$0xf] %vm6024_vm4, %v4743_v8  ;;  %vm6037_vm4 = vcmask 785408  }
 0x6a9   : > { %1235 = vrot.lane.b32.xlu0 %v1227_v43, %s4672_s28  ;;  %v5061_v56 = vld [vmem:[#allocation2] sm:$0xff]  ;;  %vm6038_vm3 = vmmov %vm6037_vm4 }
 0x6aa   : > { %1314 = vrot.lane.b32.xlu1 %v1306_v45, %s4676_s7  ;;  %v1429_v59 = vcombine.high %v5061_v56, %v5061_v56  ;;  %v1439_v61 = vcombine.low %v5061_v56, %v5061_v56 }
 0x6ac   : > { %v1432_v25 = vsel %vm258_vm7, %v1429_v59, 0.0 }
 0x6ad   : > { %1172 = vrot.lane.b32.xlu0 %v1201_v46, %s4674_s30 }
 0x6ae   : > { %1206 = vrot.lane.b32.xlu1 %v1201_v46, %s4669_s25 }
 0x6af   : > { %v1454_v52 = vld [vmem:[#allocation2 + $0x8] sm:$0xf] }
 0x6b0   : > { %v1515_v53 = vld [vmem:[#allocation2 + $0x8] sm:$0xf] }
 0x6b1   : > { %1187 = vrot.lane.b32.xlu0 %v1201_v46, %s4671_s27  ;;  %v1540_v54 = vld [vmem:[#allocation2 + $0x8] sm:$0xf] }
 0x6b2   : > { %1273 = vrot.lane.b32.xlu1 %v1201_v46, %s4670_s26  ;;  %v1473_v55 = vld [vmem:[#allocation2 + $0x8] sm:$0xf] }
 0x6b3   : > { %v1498_v57 = vld [vmem:[#allocation2 + $0x8] sm:$0xf] }
 0x6b4   : > { %v4622_v58 = vld [vmem:[#allocation2 + $0x8] ss:$0 sps:$4 sm:$0xff]  }
 0x6b5   : > { %1248 = vrot.lane.b32.xlu0 %v1201_v46, %s4673_s29  ;;  %v4623_v60 = vld [vmem:[#allocation2 + $0x8] ss:$0 sps:$4 sm:$0xff]  }
 0x6b6   : > { %1310 = vrot.lane.b32.xlu1 %v1201_v46, %s4676_s7  ;;  %v1577_v62 = vld [vmem:[#allocation2 + $0x8] sm:$0xf] }
 0x6b9   : > { %1295 = vrot.lane.b32.xlu0 %v1201_v46, %s4675_s6 }
 0x6ba   : > { %1174 = vrot.lane.b32.xlu1 %v4617_v1, %s4674_s30 }
 0x6bd   : > { %1231 = vrot.lane.b32.xlu0 %v1201_v46, %s4672_s28 }
 0x6be   : > { %1297 = vrot.lane.b32.xlu1 %v4619_v49, %s4675_s6 }
 0x6c1   : > { %1189 = vrot.lane.b32.xlu0 %v1158_v47, %s4671_s27 }
 0x6c2   : > { %1208 = vrot.lane.b32.xlu1 %v1158_v47, %s4669_s25 }
 0x6c5   : > { %1250 = vrot.lane.b32.xlu0 %v1158_v47, %s4673_s29 }
 0x6c6   : > { %1170 = vrot.lane.b32.xlu1 %v1291_v51, %s4674_s30 }
 0x6c9   : > { %1312 = vrot.lane.b32.xlu0 %v1158_v47, %s4676_s7 }
 0x6ca   : > { %1275 = vrot.lane.b32.xlu1 %v1158_v47, %s4670_s26 }
 0x6cd   : > { %1462 = vrot.lane.b32.xlu0 %v1454_v52, %s4671_s27 }
 0x6ce   : > { %1233 = vrot.lane.b32.xlu1 %v1158_v47, %s4672_s28 }
 0x6d1   : > { %1523 = vrot.lane.b32.xlu0 %v1515_v53, %s4673_s29 }
 0x6d2   : > { %1293 = vrot.lane.b32.xlu1 %v1291_v51, %s4675_s6 }
 0x6d5   : > { %1548 = vrot.lane.b32.xlu0 %v1540_v54, %s4670_s26 }
 0x6d6   : > { %1481 = vrot.lane.b32.xlu1 %v1473_v55, %s4669_s25 }
 0x6d9   : > { %1506 = vrot.lane.b32.xlu0 %v1498_v57, %s4672_s28 }
 0x6da   : > { %1443 = vrot.lane.b32.xlu1 %v5061_v56, %s4674_s30 }
 0x6dd   : > { %1477 = vrot.lane.b32.xlu0 %v5061_v56, %s4669_s25 }
 0x6de   : > { %1458 = vrot.lane.b32.xlu1 %v5061_v56, %s4671_s27 }
 0x6e1   : > { %1519 = vrot.lane.b32.xlu0 %v5061_v56, %s4673_s29 }
 0x6e2   : > { %1544 = vrot.lane.b32.xlu1 %v5061_v56, %s4670_s26 }
 0x6e5   : > { %1566 = vrot.lane.b32.xlu0 %v5061_v56, %s4675_s6 }
 0x6e6   : > { %1568 = vrot.lane.b32.xlu1 %v4622_v58, %s4675_s6 }
 0x6e9   : > { %1445 = vrot.lane.b32.xlu0 %v4623_v60, %s4674_s30 }
 0x6ea   : > { %1460 = vrot.lane.b32.xlu1 %v1429_v59, %s4671_s27 }
 0x6ed   : > { %1479 = vrot.lane.b32.xlu0 %v1429_v59, %s4669_s25 }
 0x6ee   : > { %1521 = vrot.lane.b32.xlu1 %v1429_v59, %s4673_s29 }
 0x6f1   : > { %1441 = vrot.lane.b32.xlu0 %v1439_v61, %s4674_s30 }
 0x6f2   : > { %1546 = vrot.lane.b32.xlu1 %v1429_v59, %s4670_s26 }
 0x6f5   : > { %1502 = vrot.lane.b32.xlu0 %v5061_v56, %s4672_s28 }
 0x6f6   : > { %1504 = vrot.lane.b32.xlu1 %v1429_v59, %s4672_s28 }
 0x6f9   : > { %1583 = vrot.lane.b32.xlu0 %v1429_v59, %s4676_s7 }
 0x6fa   : > { %1564 = vrot.lane.b32.xlu1 %v1439_v61, %s4675_s6 }
 0x6fd   : > { %1581 = vrot.lane.b32.xlu0 %v5061_v56, %s4676_s7 }
 0x6fe   : > { %1585 = vrot.lane.b32.xlu1 %v1577_v62, %s4676_s7 }
 0x702   : > { %1611 = vperm.xlu1 %4602, %v4417_v2  }
 0x713   : > { %v1211_v63 = vpop.permute.xlu0 %1210 }
 0x714   : > { %v1192_v3 = vpop.permute.xlu1 %1191 }
 0x717   : > { %v1278_v4 = vpop.permute.xlu0 %1277 }
 0x718   : > { %v1253_v5 = vpop.permute.xlu1 %1252 }
 0x71b   : > { %v5098_v6 = vpop.permute.xlu0 %1235 }
 0x71c   : > { %v1315_v9 = vpop.permute.xlu1 %1314 }
 0x71f   : > { %v1173_v14 = vpop.permute.xlu0 %1172 }
 0x720   : > { %v1207_v13 = vpop.permute.xlu1 %1206 }
 0x723   : > { %v1188_v16 = vpop.permute.xlu0 %1187 }
 0x724   : > { %v1274_v15 = vpop.permute.xlu1 %1273 }
 0x727   : > { %v1249_v18 = vpop.permute.xlu0 %1248 }
 0x728   : > { %v1311_v17 = vpop.permute.xlu1 %1310 }
 0x72b   : > { %v5100_v20 = vpop.permute.xlu0 %1295 }
 0x72c   : > { %v1175_v19 = vpop.permute.xlu1 %1174 }
 0x72d   : > { %v1177_v21 = vsel %vm310_vm8, %v1173_v14, %v1175_v19 }
 0x72e   : > { %1181 = vst [vmem:[#allocation3 + $0x8] sm:$0xf0] %v1177_v21 }
 0x72f   : > { %v1232_v23 = vpop.permute.xlu0 %1231 }
 0x730   : > { %v1298_v22 = vpop.permute.xlu1 %1297 }
 0x731   : > { %v1300_v24 = vsel %vm443_vm9, %v5100_v20, %v1298_v22 }
 0x732   : > { %1304 = vst [vmem:[#allocation3 + $0x38] sm:$0xf0] %v1300_v24 }
 0x733   : > { %v1190_v27 = vpop.permute.xlu0 %1189 }
 0x734   : > { %v1209_v26 = vpop.permute.xlu1 %1208  ;;  %v1193_v31 = vsel %vm332_vm12, %v1188_v16, %v1190_v27  ;;  %v1194_v32 = vsel %vm332_vm12, %v1190_v27, %v1192_v3 }
 0x735   : > { %v1327_v28 = vld [vmem:[#allocation3 + $0x8] sm:$0xff]  ;;  %v1212_v29 = vsel %vm352_vm10, %v1207_v13, %v1209_v26  ;;  %v1213_v30 = vsel %vm352_vm10, %v1209_v26, %v1211_v63  ;;  %v1197_v36 = vsel %vm267_vm11, %v1193_v31, 0.0  ;;  %v1198_v37 = vsel %vm268_vm13, %v1194_v32, 0.0 }
 0x736   : > { %1434 = vst [vmem:[#allocation3 + $0x8] sm:$0xf] %v1432_v25  ;;  %v1216_v33 = vsel %vm257_vm6, %v1212_v29, 0.0  ;;  %v1217_v35 = vsel %vm258_vm7, %v1213_v30, 0.0  ;;  %1199 = vst [vmem:[#allocation3 + $0x10] sm:$0xf] %v1197_v36 }
 0x737   : > { %v1220_v40 = vrot.slane %v1216_v33, 4  ;;  %v1221_v41 = vrot.slane %v1217_v35, 4  ;;  %1200 = vst [vmem:[#allocation3 + $0x18] sm:$0xf] %v1198_v37  ;;  %v1251_v43 = vpop.permute.xlu0 %1250 }
 0x738   : > { %v1171_v45 = vpop.permute.xlu1 %1170  ;;  %v1254_v46 = vsel %vm396_vm15, %v1249_v18, %v1251_v43  ;;  %v1255_v1 = vsel %vm396_vm15, %v1251_v43, %v1253_v5  ;;  %v1431_v5 = vsel %vm257_vm6, %v5061_v56, 0.0 }
 0x739   : > { %1224 = vst [vmem:[#allocation3 + $0x10] sm:$0xf0] %v1220_v40  ;;  %1225 = vst [vmem:[#allocation3 + $0x18] sm:$0xf0] %v1221_v41  ;;  %v1176_v47 = vsel %vm310_vm8, %v1171_v45, %v1173_v14  ;;  %v1258_v48 = vsel %vm267_vm11, %v1254_v46, 0.0  ;;  %v1259_v49 = vsel %vm268_vm13, %v1255_v1, 0.0 }
 0x73a   : > { %1180 = vst [vmem:[#allocation3] sm:$0xf0] %v1176_v47  ;;  %v1262_v50 = vrot.slane %v1258_v48, 4  ;;  %v1263_v51 = vrot.slane %v1259_v49, 4 }
 0x73b   : > { %v1313_v52 = vpop.permute.xlu0 %1312 }
 0x73c   : > { %v1276_v53 = vpop.permute.xlu1 %1275  ;;  %1266 = vst [vmem:[#allocation3 + $0x20] sm:$0xf0] %v1262_v50  ;;  %1267 = vst [vmem:[#allocation3 + $0x28] sm:$0xf0] %v1263_v51  ;;  %v1316_v54 = vsel %vm6036_vm14, %v1311_v17, %v1313_v52  ;;  %v1317_v55 = vsel %vm6035_vm0, %v1313_v52, %v1315_v9  ;;  %vm6041_vm14 = vcmask 785408  }
 0x73d   : > { %v1279_v57 = vsel %vm6037_vm4, %v1274_v15, %v1276_v53  ;;  %v1280_v58 = vsel %vm6038_vm3, %v1276_v53, %v1278_v4  ;;  %v1320_v59 = vsel %vm267_vm11, %v1316_v54, 0.0  ;;  %v1321_v60 = vsel %vm268_vm13, %v1317_v55, 0.0  ;;  %vm6042_vm0 = vmmov %vm6041_vm14 }
 0x73e   : > { %v1283_v61 = vsel %vm257_vm6, %v1279_v57, 0.0  ;;  %v1284_v62 = vsel %vm258_vm7, %v1280_v58, 0.0  ;;  %1322 = vst [vmem:[#allocation3 + $0x40] sm:$0xf] %v1320_v59  ;;  %1323 = vst [vmem:[#allocation3 + $0x48] sm:$0xf] %v1321_v60 }
 0x73f   : > { %1285 = vst [vmem:[#allocation3 + $0x30] sm:$0xf] %v1283_v61  ;;  %1286 = vst [vmem:[#allocation3 + $0x38] sm:$0xf] %v1284_v62  ;;  %v1463_v3 = vpop.permute.xlu0 %1462  ;;  %vm6039_vm3 = vcmask 908288  }
 0x740   : > { %v1328_v2 = vld [vmem:[#allocation3 + $0x10] sm:$0xff]  ;;  %v1329_v63 = vld [vmem:[#allocation3 + $0x18] sm:$0xff]  ;;  %v1234_v4 = vpop.permute.xlu1 %1233  ;;  %vm6040_vm4 = vmmov %vm6039_vm3 }
 0x741   : > { %v1326_v9 = vld [vmem:[#allocation3] sm:$0xff]  ;;  %v1237_v13 = vsel %vm6039_vm3, %v1232_v23, %v1234_v4  ;;  %v1238_v14 = vsel %vm6040_vm4, %v1234_v4, %v5098_v6  ;;  %v4495_v15 = vpack.c.bf16 %v1329_v63, %v1327_v28  ;;  %vm6043_vm4 = vmmov %vm6039_vm3 }
 0x742   : > { %1433 = vst [vmem:[#allocation3] sm:$0xf] %v1431_v5  ;;  %1241 = vst [vmem:[#allocation3 + $0x20] sm:$0xf] %v1237_v13  ;;  %v4497_v16 = vpack.c.bf16 %v1328_v2, %v1326_v9 }
 0x743   : > { %1242 = vst [vmem:[#allocation3 + $0x28] sm:$0xf] %v1238_v14  ;;  %4496 = vmatprep.subr.bf16.mxu1 %v4495_v15  ;;  %v1524_v17 = vpop.permute.xlu0 %1523 }
 0x744   : > { %v1294_v18 = vpop.permute.xlu1 %1293  ;;  %4498 = vmatpush1.bf16.msra.mxu1 %v4497_v16 }
 0x745   : > { %v1299_v19 = vsel %vm443_vm9, %v1294_v18, %v5100_v20  ;;  %v1335_v31 = vld [vmem:[#allocation3 + $0x48] sm:$0xf]  ;;  %v1334_v32 = vld [vmem:[#allocation3 + $0x40] sm:$0xf] }
 0x746   : > { %1303 = vst [vmem:[#allocation3 + $0x30] sm:$0xf0] %v1299_v19  ;;  %v1333_v22 = vld [vmem:[#allocation3 + $0x38] sm:$0xff] }
 0x747   : > { %v1549_v56 = vpop.permute.xlu0 %1548 }
 0x748   : > { %v1482_v21 = vpop.permute.xlu1 %1481 }
 0x749   : > { %v1330_v26 = vld [vmem:[#allocation3 + $0x20] sm:$0xff] }
 0x74a   : > { %v1331_v23 = vld [vmem:[#allocation3 + $0x28] sm:$0xff] }
 0x74b   : > { %v4499_v24 = vpack.c.bf16 %v1333_v22, %v1331_v23  ;;  %v1507_v25 = vpop.permute.xlu0 %1506 }
 0x74c   : > { %v1444_v6 = vpop.permute.xlu1 %1443 }
 0x74d   : > { %4500 = vmatprep.subr.bf16.mxu1 %v4499_v24  ;;  %v1332_v27 = vld [vmem:[#allocation3 + $0x30] sm:$0xff] }
 0x74e   : > { %v4501_v28 = vpack.c.bf16 %v1332_v27, %v1330_v26 }
 0x74f   : > { %v1478_v29 = vpop.permute.xlu0 %1477 }
 0x750   : > { %v1459_v30 = vpop.permute.xlu1 %1458  ;;  %4502 = vmatpush1.bf16.msra.mxu1 %v4501_v28 }
 0x751   : > { %4413 = vmatprep.subr.msk.mxu1 %vm491_vm2, %v1335_v31 }
 0x753   : > { %v1520_v20 = vpop.permute.xlu0 %1519 }
 0x754   : > { %v1545_v33 = vpop.permute.xlu1 %1544  ;;  %4414 = vmatpush1.msk.msra.mxu1 %vm491_vm2, %v1334_v32 }
 0x757   : > { %v1567_v35 = vpop.permute.xlu0 %1566 }
 0x758   : > { %v1569_v36 = vpop.permute.xlu1 %1568 }
 0x759   : > { %v1571_v37 = vsel %vm443_vm9, %v1567_v35, %v1569_v36 }
 0x75a   : > { %1575 = vst [vmem:[#allocation3 + $0x38] sm:$0xf0] %v1571_v37 }
 0x75b   : > { %v1446_v40 = vpop.permute.xlu0 %1445 }
 0x75c   : > { %v1461_v41 = vpop.permute.xlu1 %1460  ;;  %v1448_v43 = vsel %vm310_vm8, %v1444_v6, %v1446_v40 }
 0x75d   : > { %v1464_v45 = vsel %vm332_vm12, %v1459_v30, %v1461_v41  ;;  %v1465_v46 = vsel %vm332_vm12, %v1461_v41, %v1463_v3  ;;  %1452 = vst [vmem:[#allocation3 + $0x8] sm:$0xf0] %v1448_v43  ;;  %v4416_v43 = vld [vmem:[%s6016_s1 + $0x10] sm:$0xf] }
 0x75e   : > { %v1468_v1 = vsel %vm267_vm11, %v1464_v45, 0.0  ;;  %v1469_v47 = vsel %vm268_vm13, %v1465_v46, 0.0  ;;  %v4411_v45 = vld [vmem:[%s6016_s1 + $0xc] sm:$0xf] }
 0x75f   : > { %1470 = vst [vmem:[#allocation3 + $0x10] sm:$0xf] %v1468_v1  ;;  %1471 = vst [vmem:[#allocation3 + $0x18] sm:$0xf] %v1469_v47  ;;  %v1480_v48 = vpop.permute.xlu0 %1479  ;;  %4415 = vmatmul.mubr.msk.f32.vlgmr.msra.gmra.mrb[2].mxu1 %vm487_vm1, %v4411_v45 }
 0x760   : > { %v1522_v49 = vpop.permute.xlu1 %1521  ;;  %v1483_v50 = vsel %vm352_vm10, %v1478_v29, %v1480_v48  ;;  %v1484_v51 = vsel %vm352_vm10, %v1480_v48, %v1482_v21  ;;  %1973 = vmatprep.mubr.f32.mxu1 %v4667_v0 }
 0x761   : > { %v1525_v52 = vsel %vm396_vm15, %v1520_v20, %v1522_v49  ;;  %v1526_v53 = vsel %vm396_vm15, %v1522_v49, %v1524_v17  ;;  %v1487_v54 = vsel %vm257_vm6, %v1483_v50, 0.0  ;;  %v1488_v55 = vsel %vm258_vm7, %v1484_v51, 0.0 }
 0x762   : > { %v1529_v57 = vsel %vm267_vm11, %v1525_v52, 0.0  ;;  %v1530_v58 = vsel %vm268_vm13, %v1526_v53, 0.0  ;;  %v1491_v59 = vrot.slane %v1487_v54, 4  ;;  %v1492_v60 = vrot.slane %v1488_v55, 4 }
 0x763   : > { %v1533_v61 = vrot.slane %v1529_v57, 4  ;;  %v1534_v62 = vrot.slane %v1530_v58, 4  ;;  %v1442_v63 = vpop.permute.xlu0 %1441 }
 0x764   : > { %v1547_v2 = vpop.permute.xlu1 %1546  ;;  %1495 = vst [vmem:[#allocation3 + $0x10] sm:$0xf0] %v1491_v59  ;;  %1496 = vst [vmem:[#allocation3 + $0x18] sm:$0xf0] %v1492_v60  ;;  %v1447_v5 = vsel %vm310_vm8, %v1442_v63, %v1444_v6  ;;  %v1598_v18 = vld [vmem:[#allocation3 + $0x8] sm:$0xff] }
 0x765   : > { %1537 = vst [vmem:[#allocation3 + $0x20] sm:$0xf0] %v1533_v61  ;;  %1538 = vst [vmem:[#allocation3 + $0x28] sm:$0xf0] %v1534_v62  ;;  %v1550_v3 = vsel %vm6041_vm14, %v1545_v33, %v1547_v2  ;;  %v1551_v4 = vsel %vm6042_vm0, %v1547_v2, %v1549_v56  ;;  %vm6044_vm14 = vcmask 769024  }
 0x766   : > { %v1554_v9 = vsel %vm257_vm6, %v1550_v3, 0.0  ;;  %v1555_v13 = vsel %vm258_vm7, %v1551_v4, 0.0  ;;  %1451 = vst [vmem:[#allocation3] sm:$0xf0] %v1447_v5  ;;  %vm6045_vm0 = vmmov %vm6044_vm14 }
 0x767   : > { %1556 = vst [vmem:[#allocation3 + $0x30] sm:$0xf] %v1554_v9  ;;  %1557 = vst [vmem:[#allocation3 + $0x38] sm:$0xf] %v1555_v13  ;;  %v1503_v15 = vpop.permute.xlu0 %1502 }
 0x768   : > { %v1505_v14 = vpop.permute.xlu1 %1504 }
 0x769   : > { %v1509_v16 = vsel %vm6039_vm3, %v1505_v14, %v1507_v25  ;;  %v1508_v17 = vsel %vm6043_vm4, %v1503_v15, %v1505_v14  ;;  %vm6046_vm3 = vcmask 138240   ;;  %vm6047_vm4 = vcmask 134144  }
 0x76a   : > { %1513 = vst [vmem:[#allocation3 + $0x28] sm:$0xf] %v1509_v16  ;;  %1512 = vst [vmem:[#allocation3 + $0x20] sm:$0xf] %v1508_v17 }
 0x76b   : > { %v1599_v19 = vld [vmem:[#allocation3 + $0x10] sm:$0xff]  ;;  %v1600_v56 = vld [vmem:[#allocation3 + $0x18] sm:$0xff]  ;;  %v1584_v22 = vpop.permute.xlu0 %1583 }
 0x76c   : > { %v1565_v21 = vpop.permute.xlu1 %1564  ;;  %v4503_v6 = vpack.c.bf16 %v1600_v56, %v1598_v18 }
 0x76d   : > { %v1597_v23 = vld [vmem:[#allocation3] sm:$0xff]  ;;  %v1570_v24 = vsel %vm443_vm9, %v1565_v21, %v1567_v35 }
 0x76e   : > { %1574 = vst [vmem:[#allocation3 + $0x30] sm:$0xf0] %v1570_v24  ;;  %v4505_v26 = vpack.c.bf16 %v1599_v19, %v1597_v23  ;;  %4504 = vmatprep.subr.bf16.mxu0 %v4503_v6  ;;  %v1604_v25 = vld [vmem:[#allocation3 + $0x38] sm:$0xff]  ;;  %v4412_v21 = vld [vmem:[%s6017_s2 + $0xc] sm:$0xf] }
 0x76f   : > { %v1582_v28 = vpop.permute.xlu0 %1581  ;;  %v1995_v23 = vld [vmem:[%s6019_s4] sm:$0xf] }
 0x770   : > { %v1586_v27 = vpop.permute.xlu1 %1585  ;;  %4506 = vmatpush1.bf16.msra.mxu0 %v4505_v26  ;;  %v1587_v31 = vsel %vm6045_vm0, %v1582_v28, %v1584_v22 }
 0x771   : > { %v1602_v29 = vld [vmem:[#allocation3 + $0x28] sm:$0xff]  ;;  %v1588_v30 = vsel %vm6044_vm14, %v1584_v22, %v1586_v27  ;;  %v1591_v20 = vsel %vm267_vm11, %v1587_v31, 0.0  ;;  %v1601_v35 = vld [vmem:[#allocation3 + $0x20] sm:$0xff]  ;;  %vm6048_vm14 = vcmask 785408  }
 0x772   : > { %v1592_v32 = vsel %vm268_vm13, %v1588_v30, 0.0  ;;  %v4507_v33 = vpack.c.bf16 %v1604_v25, %v1602_v29  ;;  %1593 = vst [vmem:[#allocation3 + $0x40] sm:$0xf] %v1591_v20  ;;  %v4422_v22 = vld [vmem:[%s6017_s2 + $0x14] sm:$0xf]  ;;  %vm6049_vm0 = vmmov %vm6048_vm14 }
 0x773   : > { %1594 = vst [vmem:[#allocation3 + $0x48] sm:$0xf] %v1592_v32 }
 0x774   : > { %4508 = vmatprep.subr.bf16.mxu0 %v4507_v33 }
 0x775   : > { %v1603_v36 = vld [vmem:[#allocation3 + $0x30] sm:$0xff] }
 0x776   : > { %v4509_v37 = vpack.c.bf16 %v1603_v36, %v1601_v35 }
 0x778   : > { %4510 = vmatpush1.bf16.msra.mxu0 %v4509_v37 }
 0x779   : > { %v1605_v41 = vld [vmem:[#allocation3 + $0x40] sm:$0xf] }
 0x77a   : > { %v1606_v40 = vld [vmem:[#allocation3 + $0x48] sm:$0xf] }
 0x77b   : > { %4418 = vmatprep.subr.msk.mxu0 %vm491_vm2, %v1606_v40 }
 0x77c   : > { %4419 = vmatpush1.msk.msra.mxu0 %vm491_vm2, %v1605_v41 }
 0x77d   : > { %4420 = vmatmul.mubr.msk.f32.vlgmr.msra.gmra.mrb[4].mxu0 %vm487_vm1, %v4416_v43 }
 0x77e   : > { %2069 = vmatprep.mubr.f32.mxu0 %v4667_v0 }
 0x781   : > { %v1612_v46 = vpop.permute.xlu1 %1611 }
 0x832   : > { %v5227_v56 = vpop.f32.mrb[2].mxu1 }
 0x833   : > { %v5240_v24 = vpop.f32.mrb[3].mxu1 }
 0x850   : > { %v1689_v1 = vpop.f32.mrb[4].mxu0 }
 0x851   : > { %v1690_v47 = vadd.f32 %v1689_v1, %v1612_v46  ;;  %v1691_v48 = vpop.f32.mrb[5].mxu0 }
 0x852   : > { %v1692_v49 = vadd.f32 %v1691_v48, %v1612_v46 }
 0x853   : > { %v1696_v50 = vmin.f32 %v1690_v47, 0.0  ;;  %v1694_v52 = vmax.f32 %v1690_v47, 0.0 }
 0x854   : > { %v1697_v51 = vmin.f32 %v1692_v49, 0.0  ;;  %v1695_v54 = vmax.f32 %v1692_v49, 0.0 }
 0x855   : > { %v1698_v53 = vmul.f32 0.25, %v1696_v50 }
 0x856   : > { %v1699_v55 = vmul.f32 0.25, %v1697_v51 }
 0x857   : > { %v1700_v57 = vadd.f32 %v1698_v53, %v1694_v52 }
 0x858   : > { %v1701_v58 = vadd.f32 %v1699_v55, %v1695_v54 }
 0x85a   : > { %v1704_v59 = vcombine.low %v1700_v57, %v1701_v58 }
 0x85c   : > { %1705 = vrot.lane.b32.xlu0 %v1704_v59, %s4668_s24 }
 0x8ce   : > { %v1706_v60 = vpop.permute.xlu0 %1705 }
 0x8cf   : > { %v1707_v61 = vrot.slane %v1706_v60, 4 }
 0x8d1   : > { %v1708_v62 = vsel %vm6046_vm3, %v1707_v61, %v1706_v60  ;;  %1712 = vst.msk [vmem:[#allocation2 + $0x8] sm:$0xf] %vm6047_vm4, %v1707_v61  ;;  %vm6050_vm3 = vcmask 908288  }
 0x8d2   : > { %1711 = vst.msk [vmem:[#allocation2] sm:$0xff] %vm4739_vm5, %v1708_v62  ;;  %vm6051_vm4 = vmmov %vm6050_vm3 }
 0x8d8   : > { %v1759_v2 = vld [vmem:[#allocation2 + $0x8] sm:$0xf] }
 0x8d9   : > { %v1740_v63 = vld [vmem:[#allocation2 + $0x8] sm:$0xf]  ;;  %v1713_v3 = vld [vmem:[#allocation2] sm:$0xff]  ;;  %1767 = vrot.lane.b32.xlu0 %v1759_v2, %s4669_s25 }
 0x8da   : > { %1748 = vrot.lane.b32.xlu1 %v1740_v63, %s4671_s27  ;;  %v1715_v4 = vcombine.high %v1713_v3, %v1713_v3  ;;  %v1717_v5 = vsel %vm257_vm6, %v1713_v3, 0.0  ;;  %v1826_v13 = vld [vmem:[#allocation2 + $0x8] sm:$0xf]  ;;  %v1725_v18 = vcombine.low %v1713_v3, %v1713_v3 }
 0x8db   : > { %1719 = vst [vmem:[#allocation3] sm:$0xf] %v1717_v5  ;;  %v1801_v14 = vld [vmem:[#allocation2 + $0x8] sm:$0xf] }
 0x8dc   : > { %v1718_v9 = vsel %vm258_vm7, %v1715_v4, 0.0  ;;  %v1784_v15 = vld [vmem:[#allocation2 + $0x8] sm:$0xf] }
 0x8dd   : > { %1720 = vst [vmem:[#allocation3 + $0x8] sm:$0xf] %v1718_v9  ;;  %1834 = vrot.lane.b32.xlu0 %v1826_v13, %s4670_s26  ;;  %v4625_v16 = vld [vmem:[#allocation2 + $0x8] ss:$0 sps:$4 sm:$0xff]  }
 0x8de   : > { %1809 = vrot.lane.b32.xlu1 %v1801_v14, %s4673_s29  ;;  %v4626_v17 = vld [vmem:[#allocation2 + $0x8] ss:$0 sps:$4 sm:$0xff]  }
 0x8df   : > { %v1863_v19 = vld [vmem:[#allocation2 + $0x8] sm:$0xf] }
 0x8e1   : > { %1792 = vrot.lane.b32.xlu0 %v1784_v15, %s4672_s28 }
 0x8e2   : > { %1763 = vrot.lane.b32.xlu1 %v1713_v3, %s4669_s25 }
 0x8e5   : > { %1729 = vrot.lane.b32.xlu0 %v1713_v3, %s4674_s30 }
 0x8e6   : > { %1830 = vrot.lane.b32.xlu1 %v1713_v3, %s4670_s26 }
 0x8e9   : > { %1744 = vrot.lane.b32.xlu0 %v1713_v3, %s4671_s27 }
 0x8ea   : > { %1731 = vrot.lane.b32.xlu1 %v4625_v16, %s4674_s30 }
 0x8ed   : > { %1805 = vrot.lane.b32.xlu0 %v1713_v3, %s4673_s29 }
 0x8ee   : > { %1854 = vrot.lane.b32.xlu1 %v4626_v17, %s4675_s6 }
 0x8f1   : > { %1852 = vrot.lane.b32.xlu0 %v1713_v3, %s4675_s6 }
 0x8f2   : > { %1765 = vrot.lane.b32.xlu1 %v1715_v4, %s4669_s25 }
 0x8f5   : > { %1746 = vrot.lane.b32.xlu0 %v1715_v4, %s4671_s27 }
 0x8f6   : > { %1727 = vrot.lane.b32.xlu1 %v1725_v18, %s4674_s30 }
 0x8f9   : > { %1807 = vrot.lane.b32.xlu0 %v1715_v4, %s4673_s29 }
 0x8fa   : > { %1832 = vrot.lane.b32.xlu1 %v1715_v4, %s4670_s26 }
 0x8fd   : > { %1788 = vrot.lane.b32.xlu0 %v1713_v3, %s4672_s28 }
 0x8fe   : > { %1790 = vrot.lane.b32.xlu1 %v1715_v4, %s4672_s28 }
 0x901   : > { %1869 = vrot.lane.b32.xlu0 %v1715_v4, %s4676_s7 }
 0x902   : > { %1850 = vrot.lane.b32.xlu1 %v1725_v18, %s4675_s6 }
 0x905   : > { %1867 = vrot.lane.b32.xlu0 %v1713_v3, %s4676_s7 }
 0x906   : > { %1871 = vrot.lane.b32.xlu1 %v1863_v19, %s4676_s7 }
 0x909   : > { %1340 = vperm.xlu0 %4603, %v4412_v21  }
 0x90a   : > { %1897 = vperm.xlu1 %4602, %v4422_v22  }
 0x90e   : > { %1998 = vperm.xlu1 %4602, %v1995_v23  }
 0x94b   : > { %v1768_v6 = vpop.permute.xlu0 %1767 }
 0x94c   : > { %v1749_v26 = vpop.permute.xlu1 %1748 }
 0x94f   : > { %v1835_v27 = vpop.permute.xlu0 %1834 }
 0x950   : > { %v1810_v28 = vpop.permute.xlu1 %1809 }
 0x953   : > { %v1793_v25 = vpop.permute.xlu0 %1792 }
 0x954   : > { %v1764_v29 = vpop.permute.xlu1 %1763 }
 0x957   : > { %v1730_v31 = vpop.permute.xlu0 %1729 }
 0x958   : > { %v1831_v30 = vpop.permute.xlu1 %1830 }
 0x95b   : > { %v1745_v20 = vpop.permute.xlu0 %1744 }
 0x95c   : > { %v1732_v32 = vpop.permute.xlu1 %1731 }
 0x95d   : > { %v1734_v33 = vsel %vm310_vm8, %v1730_v31, %v1732_v32 }
 0x95e   : > { %1738 = vst [vmem:[#allocation3 + $0x8] sm:$0xf0] %v1734_v33 }
 0x95f   : > { %v1806_v36 = vpop.permute.xlu0 %1805 }
 0x960   : > { %v1855_v35 = vpop.permute.xlu1 %1854 }
 0x963   : > { %v1853_v40 = vpop.permute.xlu0 %1852 }
 0x964   : > { %v1766_v37 = vpop.permute.xlu1 %1765  ;;  %v1857_v45 = vsel %vm443_vm9, %v1853_v40, %v1855_v35 }
 0x965   : > { %v1769_v41 = vsel %vm352_vm10, %v1764_v29, %v1766_v37  ;;  %v1770_v43 = vsel %vm352_vm10, %v1766_v37, %v1768_v6  ;;  %1861 = vst [vmem:[#allocation3 + $0x38] sm:$0xf0] %v1857_v45  ;;  %v1884_v18 = vld [vmem:[#allocation3 + $0x8] sm:$0xff] }
 0x966   : > { %v1773_v46 = vsel %vm257_vm6, %v1769_v41, 0.0  ;;  %v1774_v1 = vsel %vm258_vm7, %v1770_v43, 0.0  ;;  %v4421_v45 = vld [vmem:[%s6016_s1 + $0x14] sm:$0xf] }
 0x967   : > { %v1777_v47 = vrot.slane %v1773_v46, 4  ;;  %v1778_v48 = vrot.slane %v1774_v1, 4  ;;  %v1747_v49 = vpop.permute.xlu0 %1746 }
 0x968   : > { %v1728_v50 = vpop.permute.xlu1 %1727  ;;  %v1750_v51 = vsel %vm332_vm12, %v1745_v20, %v1747_v49  ;;  %v1751_v52 = vsel %vm332_vm12, %v1747_v49, %v1749_v26 }
 0x969   : > { %1781 = vst [vmem:[#allocation3 + $0x10] sm:$0xf0] %v1777_v47  ;;  %1782 = vst [vmem:[#allocation3 + $0x18] sm:$0xf0] %v1778_v48  ;;  %v1733_v53 = vsel %vm310_vm8, %v1728_v50, %v1730_v31  ;;  %v1754_v54 = vsel %vm267_vm11, %v1750_v51, 0.0  ;;  %v1755_v55 = vsel %vm268_vm13, %v1751_v52, 0.0 }
 0x96a   : > { %1737 = vst [vmem:[#allocation3] sm:$0xf0] %v1733_v53  ;;  %1756 = vst [vmem:[#allocation3 + $0x10] sm:$0xf] %v1754_v54 }
 0x96b   : > { %1757 = vst [vmem:[#allocation3 + $0x18] sm:$0xf] %v1755_v55  ;;  %v1808_v57 = vpop.permute.xlu0 %1807  ;;  %v4657_v55 = vld [vmem:[%s4726_s23] sm:$0xff] }
 0x96c   : > { %v1833_v58 = vpop.permute.xlu1 %1832  ;;  %v1811_v59 = vsel %vm396_vm15, %v1806_v36, %v1808_v57  ;;  %v1812_v60 = vsel %vm396_vm15, %v1808_v57, %v1810_v28 }
 0x96d   : > { %v1836_v61 = vsel %vm6048_vm14, %v1831_v30, %v1833_v58  ;;  %v1837_v62 = vsel %vm6049_vm0, %v1833_v58, %v1835_v27  ;;  %v1815_v2 = vsel %vm267_vm11, %v1811_v59, 0.0  ;;  %v1816_v63 = vsel %vm268_vm13, %v1812_v60, 0.0 }
 0x96e   : > { %v1840_v3 = vsel %vm257_vm6, %v1836_v61, 0.0  ;;  %v1841_v4 = vsel %vm258_vm7, %v1837_v62, 0.0  ;;  %v1819_v5 = vrot.slane %v1815_v2, 4  ;;  %v1820_v9 = vrot.slane %v1816_v63, 4 }
 0x96f   : > { %1842 = vst [vmem:[#allocation3 + $0x30] sm:$0xf] %v1840_v3  ;;  %1843 = vst [vmem:[#allocation3 + $0x38] sm:$0xf] %v1841_v4  ;;  %v1789_v13 = vpop.permute.xlu0 %1788  ;;  %vm6052_vm14 = vcmask 769024  }
 0x970   : > { %v1791_v14 = vpop.permute.xlu1 %1790  ;;  %1823 = vst [vmem:[#allocation3 + $0x20] sm:$0xf0] %v1819_v5  ;;  %1824 = vst [vmem:[#allocation3 + $0x28] sm:$0xf0] %v1820_v9 }
 0x971   : > { %v1883_v15 = vld [vmem:[#allocation3] sm:$0xff]  ;;  %v1794_v16 = vsel %vm6050_vm3, %v1789_v13, %v1791_v14  ;;  %v1795_v17 = vsel %vm6051_vm4, %v1791_v14, %v1793_v25  ;;  %v1885_v19 = vld [vmem:[#allocation3 + $0x10] sm:$0xff]  ;;  %vm6053_vm0 = vmmov %vm6052_vm14  ;;  %vm2001_vm3 = vcmask 64512   ;;  %vm6054_vm4 = vcmask 138240  }
 0x972   : > { %v1886_v21 = vld [vmem:[#allocation3 + $0x18] sm:$0xff]  ;;  %1798 = vst [vmem:[#allocation3 + $0x20] sm:$0xf] %v1794_v16  ;;  %1799 = vst [vmem:[#allocation3 + $0x28] sm:$0xf] %v1795_v17  ;;  %v4513_v23 = vpack.c.bf16 %v1885_v19, %v1883_v15 }
 0x973   : > { %v4511_v22 = vpack.c.bf16 %v1886_v21, %v1884_v18  ;;  %v1870_v6 = vpop.permute.xlu0 %1869 }
 0x974   : > { %v1851_v26 = vpop.permute.xlu1 %1850 }
 0x975   : > { %v1856_v27 = vsel %vm443_vm9, %v1851_v26, %v1853_v40  ;;  %4512 = vmatprep.subr.bf16.mxu1 %v4511_v22 }
 0x976   : > { %1860 = vst [vmem:[#allocation3 + $0x30] sm:$0xf0] %v1856_v27  ;;  %4514 = vmatpush1.bf16.msra.mxu1 %v4513_v23  ;;  %v1890_v30 = vld [vmem:[#allocation3 + $0x38] sm:$0xff] }
 0x977   : > { %v1868_v28 = vpop.permute.xlu0 %1867 }
 0x978   : > { %v1872_v29 = vpop.permute.xlu1 %1871  ;;  %v1873_v25 = vsel %vm6052_vm14, %v1868_v28, %v1870_v6  ;;  %vm6055_vm14 = vcmask 134144   ;;  %v4428_v28 = vld [vmem:[%s6017_s2 + $0x18] sm:$0xf] }
 0x979   : > { %v1888_v31 = vld [vmem:[#allocation3 + $0x28] sm:$0xff]  ;;  %v1874_v32 = vsel %vm6053_vm0, %v1870_v6, %v1872_v29  ;;  %v1877_v20 = vsel %vm267_vm11, %v1873_v25, 0.0  ;;  %v1887_v36 = vld [vmem:[#allocation3 + $0x20] sm:$0xff]  ;;  %vm6056_vm0 = vcmask 785408  }
 0x97a   : > { %v1878_v33 = vsel %vm268_vm13, %v1874_v32, 0.0  ;;  %v4515_v35 = vpack.c.bf16 %v1890_v30, %v1888_v31  ;;  %1879 = vst [vmem:[#allocation3 + $0x40] sm:$0xf] %v1877_v20 }
 0x97b   : > { %1880 = vst [vmem:[#allocation3 + $0x48] sm:$0xf] %v1878_v33 }
 0x97c   : > { %4516 = vmatprep.subr.bf16.mxu1 %v4515_v35 }
 0x97d   : > { %v1889_v37 = vld [vmem:[#allocation3 + $0x30] sm:$0xff] }
 0x97e   : > { %v4517_v40 = vpack.c.bf16 %v1889_v37, %v1887_v36 }
 0x980   : > { %4518 = vmatpush1.bf16.msra.mxu1 %v4517_v40 }
 0x981   : > { %v1891_v43 = vld [vmem:[#allocation3 + $0x40] sm:$0xf] }
 0x982   : > { %v1892_v41 = vld [vmem:[#allocation3 + $0x48] sm:$0xf] }
 0x983   : > { %4423 = vmatprep.subr.msk.mxu1 %vm491_vm2, %v1892_v41 }
 0x984   : > { %4424 = vmatpush1.msk.msra.mxu1 %vm491_vm2, %v1891_v43 }
 0x985   : > { %4425 = vmatmul.mubr.msk.f32.vlgmr.msra.gmra.mrb[4].mxu1 %vm487_vm1, %v4421_v45 }
 0x986   : > { %2347 = vmatprep.mubr.f32.mxu1 %v4667_v0 }
 0x988   : > { %v1341_v46 = vpop.permute.xlu0 %1340 }
 0x989   : > { %v1419_v1 = vadd.f32 %v5227_v56, %v1341_v46  ;;  %v1421_v47 = vadd.f32 %v5240_v24, %v1341_v46  ;;  %v1898_v50 = vpop.permute.xlu1 %1897 }
 0x98b   : > { %v1423_v48 = vadd.f32 %v1419_v1, %v4933_v38  ;;  %v1424_v49 = vadd.f32 %v1421_v47, %v4936_v39  ;;  %v1992_v38 = vld [vmem:[%s6018_s3] sm:$0xf] }
 0x98d   : > { %1982 = vst [vmem:[#allocation4] sm:$0xf] %v1423_v48  ;;  %1983 = vst [vmem:[#allocation4 + $0x8] sm:$0xf] %v1424_v49  ;;  %v1999_v24 = vpop.permute.xlu1 %1998 }
 0xa58   : > { %v1975_v51 = vpop.f32.mrb[4].mxu1 }
 0xa59   : > { %v1976_v52 = vadd.f32 %v1975_v51, %v1898_v50  ;;  %v1977_v53 = vpop.f32.mrb[5].mxu1 }
 0xa5a   : > { %v1978_v54 = vadd.f32 %v1977_v53, %v1898_v50 }
 0xa5b   : > { %v1980_v57 = vadd.f32 %v4657_v55, %v1976_v52 }
 0xa5c   : > { %v1981_v58 = vadd.f32 %v1978_v54, %v4930_v34 }
 0xa5d   : > { %v1986_v59 = vrot.slane %v1980_v57, 4 }
 0xa5e   : > { %v1987_v60 = vrot.slane %v1981_v58, 4 }
 0xa5f   : > { %1990 = vst [vmem:[#allocation4] sm:$0xf0] %v1986_v59 }
 0xa60   : > { %1991 = vst [vmem:[#allocation4 + $0x8] sm:$0xf0] %v1987_v60 }
 0xa66   : > { %v1993_v39 = vld [vmem:[#allocation4] sm:$0xff] }
 0xa67   : > { %v1994_v56 = vld [vmem:[#allocation4 + $0x8] sm:$0xff] }
 0xa68   : > { %2005 = vmatprep.subr.mxu0 %v1994_v56 }
 0xa69   : > { %2006 = vmatpush1.msra.mxu0 %v1993_v39 }
 0xa6a   : > { %4426 = vmatmul.mubr.msk.f32.vlgmr.msra.gmra.mrb[6].mxu0 %vm2001_vm3, %v1992_v38  ;;  %vm6057_vm3 = vmmov %vm6056_vm0 }
 0xa6b   : > { %2633 = vmatprep.mubr.f32.mxu0 %v4667_v0 }
 0xb3d   : > { %v2071_v61 = vpop.f32.mrb[6].mxu0 }
 0xb3e   : > { %v5295_v62 = vadd.f32 %v2071_v61, %v1999_v24  ;;  %v2073_v2 = vpop.f32.mrb[7].mxu0 }
 0xb3f   : > { %v5297_v63 = vadd.f32 %v2073_v2, %v1999_v24 }
 0xb41   : > { %v2078_v3 = vcombine.low %v5295_v62, %v5297_v63 }
 0xb43   : > { %2079 = vrot.lane.b32.xlu1 %v2078_v3, %s4668_s24 }
 0xbb5   : > { %v2080_v4 = vpop.permute.xlu1 %2079 }
 0xbb6   : > { %v5302_v5 = vrot.slane %v2080_v4, 4 }
 0xbb8   : > { %v5306_v9 = vsel %vm6054_vm4, %v5302_v5, %v2080_v4  ;;  %2086 = vst.msk [vmem:[#allocation2 + $0x8] sm:$0xf] %vm6055_vm14, %v5302_v5  ;;  %vm6058_vm4 = vcmask 908288  }
 0xbb9   : > { %2085 = vst.msk [vmem:[#allocation2] sm:$0xff] %vm4739_vm5, %v5306_v9  ;;  %vm6059_vm14 = vmmov %vm6058_vm4 }
 0xbbf   : > { %v2133_v13 = vld [vmem:[#allocation2 + $0x8] sm:$0xf] }
 0xbc0   : > { %v2114_v14 = vld [vmem:[#allocation2 + $0x8] sm:$0xf]  ;;  %2141 = vrot.lane.b32.xlu1 %v2133_v13, %s4669_s25  ;;  %v2132_v15 = vld [vmem:[#allocation2] sm:$0xff] }
 0xbc1   : > { %2122 = vrot.lane.b32.xlu0 %v2114_v14, %s4671_s27  ;;  %v2089_v16 = vcombine.high %v2132_v15, %v2132_v15  ;;  %v2091_v17 = vsel %vm257_vm6, %v2132_v15, 0.0  ;;  %v2200_v18 = vld [vmem:[#allocation2 + $0x8] sm:$0xf]  ;;  %v2099_v26 = vcombine.low %v2132_v15, %v2132_v15 }
 0xbc2   : > { %2093 = vst [vmem:[#allocation3] sm:$0xf] %v2091_v17  ;;  %v2175_v19 = vld [vmem:[#allocation2 + $0x8] sm:$0xf] }
 0xbc3   : > { %v2092_v21 = vsel %vm258_vm7, %v2089_v16, 0.0  ;;  %v2158_v22 = vld [vmem:[#allocation2 + $0x8] sm:$0xf] }
 0xbc4   : > { %2208 = vrot.lane.b32.xlu1 %v2200_v18, %s4670_s26  ;;  %2094 = vst [vmem:[#allocation3 + $0x8] sm:$0xf] %v2092_v21  ;;  %v4629_v23 = vld [vmem:[#allocation2 + $0x8] ss:$0 sps:$4 sm:$0xff]  }
 0xbc5   : > { %2183 = vrot.lane.b32.xlu0 %v2175_v19, %s4673_s29  ;;  %v4630_v6 = vld [vmem:[#allocation2 + $0x8] ss:$0 sps:$4 sm:$0xff]  }
 0xbc6   : > { %v2237_v27 = vld [vmem:[#allocation2 + $0x8] sm:$0xf] }
 0xbc8   : > { %2166 = vrot.lane.b32.xlu1 %v2158_v22, %s4672_s28 }
 0xbc9   : > { %2137 = vrot.lane.b32.xlu0 %v2132_v15, %s4669_s25 }
 0xbcc   : > { %2103 = vrot.lane.b32.xlu1 %v2132_v15, %s4674_s30 }
 0xbcd   : > { %2204 = vrot.lane.b32.xlu0 %v2132_v15, %s4670_s26 }
 0xbd0   : > { %2118 = vrot.lane.b32.xlu1 %v2132_v15, %s4671_s27 }
 0xbd1   : > { %2105 = vrot.lane.b32.xlu0 %v4629_v23, %s4674_s30 }
 0xbd4   : > { %2179 = vrot.lane.b32.xlu1 %v2132_v15, %s4673_s29 }
 0xbd5   : > { %2228 = vrot.lane.b32.xlu0 %v4630_v6, %s4675_s6 }
 0xbd8   : > { %2226 = vrot.lane.b32.xlu1 %v2132_v15, %s4675_s6 }
 0xbd9   : > { %2139 = vrot.lane.b32.xlu0 %v2089_v16, %s4669_s25 }
 0xbdc   : > { %2120 = vrot.lane.b32.xlu1 %v2089_v16, %s4671_s27 }
 0xbdd   : > { %2101 = vrot.lane.b32.xlu0 %v2099_v26, %s4674_s30 }
 0xbe0   : > { %2181 = vrot.lane.b32.xlu1 %v2089_v16, %s4673_s29 }
 0xbe1   : > { %2206 = vrot.lane.b32.xlu0 %v2089_v16, %s4670_s26 }
 0xbe4   : > { %2162 = vrot.lane.b32.xlu1 %v2132_v15, %s4672_s28 }
 0xbe5   : > { %2164 = vrot.lane.b32.xlu0 %v2089_v16, %s4672_s28 }
 0xbe8   : > { %2243 = vrot.lane.b32.xlu1 %v2089_v16, %s4676_s7 }
 0xbe9   : > { %2224 = vrot.lane.b32.xlu0 %v2099_v26, %s4675_s6 }
 0xbec   : > { %2241 = vrot.lane.b32.xlu1 %v2132_v15, %s4676_s7 }
 0xbed   : > { %2245 = vrot.lane.b32.xlu0 %v2237_v27, %s4676_s7 }
 0xbf1   : > { %2271 = vperm.xlu0 %4603, %v4428_v28  }
 0xc32   : > { %v2142_v29 = vpop.permute.xlu1 %2141 }
 0xc33   : > { %v2123_v30 = vpop.permute.xlu0 %2122 }
 0xc36   : > { %v2209_v31 = vpop.permute.xlu1 %2208 }
 0xc37   : > { %v2184_v25 = vpop.permute.xlu0 %2183 }
 0xc3a   : > { %v2167_v32 = vpop.permute.xlu1 %2166 }
 0xc3b   : > { %v2138_v20 = vpop.permute.xlu0 %2137 }
 0xc3e   : > { %v2104_v35 = vpop.permute.xlu1 %2103 }
 0xc3f   : > { %v2205_v33 = vpop.permute.xlu0 %2204 }
 0xc42   : > { %v2119_v37 = vpop.permute.xlu1 %2118 }
 0xc43   : > { %v2106_v36 = vpop.permute.xlu0 %2105 }
 0xc44   : > { %v2108_v40 = vsel %vm310_vm8, %v2104_v35, %v2106_v36 }
 0xc45   : > { %2112 = vst [vmem:[#allocation3 + $0x8] sm:$0xf0] %v2108_v40 }
 0xc46   : > { %v2180_v43 = vpop.permute.xlu1 %2179 }
 0xc47   : > { %v2229_v41 = vpop.permute.xlu0 %2228 }
 0xc4a   : > { %v2227_v46 = vpop.permute.xlu1 %2226 }
 0xc4b   : > { %v2140_v45 = vpop.permute.xlu0 %2139  ;;  %v2231_v48 = vsel %vm443_vm9, %v2227_v46, %v2229_v41 }
 0xc4c   : > { %v2143_v1 = vsel %vm352_vm10, %v2138_v20, %v2140_v45  ;;  %v2144_v47 = vsel %vm352_vm10, %v2140_v45, %v2142_v29  ;;  %2235 = vst [vmem:[#allocation3 + $0x38] sm:$0xf0] %v2231_v48  ;;  %v2258_v23 = vld [vmem:[#allocation3 + $0x8] sm:$0xff] }
 0xc4d   : > { %v2147_v49 = vsel %vm257_vm6, %v2143_v1, 0.0  ;;  %v2148_v50 = vsel %vm258_vm7, %v2144_v47, 0.0  ;;  %v4427_v48 = vld [vmem:[%s6016_s1 + $0x18] sm:$0xf] }
 0xc4e   : > { %v2151_v51 = vrot.slane %v2147_v49, 4  ;;  %v2152_v52 = vrot.slane %v2148_v50, 4  ;;  %v2121_v53 = vpop.permute.xlu1 %2120 }
 0xc4f   : > { %v2102_v54 = vpop.permute.xlu0 %2101  ;;  %v2124_v55 = vsel %vm332_vm12, %v2119_v37, %v2121_v53  ;;  %v2125_v57 = vsel %vm332_vm12, %v2121_v53, %v2123_v30 }
 0xc50   : > { %2155 = vst [vmem:[#allocation3 + $0x10] sm:$0xf0] %v2151_v51  ;;  %2156 = vst [vmem:[#allocation3 + $0x18] sm:$0xf0] %v2152_v52  ;;  %v2107_v58 = vsel %vm310_vm8, %v2102_v54, %v2104_v35  ;;  %v2128_v59 = vsel %vm267_vm11, %v2124_v55, 0.0  ;;  %v2129_v60 = vsel %vm268_vm13, %v2125_v57, 0.0 }
 0xc51   : > { %2111 = vst [vmem:[#allocation3] sm:$0xf0] %v2107_v58  ;;  %2130 = vst [vmem:[#allocation3 + $0x10] sm:$0xf] %v2128_v59 }
 0xc52   : > { %2131 = vst [vmem:[#allocation3 + $0x18] sm:$0xf] %v2129_v60  ;;  %v2182_v56 = vpop.permute.xlu1 %2181 }
 0xc53   : > { %v2207_v38 = vpop.permute.xlu0 %2206  ;;  %v2185_v39 = vsel %vm396_vm15, %v2180_v43, %v2182_v56  ;;  %v2186_v24 = vsel %vm396_vm15, %v2182_v56, %v2184_v25 }
 0xc54   : > { %v2210_v61 = vsel %vm6056_vm0, %v2205_v33, %v2207_v38  ;;  %v2211_v2 = vsel %vm6057_vm3, %v2207_v38, %v2209_v31  ;;  %v2189_v3 = vsel %vm267_vm11, %v2185_v39, 0.0  ;;  %v2190_v4 = vsel %vm268_vm13, %v2186_v24, 0.0 }
 0xc55   : > { %v2214_v13 = vsel %vm257_vm6, %v2210_v61, 0.0  ;;  %v2215_v14 = vsel %vm258_vm7, %v2211_v2, 0.0  ;;  %v2193_v15 = vrot.slane %v2189_v3, 4  ;;  %v2194_v16 = vrot.slane %v2190_v4, 4 }
 0xc56   : > { %2216 = vst [vmem:[#allocation3 + $0x30] sm:$0xf] %v2214_v13  ;;  %2217 = vst [vmem:[#allocation3 + $0x38] sm:$0xf] %v2215_v14  ;;  %v2163_v17 = vpop.permute.xlu1 %2162  ;;  %vm6060_vm0 = vcmask 769024  }
 0xc57   : > { %v2165_v18 = vpop.permute.xlu0 %2164  ;;  %2197 = vst [vmem:[#allocation3 + $0x20] sm:$0xf0] %v2193_v15  ;;  %2198 = vst [vmem:[#allocation3 + $0x28] sm:$0xf0] %v2194_v16 }
 0xc58   : > { %v2257_v19 = vld [vmem:[#allocation3] sm:$0xff]  ;;  %v2168_v21 = vsel %vm6058_vm4, %v2163_v17, %v2165_v18  ;;  %v2169_v22 = vsel %vm6059_vm14, %v2165_v18, %v2167_v32  ;;  %v2259_v6 = vld [vmem:[#allocation3 + $0x10] sm:$0xff]  ;;  %vm6061_vm3 = vmmov %vm6060_vm0  ;;  %vm6062_vm4 = vcmask 138240   ;;  %vm6063_vm14 = vcmask 134144  }
 0xc59   : > { %v2260_v26 = vld [vmem:[#allocation3 + $0x18] sm:$0xff]  ;;  %2172 = vst [vmem:[#allocation3 + $0x20] sm:$0xf] %v2168_v21  ;;  %2173 = vst [vmem:[#allocation3 + $0x28] sm:$0xf] %v2169_v22  ;;  %v4521_v28 = vpack.c.bf16 %v2259_v6, %v2257_v19 }
 0xc5a   : > { %v4519_v27 = vpack.c.bf16 %v2260_v26, %v2258_v23  ;;  %v2244_v29 = vpop.permute.xlu1 %2243  ;;  %v4433_v26 = vld [vmem:[%s6017_s2 + $0x1c] sm:$0xf] }
 0xc5b   : > { %v2225_v30 = vpop.permute.xlu0 %2224 }
 0xc5c   : > { %v2230_v31 = vsel %vm443_vm9, %v2225_v30, %v2227_v46  ;;  %4520 = vmatprep.subr.bf16.mxu1 %v4519_v27 }
 0xc5d   : > { %2234 = vst [vmem:[#allocation3 + $0x30] sm:$0xf0] %v2230_v31  ;;  %4522 = vmatpush1.bf16.msra.mxu1 %v4521_v28  ;;  %v2264_v33 = vld [vmem:[#allocation3 + $0x38] sm:$0xff] }
 0xc5e   : > { %v2242_v25 = vpop.permute.xlu1 %2241 }
 0xc5f   : > { %v2246_v20 = vpop.permute.xlu0 %2245  ;;  %v2247_v32 = vsel %vm6060_vm0, %v2242_v25, %v2244_v29  ;;  %vm6064_vm0 = vcmask 785408  }
 0xc60   : > { %v2262_v35 = vld [vmem:[#allocation3 + $0x28] sm:$0xff]  ;;  %v2248_v36 = vsel %vm6061_vm3, %v2244_v29, %v2246_v20  ;;  %v2251_v37 = vsel %vm267_vm11, %v2247_v32, 0.0  ;;  %v2261_v43 = vld [vmem:[#allocation3 + $0x20] sm:$0xff]  ;;  %vm6065_vm3 = vmmov %vm6064_vm0 }
 0xc61   : > { %v2252_v40 = vsel %vm268_vm13, %v2248_v36, 0.0  ;;  %v4523_v41 = vpack.c.bf16 %v2264_v33, %v2262_v35  ;;  %2253 = vst [vmem:[#allocation3 + $0x40] sm:$0xf] %v2251_v37 }
 0xc62   : > { %2254 = vst [vmem:[#allocation3 + $0x48] sm:$0xf] %v2252_v40 }
 0xc63   : > { %4524 = vmatprep.subr.bf16.mxu1 %v4523_v41 }
 0xc64   : > { %v2263_v45 = vld [vmem:[#allocation3 + $0x30] sm:$0xff] }
 0xc65   : > { %v4525_v46 = vpack.c.bf16 %v2263_v45, %v2261_v43 }
 0xc67   : > { %4526 = vmatpush1.bf16.msra.mxu1 %v4525_v46 }
 0xc68   : > { %v2265_v47 = vld [vmem:[#allocation3 + $0x40] sm:$0xf] }
 0xc69   : > { %v2266_v1 = vld [vmem:[#allocation3 + $0x48] sm:$0xf] }
 0xc6a   : > { %4429 = vmatprep.subr.msk.mxu1 %vm491_vm2, %v2266_v1 }
 0xc6b   : > { %4430 = vmatpush1.msk.msra.mxu1 %vm491_vm2, %v2265_v47 }
 0xc6c   : > { %4431 = vmatmul.mubr.msk.f32.vlgmr.msra.gmra.mrb[6].mxu1 %vm487_vm1, %v4427_v48 }
 0xc6d   : > { %2913 = vmatprep.mubr.f32.mxu1 %v4667_v0 }
 0xc70   : > { %v2272_v49 = vpop.permute.xlu0 %2271 }
 0xd3f   : > { %v2349_v50 = vpop.f32.mrb[6].mxu1 }
 0xd40   : > { %v2350_v51 = vadd.f32 %v2349_v50, %v2272_v49  ;;  %v2351_v52 = vpop.f32.mrb[7].mxu1 }
 0xd41   : > { %v2352_v53 = vadd.f32 %v2351_v52, %v2272_v49 }
 0xd42   : > { %v2356_v54 = vmin.f32 %v2350_v51, 0.0  ;;  %v2354_v57 = vmax.f32 %v2350_v51, 0.0 }
 0xd43   : > { %v2357_v55 = vmin.f32 %v2352_v53, 0.0  ;;  %v2355_v59 = vmax.f32 %v2352_v53, 0.0 }
 0xd44   : > { %v2358_v58 = vmul.f32 0.25, %v2356_v54 }
 0xd45   : > { %v2359_v60 = vmul.f32 0.25, %v2357_v55 }
 0xd46   : > { %v2360_v56 = vadd.f32 %v2358_v58, %v2354_v57 }
 0xd47   : > { %v2361_v38 = vadd.f32 %v2359_v60, %v2355_v59 }
 0xd49   : > { %v2364_v39 = vcombine.low %v2360_v56, %v2361_v38 }
 0xd4b   : > { %2365 = vrot.lane.b32.xlu1 %v2364_v39, %s4668_s24 }
 0xdbd   : > { %v2366_v24 = vpop.permute.xlu1 %2365 }
 0xdbe   : > { %v2367_v61 = vrot.slane %v2366_v24, 4 }
 0xdc0   : > { %v2368_v2 = vsel %vm6062_vm4, %v2367_v61, %v2366_v24  ;;  %2372 = vst.msk [vmem:[#allocation2 + $0x8] sm:$0xf] %vm6063_vm14, %v2367_v61  ;;  %vm6066_vm4 = vcmask 908288  }
 0xdc1   : > { %2371 = vst.msk [vmem:[#allocation2] sm:$0xff] %vm4739_vm5, %v2368_v2  ;;  %vm6067_vm14 = vmmov %vm6066_vm4 }
 0xdc7   : > { %v2419_v3 = vld [vmem:[#allocation2 + $0x8] sm:$0xf] }
 0xdc8   : > { %v2400_v4 = vld [vmem:[#allocation2 + $0x8] sm:$0xf]  ;;  %2427 = vrot.lane.b32.xlu1 %v2419_v3, %s4669_s25  ;;  %v2418_v13 = vld [vmem:[#allocation2] sm:$0xff] }
 0xdc9   : > { %2408 = vrot.lane.b32.xlu0 %v2400_v4, %s4671_s27  ;;  %v2375_v14 = vcombine.high %v2418_v13, %v2418_v13  ;;  %v2377_v15 = vsel %vm257_vm6, %v2418_v13, 0.0  ;;  %v2486_v16 = vld [vmem:[#allocation2 + $0x8] sm:$0xf]  ;;  %v2385_v23 = vcombine.low %v2418_v13, %v2418_v13 }
 0xdca   : > { %2379 = vst [vmem:[#allocation3] sm:$0xf] %v2377_v15  ;;  %v2461_v17 = vld [vmem:[#allocation2 + $0x8] sm:$0xf] }
 0xdcb   : > { %v2378_v18 = vsel %vm258_vm7, %v2375_v14, 0.0  ;;  %v2444_v19 = vld [vmem:[#allocation2 + $0x8] sm:$0xf] }
 0xdcc   : > { %2494 = vrot.lane.b32.xlu1 %v2486_v16, %s4670_s26  ;;  %2380 = vst [vmem:[#allocation3 + $0x8] sm:$0xf] %v2378_v18  ;;  %v4633_v21 = vld [vmem:[#allocation2 + $0x8] ss:$0 sps:$4 sm:$0xff]  }
 0xdcd   : > { %2469 = vrot.lane.b32.xlu0 %v2461_v17, %s4673_s29  ;;  %v4634_v22 = vld [vmem:[#allocation2 + $0x8] ss:$0 sps:$4 sm:$0xff]  }
 0xdce   : > { %v2523_v6 = vld [vmem:[#allocation2 + $0x8] sm:$0xf] }
 0xdd0   : > { %2452 = vrot.lane.b32.xlu1 %v2444_v19, %s4672_s28 }
 0xdd1   : > { %2423 = vrot.lane.b32.xlu0 %v2418_v13, %s4669_s25 }
 0xdd4   : > { %2389 = vrot.lane.b32.xlu1 %v2418_v13, %s4674_s30 }
 0xdd5   : > { %2490 = vrot.lane.b32.xlu0 %v2418_v13, %s4670_s26 }
 0xdd8   : > { %2404 = vrot.lane.b32.xlu1 %v2418_v13, %s4671_s27 }
 0xdd9   : > { %2391 = vrot.lane.b32.xlu0 %v4633_v21, %s4674_s30 }
 0xddc   : > { %2465 = vrot.lane.b32.xlu1 %v2418_v13, %s4673_s29 }
 0xddd   : > { %2514 = vrot.lane.b32.xlu0 %v4634_v22, %s4675_s6 }
 0xde0   : > { %2512 = vrot.lane.b32.xlu1 %v2418_v13, %s4675_s6 }
 0xde1   : > { %2425 = vrot.lane.b32.xlu0 %v2375_v14, %s4669_s25 }
 0xde4   : > { %2406 = vrot.lane.b32.xlu1 %v2375_v14, %s4671_s27 }
 0xde5   : > { %2387 = vrot.lane.b32.xlu0 %v2385_v23, %s4674_s30 }
 0xde8   : > { %2467 = vrot.lane.b32.xlu1 %v2375_v14, %s4673_s29 }
 0xde9   : > { %2492 = vrot.lane.b32.xlu0 %v2375_v14, %s4670_s26 }
 0xdec   : > { %2448 = vrot.lane.b32.xlu1 %v2418_v13, %s4672_s28 }
 0xded   : > { %2450 = vrot.lane.b32.xlu0 %v2375_v14, %s4672_s28 }
 0xdf0   : > { %2529 = vrot.lane.b32.xlu1 %v2375_v14, %s4676_s7 }
 0xdf1   : > { %2510 = vrot.lane.b32.xlu0 %v2385_v23, %s4675_s6 }
 0xdf4   : > { %2527 = vrot.lane.b32.xlu1 %v2418_v13, %s4676_s7 }
 0xdf5   : > { %2531 = vrot.lane.b32.xlu0 %v2523_v6, %s4676_s7 }
 0xdf9   : > { %2557 = vperm.xlu0 %4603, %v4433_v26  }
 0xe3a   : > { %v2428_v27 = vpop.permute.xlu1 %2427 }
 0xe3b   : > { %v2409_v28 = vpop.permute.xlu0 %2408 }
 0xe3e   : > { %v2495_v29 = vpop.permute.xlu1 %2494 }
 0xe3f   : > { %v2470_v30 = vpop.permute.xlu0 %2469 }
 0xe42   : > { %v2453_v31 = vpop.permute.xlu1 %2452 }
 0xe43   : > { %v2424_v25 = vpop.permute.xlu0 %2423 }
 0xe46   : > { %v2390_v33 = vpop.permute.xlu1 %2389 }
 0xe47   : > { %v2491_v20 = vpop.permute.xlu0 %2490 }
 0xe4a   : > { %v2405_v32 = vpop.permute.xlu1 %2404 }
 0xe4b   : > { %v2392_v35 = vpop.permute.xlu0 %2391 }
 0xe4c   : > { %v2394_v36 = vsel %vm310_vm8, %v2390_v33, %v2392_v35 }
 0xe4d   : > { %2398 = vst [vmem:[#allocation3 + $0x8] sm:$0xf0] %v2394_v36 }
 0xe4e   : > { %v2466_v40 = vpop.permute.xlu1 %2465 }
 0xe4f   : > { %v2515_v37 = vpop.permute.xlu0 %2514 }
 0xe52   : > { %v2513_v43 = vpop.permute.xlu1 %2512 }
 0xe53   : > { %v2426_v41 = vpop.permute.xlu0 %2425  ;;  %v2517_v1 = vsel %vm443_vm9, %v2513_v43, %v2515_v37 }
 0xe54   : > { %v2429_v45 = vsel %vm352_vm10, %v2424_v25, %v2426_v41  ;;  %v2430_v46 = vsel %vm352_vm10, %v2426_v41, %v2428_v27  ;;  %2521 = vst [vmem:[#allocation3 + $0x38] sm:$0xf0] %v2517_v1  ;;  %v2544_v21 = vld [vmem:[#allocation3 + $0x8] sm:$0xff]  ;;  %v4432_v1 = vld [vmem:[%s6016_s1 + $0x1c] sm:$0xf] }
 0xe55   : > { %v2433_v47 = vsel %vm257_vm6, %v2429_v45, 0.0  ;;  %v2434_v48 = vsel %vm258_vm7, %v2430_v46, 0.0 }
 0xe56   : > { %v2437_v49 = vrot.slane %v2433_v47, 4  ;;  %v2438_v50 = vrot.slane %v2434_v48, 4  ;;  %v2407_v51 = vpop.permute.xlu1 %2406 }
 0xe57   : > { %v2388_v52 = vpop.permute.xlu0 %2387  ;;  %v2410_v53 = vsel %vm332_vm12, %v2405_v32, %v2407_v51  ;;  %v2411_v54 = vsel %vm332_vm12, %v2407_v51, %v2409_v28 }
 0xe58   : > { %2441 = vst [vmem:[#allocation3 + $0x10] sm:$0xf0] %v2437_v49  ;;  %2442 = vst [vmem:[#allocation3 + $0x18] sm:$0xf0] %v2438_v50  ;;  %v2393_v55 = vsel %vm310_vm8, %v2388_v52, %v2390_v33  ;;  %v2414_v57 = vsel %vm267_vm11, %v2410_v53, 0.0  ;;  %v2415_v58 = vsel %vm268_vm13, %v2411_v54, 0.0 }
 0xe59   : > { %2397 = vst [vmem:[#allocation3] sm:$0xf0] %v2393_v55  ;;  %2416 = vst [vmem:[#allocation3 + $0x10] sm:$0xf] %v2414_v57 }
 0xe5a   : > { %2417 = vst [vmem:[#allocation3 + $0x18] sm:$0xf] %v2415_v58  ;;  %v2468_v59 = vpop.permute.xlu1 %2467 }
 0xe5b   : > { %v2493_v60 = vpop.permute.xlu0 %2492  ;;  %v2471_v56 = vsel %vm396_vm15, %v2466_v40, %v2468_v59  ;;  %v2472_v38 = vsel %vm396_vm15, %v2468_v59, %v2470_v30 }
 0xe5c   : > { %v2496_v39 = vsel %vm6064_vm0, %v2491_v20, %v2493_v60  ;;  %v2497_v24 = vsel %vm6065_vm3, %v2493_v60, %v2495_v29  ;;  %v2475_v61 = vsel %vm267_vm11, %v2471_v56, 0.0  ;;  %v2476_v2 = vsel %vm268_vm13, %v2472_v38, 0.0 }
 0xe5d   : > { %v2500_v3 = vsel %vm257_vm6, %v2496_v39, 0.0  ;;  %v2501_v4 = vsel %vm258_vm7, %v2497_v24, 0.0  ;;  %v2479_v13 = vrot.slane %v2475_v61, 4  ;;  %v2480_v14 = vrot.slane %v2476_v2, 4 }
 0xe5e   : > { %2502 = vst [vmem:[#allocation3 + $0x30] sm:$0xf] %v2500_v3  ;;  %2503 = vst [vmem:[#allocation3 + $0x38] sm:$0xf] %v2501_v4  ;;  %v2449_v15 = vpop.permute.xlu1 %2448  ;;  %vm6068_vm0 = vcmask 769024  }
 0xe5f   : > { %v2451_v16 = vpop.permute.xlu0 %2450  ;;  %2483 = vst [vmem:[#allocation3 + $0x20] sm:$0xf0] %v2479_v13  ;;  %2484 = vst [vmem:[#allocation3 + $0x28] sm:$0xf0] %v2480_v14 }
 0xe60   : > { %v2454_v17 = vsel %vm6066_vm4, %v2449_v15, %v2451_v16  ;;  %v2455_v18 = vsel %vm6067_vm14, %v2451_v16, %v2453_v31  ;;  %v2543_v19 = vld [vmem:[#allocation3] sm:$0xff]  ;;  %v2545_v23 = vld [vmem:[#allocation3 + $0x10] sm:$0xff]  ;;  %vm6069_vm3 = vmmov %vm6068_vm0  ;;  %vm6070_vm4 = vcmask 138240   ;;  %vm6071_vm14 = vcmask 134144  }
 0xe61   : > { %2458 = vst [vmem:[#allocation3 + $0x20] sm:$0xf] %v2454_v17  ;;  %2459 = vst [vmem:[#allocation3 + $0x28] sm:$0xf] %v2455_v18  ;;  %v2546_v22 = vld [vmem:[#allocation3 + $0x18] sm:$0xff]  ;;  %v4529_v26 = vpack.c.bf16 %v2545_v23, %v2543_v19 }
 0xe62   : > { %v4527_v6 = vpack.c.bf16 %v2546_v22, %v2544_v21  ;;  %v2530_v27 = vpop.permute.xlu1 %2529  ;;  %v4438_v16 = vld [vmem:[%s6017_s2 + $0x20] sm:$0xf] }
 0xe63   : > { %v2511_v28 = vpop.permute.xlu0 %2510 }
 0xe64   : > { %v2516_v29 = vsel %vm443_vm9, %v2511_v28, %v2513_v43  ;;  %4528 = vmatprep.subr.bf16.mxu0 %v4527_v6 }
 0xe65   : > { %2520 = vst [vmem:[#allocation3 + $0x30] sm:$0xf0] %v2516_v29  ;;  %4530 = vmatpush1.bf16.msra.mxu0 %v4529_v26  ;;  %v2550_v35 = vld [vmem:[#allocation3 + $0x38] sm:$0xff] }
 0xe66   : > { %v2528_v30 = vpop.permute.xlu1 %2527 }
 0xe67   : > { %v2532_v25 = vpop.permute.xlu0 %2531  ;;  %v2533_v20 = vsel %vm6068_vm0, %v2528_v30, %v2530_v27  ;;  %vm6072_vm0 = vcmask 785408  }
 0xe68   : > { %v2534_v31 = vsel %vm6069_vm3, %v2530_v27, %v2532_v25  ;;  %v2548_v33 = vld [vmem:[#allocation3 + $0x28] sm:$0xff]  ;;  %v2537_v32 = vsel %vm267_vm11, %v2533_v20, 0.0  ;;  %v2547_v40 = vld [vmem:[#allocation3 + $0x20] sm:$0xff]  ;;  %vm6073_vm3 = vmmov %vm6072_vm0 }
 0xe69   : > { %v2538_v36 = vsel %vm268_vm13, %v2534_v31, 0.0  ;;  %v4531_v37 = vpack.c.bf16 %v2550_v35, %v2548_v33  ;;  %2539 = vst [vmem:[#allocation3 + $0x40] sm:$0xf] %v2537_v32 }
 0xe6a   : > { %2540 = vst [vmem:[#allocation3 + $0x48] sm:$0xf] %v2538_v36 }
 0xe6b   : > { %4532 = vmatprep.subr.bf16.mxu0 %v4531_v37 }
 0xe6c   : > { %v2549_v41 = vld [vmem:[#allocation3 + $0x30] sm:$0xff] }
 0xe6d   : > { %v4533_v43 = vpack.c.bf16 %v2549_v41, %v2547_v40 }
 0xe6f   : > { %4534 = vmatpush1.bf16.msra.mxu0 %v4533_v43 }
 0xe70   : > { %v2551_v46 = vld [vmem:[#allocation3 + $0x40] sm:$0xf] }
 0xe71   : > { %v2552_v45 = vld [vmem:[#allocation3 + $0x48] sm:$0xf] }
 0xe72   : > { %4434 = vmatprep.subr.msk.mxu0 %vm491_vm2, %v2552_v45 }
 0xe73   : > { %4435 = vmatpush1.msk.msra.mxu0 %vm491_vm2, %v2551_v46 }
 0xe74   : > { %4436 = vmatmul.mubr.msk.f32.vlgmr.msra.gmra.mrb[8].mxu0 %vm487_vm1, %v4432_v1 }
 0xe75   : > { %3199 = vmatprep.mubr.f32.mxu0 %v4667_v0 }
 0xe78   : > { %v2558_v47 = vpop.permute.xlu0 %2557 }
 0xf47   : > { %v2635_v48 = vpop.f32.mrb[8].mxu0 }
 0xf48   : > { %v2636_v49 = vadd.f32 %v2635_v48, %v2558_v47  ;;  %v2637_v50 = vpop.f32.mrb[9].mxu0 }
 0xf49   : > { %v2638_v51 = vadd.f32 %v2637_v50, %v2558_v47 }
 0xf4a   : > { %v5467_v52 = vadd.f32 %v2636_v49, %v5295_v62 }
 0xf4b   : > { %v5470_v53 = vadd.f32 %v2638_v51, %v5297_v63 }
 0xf4d   : > { %v2644_v54 = vcombine.low %v5467_v52, %v5470_v53 }
 0xf4f   : > { %2645 = vrot.lane.b32.xlu1 %v2644_v54, %s4668_s24 }
 0xfc1   : > { %v2646_v55 = vpop.permute.xlu1 %2645 }
 0xfc2   : > { %v2647_v57 = vrot.slane %v2646_v55, 4 }
 0xfc4   : > { %v2648_v58 = vsel %vm6070_vm4, %v2647_v57, %v2646_v55  ;;  %2652 = vst.msk [vmem:[#allocation2 + $0x8] sm:$0xf] %vm6071_vm14, %v2647_v57  ;;  %vm6074_vm4 = vcmask 908288  }
 0xfc5   : > { %2651 = vst.msk [vmem:[#allocation2] sm:$0xff] %vm4739_vm5, %v2648_v58  ;;  %vm6075_vm14 = vmmov %vm6074_vm4 }
 0xfcb   : > { %v2699_v59 = vld [vmem:[#allocation2 + $0x8] sm:$0xf] }
 0xfcc   : > { %v2680_v60 = vld [vmem:[#allocation2 + $0x8] sm:$0xf]  ;;  %2707 = vrot.lane.b32.xlu1 %v2699_v59, %s4669_s25  ;;  %v2698_v56 = vld [vmem:[#allocation2] sm:$0xff] }
 0xfcd   : > { %2688 = vrot.lane.b32.xlu0 %v2680_v60, %s4671_s27  ;;  %v2655_v38 = vcombine.high %v2698_v56, %v2698_v56  ;;  %v2657_v39 = vsel %vm257_vm6, %v2698_v56, 0.0  ;;  %v2766_v24 = vld [vmem:[#allocation2 + $0x8] sm:$0xf]  ;;  %v2665_v14 = vcombine.low %v2698_v56, %v2698_v56 }
 0xfce   : > { %2659 = vst [vmem:[#allocation3] sm:$0xf] %v2657_v39  ;;  %v2741_v61 = vld [vmem:[#allocation2 + $0x8] sm:$0xf] }
 0xfcf   : > { %v2658_v2 = vsel %vm258_vm7, %v2655_v38, 0.0  ;;  %v2724_v3 = vld [vmem:[#allocation2 + $0x8] sm:$0xf] }
 0xfd0   : > { %2774 = vrot.lane.b32.xlu1 %v2766_v24, %s4670_s26  ;;  %2660 = vst [vmem:[#allocation3 + $0x8] sm:$0xf] %v2658_v2  ;;  %v4637_v4 = vld [vmem:[#allocation2 + $0x8] ss:$0 sps:$4 sm:$0xff]  }
 0xfd1   : > { %2749 = vrot.lane.b32.xlu0 %v2741_v61, %s4673_s29  ;;  %v4638_v13 = vld [vmem:[#allocation2 + $0x8] ss:$0 sps:$4 sm:$0xff]  }
 0xfd2   : > { %v2803_v15 = vld [vmem:[#allocation2 + $0x8] sm:$0xf] }
 0xfd4   : > { %2732 = vrot.lane.b32.xlu1 %v2724_v3, %s4672_s28 }
 0xfd5   : > { %2703 = vrot.lane.b32.xlu0 %v2698_v56, %s4669_s25 }
 0xfd8   : > { %2669 = vrot.lane.b32.xlu1 %v2698_v56, %s4674_s30 }
 0xfd9   : > { %2770 = vrot.lane.b32.xlu0 %v2698_v56, %s4670_s26 }
 0xfdc   : > { %2684 = vrot.lane.b32.xlu1 %v2698_v56, %s4671_s27 }
 0xfdd   : > { %2671 = vrot.lane.b32.xlu0 %v4637_v4, %s4674_s30 }
 0xfe0   : > { %2745 = vrot.lane.b32.xlu1 %v2698_v56, %s4673_s29 }
 0xfe1   : > { %2794 = vrot.lane.b32.xlu0 %v4638_v13, %s4675_s6 }
 0xfe4   : > { %2792 = vrot.lane.b32.xlu1 %v2698_v56, %s4675_s6 }
 0xfe5   : > { %2705 = vrot.lane.b32.xlu0 %v2655_v38, %s4669_s25 }
 0xfe8   : > { %2686 = vrot.lane.b32.xlu1 %v2655_v38, %s4671_s27 }
 0xfe9   : > { %2667 = vrot.lane.b32.xlu0 %v2665_v14, %s4674_s30 }
 0xfec   : > { %2747 = vrot.lane.b32.xlu1 %v2655_v38, %s4673_s29 }
 0xfed   : > { %2772 = vrot.lane.b32.xlu0 %v2655_v38, %s4670_s26 }
 0xff0   : > { %2728 = vrot.lane.b32.xlu1 %v2698_v56, %s4672_s28 }
 0xff1   : > { %2730 = vrot.lane.b32.xlu0 %v2655_v38, %s4672_s28 }
 0xff4   : > { %2809 = vrot.lane.b32.xlu1 %v2655_v38, %s4676_s7 }
 0xff5   : > { %2790 = vrot.lane.b32.xlu0 %v2665_v14, %s4675_s6 }
 0xff8   : > { %2807 = vrot.lane.b32.xlu1 %v2698_v56, %s4676_s7 }
 0xff9   : > { %2811 = vrot.lane.b32.xlu0 %v2803_v15, %s4676_s7 }
 0xffd   : > { %2837 = vperm.xlu0 %4603, %v4438_v16  }
0x103e   : > { %v2708_v17 = vpop.permute.xlu1 %2707 }
0x103f   : > { %v2689_v18 = vpop.permute.xlu0 %2688 }
0x1042   : > { %v2775_v19 = vpop.permute.xlu1 %2774 }
0x1043   : > { %v2750_v21 = vpop.permute.xlu0 %2749 }
0x1046   : > { %v2733_v22 = vpop.permute.xlu1 %2732 }
0x1047   : > { %v2704_v23 = vpop.permute.xlu0 %2703 }
0x104a   : > { %v2670_v26 = vpop.permute.xlu1 %2669 }
0x104b   : > { %v2771_v6 = vpop.permute.xlu0 %2770 }
0x104e   : > { %v2685_v28 = vpop.permute.xlu1 %2684 }
0x104f   : > { %v2672_v27 = vpop.permute.xlu0 %2671 }
0x1050   : > { %v2674_v29 = vsel %vm310_vm8, %v2670_v26, %v2672_v27 }
0x1051   : > { %2678 = vst [vmem:[#allocation3 + $0x8] sm:$0xf0] %v2674_v29 }
0x1052   : > { %v2746_v25 = vpop.permute.xlu1 %2745 }
0x1053   : > { %v2795_v30 = vpop.permute.xlu0 %2794 }
0x1056   : > { %v2793_v31 = vpop.permute.xlu1 %2792 }
0x1057   : > { %v2706_v20 = vpop.permute.xlu0 %2705  ;;  %v2797_v32 = vsel %vm443_vm9, %v2793_v31, %v2795_v30 }
0x1058   : > { %v2709_v33 = vsel %vm352_vm10, %v2704_v23, %v2706_v20  ;;  %v2710_v35 = vsel %vm352_vm10, %v2706_v20, %v2708_v17  ;;  %2801 = vst [vmem:[#allocation3 + $0x38] sm:$0xf0] %v2797_v32  ;;  %v2824_v14 = vld [vmem:[#allocation3 + $0x8] sm:$0xff] }
0x1059   : > { %v2713_v36 = vsel %vm257_vm6, %v2709_v33, 0.0  ;;  %v2714_v37 = vsel %vm258_vm7, %v2710_v35, 0.0 }
0x105a   : > { %v2717_v40 = vrot.slane %v2713_v36, 4  ;;  %v2718_v41 = vrot.slane %v2714_v37, 4  ;;  %v2687_v43 = vpop.permute.xlu1 %2686  ;;  %v4437_v37 = vld [vmem:[%s6016_s1 + $0x20] sm:$0xf] }
0x105b   : > { %v2668_v45 = vpop.permute.xlu0 %2667  ;;  %v2690_v46 = vsel %vm332_vm12, %v2685_v28, %v2687_v43  ;;  %v2691_v1 = vsel %vm332_vm12, %v2687_v43, %v2689_v18 }
0x105c   : > { %2721 = vst [vmem:[#allocation3 + $0x10] sm:$0xf0] %v2717_v40  ;;  %2722 = vst [vmem:[#allocation3 + $0x18] sm:$0xf0] %v2718_v41  ;;  %v2673_v47 = vsel %vm310_vm8, %v2668_v45, %v2670_v26  ;;  %v2694_v48 = vsel %vm267_vm11, %v2690_v46, 0.0  ;;  %v2695_v49 = vsel %vm268_vm13, %v2691_v1, 0.0 }
0x105d   : > { %2677 = vst [vmem:[#allocation3] sm:$0xf0] %v2673_v47  ;;  %2696 = vst [vmem:[#allocation3 + $0x10] sm:$0xf] %v2694_v48 }
0x105e   : > { %2697 = vst [vmem:[#allocation3 + $0x18] sm:$0xf] %v2695_v49  ;;  %v2748_v50 = vpop.permute.xlu1 %2747 }
0x105f   : > { %v2773_v51 = vpop.permute.xlu0 %2772  ;;  %v2751_v54 = vsel %vm396_vm15, %v2746_v25, %v2748_v50  ;;  %v2752_v55 = vsel %vm396_vm15, %v2748_v50, %v2750_v21 }
0x1060   : > { %v2776_v57 = vsel %vm6072_vm0, %v2771_v6, %v2773_v51  ;;  %v2777_v58 = vsel %vm6073_vm3, %v2773_v51, %v2775_v19  ;;  %v2755_v59 = vsel %vm267_vm11, %v2751_v54, 0.0  ;;  %v2756_v60 = vsel %vm268_vm13, %v2752_v55, 0.0 }
0x1061   : > { %v2780_v56 = vsel %vm257_vm6, %v2776_v57, 0.0  ;;  %v2781_v38 = vsel %vm258_vm7, %v2777_v58, 0.0  ;;  %v2759_v39 = vrot.slane %v2755_v59, 4  ;;  %v2760_v24 = vrot.slane %v2756_v60, 4 }
0x1062   : > { %2782 = vst [vmem:[#allocation3 + $0x30] sm:$0xf] %v2780_v56  ;;  %2783 = vst [vmem:[#allocation3 + $0x38] sm:$0xf] %v2781_v38  ;;  %v2729_v61 = vpop.permute.xlu1 %2728  ;;  %vm6076_vm0 = vcmask 769024  }
0x1063   : > { %v2731_v2 = vpop.permute.xlu0 %2730  ;;  %2763 = vst [vmem:[#allocation3 + $0x20] sm:$0xf0] %v2759_v39  ;;  %2764 = vst [vmem:[#allocation3 + $0x28] sm:$0xf0] %v2760_v24 }
0x1064   : > { %v2734_v3 = vsel %vm6074_vm4, %v2729_v61, %v2731_v2  ;;  %v2735_v4 = vsel %vm6075_vm14, %v2731_v2, %v2733_v22  ;;  %v2823_v13 = vld [vmem:[#allocation3] sm:$0xff]  ;;  %v2825_v16 = vld [vmem:[#allocation3 + $0x10] sm:$0xff]  ;;  %vm6077_vm3 = vmmov %vm6076_vm0  ;;  %vm6078_vm4 = vcmask 138240   ;;  %vm6079_vm14 = vcmask 134144  }
0x1065   : > { %2738 = vst [vmem:[#allocation3 + $0x20] sm:$0xf] %v2734_v3  ;;  %2739 = vst [vmem:[#allocation3 + $0x28] sm:$0xf] %v2735_v4  ;;  %v2826_v15 = vld [vmem:[#allocation3 + $0x18] sm:$0xff]  ;;  %v4537_v18 = vpack.c.bf16 %v2825_v16, %v2823_v13 }
0x1066   : > { %v4535_v17 = vpack.c.bf16 %v2826_v15, %v2824_v14  ;;  %v2810_v19 = vpop.permute.xlu1 %2809 }
0x1067   : > { %v2791_v21 = vpop.permute.xlu0 %2790 }
0x1068   : > { %v2796_v23 = vsel %vm443_vm9, %v2791_v21, %v2793_v31  ;;  %4536 = vmatprep.subr.bf16.mxu1 %v4535_v17 }
0x1069   : > { %2800 = vst [vmem:[#allocation3 + $0x30] sm:$0xf0] %v2796_v23  ;;  %4538 = vmatpush1.bf16.msra.mxu1 %v4537_v18  ;;  %v2830_v29 = vld [vmem:[#allocation3 + $0x38] sm:$0xff] }
0x106a   : > { %v2808_v6 = vpop.permute.xlu1 %2807 }
0x106b   : > { %v2812_v26 = vpop.permute.xlu0 %2811  ;;  %v2813_v27 = vsel %vm6076_vm0, %v2808_v6, %v2810_v19  ;;  %vm6080_vm0 = vmmov %vm6079_vm14 }
0x106c   : > { %v2814_v22 = vsel %vm6077_vm3, %v2810_v19, %v2812_v26  ;;  %v2828_v28 = vld [vmem:[#allocation3 + $0x28] sm:$0xff]  ;;  %v2817_v30 = vsel %vm267_vm11, %v2813_v27, 0.0  ;;  %v2827_v31 = vld [vmem:[#allocation3 + $0x20] sm:$0xff] }
0x106d   : > { %v2818_v25 = vsel %vm268_vm13, %v2814_v22, 0.0  ;;  %v4539_v20 = vpack.c.bf16 %v2830_v29, %v2828_v28  ;;  %2819 = vst [vmem:[#allocation3 + $0x40] sm:$0xf] %v2817_v30  ;;  %v4448_v29 = vld [vmem:[%s6017_s2 + $0x28] sm:$0xf] }
0x106e   : > { %2820 = vst [vmem:[#allocation3 + $0x48] sm:$0xf] %v2818_v25 }
0x106f   : > { %4540 = vmatprep.subr.bf16.mxu1 %v4539_v20 }
0x1070   : > { %v2829_v33 = vld [vmem:[#allocation3 + $0x30] sm:$0xff] }
0x1071   : > { %v4541_v35 = vpack.c.bf16 %v2829_v33, %v2827_v31 }
0x1073   : > { %4542 = vmatpush1.bf16.msra.mxu1 %v4541_v35 }
0x1074   : > { %v2831_v36 = vld [vmem:[#allocation3 + $0x40] sm:$0xf] }
0x1075   : > { %v2832_v32 = vld [vmem:[#allocation3 + $0x48] sm:$0xf] }
0x1076   : > { %4439 = vmatprep.subr.msk.mxu1 %vm491_vm2, %v2832_v32 }
0x1077   : > { %4440 = vmatpush1.msk.msra.mxu1 %vm491_vm2, %v2831_v36 }
0x1078   : > { %4441 = vmatmul.mubr.msk.f32.vlgmr.msra.gmra.mrb[8].mxu1 %vm487_vm1, %v4437_v37 }
0x1079   : > { %3470 = vmatprep.mubr.f32.mxu1 %v4667_v0 }
0x107c   : > { %v2838_v40 = vpop.permute.xlu0 %2837 }
0x114b   : > { %v2915_v41 = vpop.f32.mrb[8].mxu1 }
0x114c   : > { %v2916_v43 = vadd.f32 %v2915_v41, %v2838_v40  ;;  %v2917_v45 = vpop.f32.mrb[9].mxu1 }
0x114d   : > { %v2918_v46 = vadd.f32 %v2917_v45, %v2838_v40 }
0x114e   : > { %v2922_v1 = vmin.f32 %v2916_v43, 0.0  ;;  %v2920_v48 = vmax.f32 %v2916_v43, 0.0 }
0x114f   : > { %v2923_v47 = vmin.f32 %v2918_v46, 0.0  ;;  %v2921_v50 = vmax.f32 %v2918_v46, 0.0 }
0x1150   : > { %v2924_v49 = vmul.f32 0.25, %v2922_v1 }
0x1151   : > { %v2925_v51 = vmul.f32 0.25, %v2923_v47 }
0x1152   : > { %v2926_v54 = vadd.f32 %v2924_v49, %v2920_v48 }
0x1153   : > { %v2927_v55 = vadd.f32 %v2925_v51, %v2921_v50 }
0x1155   : > { %v2930_v57 = vcombine.low %v2926_v54, %v2927_v55 }
0x1157   : > { %2931 = vrot.lane.b32.xlu1 %v2930_v57, %s4668_s24 }
0x11c9   : > { %v2932_v58 = vpop.permute.xlu1 %2931 }
0x11ca   : > { %v2933_v59 = vrot.slane %v2932_v58, 4 }
0x11cc   : > { %v2934_v60 = vsel %vm6078_vm4, %v2933_v59, %v2932_v58  ;;  %2938 = vst.msk [vmem:[#allocation2 + $0x8] sm:$0xf] %vm6079_vm14, %v2933_v59  ;;  %vm6081_vm4 = vmmov %vm6077_vm3  ;;  %vm6082_vm14 = vcmask 785408  }
0x11cd   : > { %2937 = vst.msk [vmem:[#allocation2] sm:$0xff] %vm4739_vm5, %v2934_v60 }
0x11d3   : > { %v2985_v56 = vld [vmem:[#allocation2 + $0x8] sm:$0xf] }
0x11d4   : > { %v2966_v38 = vld [vmem:[#allocation2 + $0x8] sm:$0xf]  ;;  %2993 = vrot.lane.b32.xlu1 %v2985_v56, %s4669_s25  ;;  %v2984_v3 = vld [vmem:[#allocation2] sm:$0xff] }
0x11d5   : > { %v3052_v39 = vld [vmem:[#allocation2 + $0x8] sm:$0xf]  ;;  %2974 = vrot.lane.b32.xlu0 %v2966_v38, %s4671_s27  ;;  %v2941_v13 = vcombine.high %v2984_v3, %v2984_v3  ;;  %v2943_v14 = vsel %vm257_vm6, %v2984_v3, 0.0  ;;  %3208 = vst.msk [vmem:[#allocation2] sm:$0xff] %vm4739_vm5, %v5306_v9 }
0x11d6   : > { %v3027_v24 = vld [vmem:[#allocation2 + $0x8] sm:$0xf]  ;;  %2945 = vst [vmem:[#allocation3] sm:$0xf] %v2943_v14 }
0x11d7   : > { %v3010_v61 = vld [vmem:[#allocation2 + $0x8] sm:$0xf]  ;;  %v2944_v16 = vsel %vm258_vm7, %v2941_v13, 0.0 }
0x11d8   : > { %v3089_v2 = vld [vmem:[#allocation2 + $0x8] sm:$0xf]  ;;  %3060 = vrot.lane.b32.xlu1 %v3052_v39, %s4670_s26  ;;  %2946 = vst [vmem:[#allocation3 + $0x8] sm:$0xf] %v2944_v16 }
0x11d9   : > { %v4641_v4 = vld [vmem:[#allocation2 + $0x8] ss:$0 sps:$4 sm:$0xff]   ;;  %3035 = vrot.lane.b32.xlu0 %v3027_v24, %s4673_s29 }
0x11da   : > { %v4642_v15 = vld [vmem:[#allocation2 + $0x8] ss:$0 sps:$4 sm:$0xff]  }
0x11db   : > { %3209 = vst.msk [vmem:[#allocation2 + $0x8] sm:$0xf] %vm6080_vm0, %v5302_v5  ;;  %v2951_v5 = vcombine.low %v2984_v3, %v2984_v3  ;;  %vm6083_vm0 = vmmov %vm6082_vm14 }
0x11dc   : > { %3018 = vrot.lane.b32.xlu1 %v3010_v61, %s4672_s28  ;;  %v5595_v23 = vld [vmem:[#allocation2] sm:$0xff] }
0x11dd   : > { %3097 = vrot.lane.b32.xlu0 %v3089_v2, %s4676_s7  ;;  %v3212_v26 = vcombine.high %v5595_v23, %v5595_v23  ;;  %v3222_v22 = vcombine.low %v5595_v23, %v5595_v23 }
0x11df   : > { %v3215_v50 = vsel %vm258_vm7, %v3212_v26, 0.0 }
0x11e0   : > { %2955 = vrot.lane.b32.xlu1 %v2984_v3, %s4674_s30 }
0x11e1   : > { %2989 = vrot.lane.b32.xlu0 %v2984_v3, %s4669_s25 }
0x11e2   : > { %v3237_v9 = vld [vmem:[#allocation2 + $0x8] sm:$0xf] }
0x11e3   : > { %v3298_v17 = vld [vmem:[#allocation2 + $0x8] sm:$0xf] }
0x11e4   : > { %2970 = vrot.lane.b32.xlu1 %v2984_v3, %s4671_s27  ;;  %v3323_v18 = vld [vmem:[#allocation2 + $0x8] sm:$0xf] }
0x11e5   : > { %3056 = vrot.lane.b32.xlu0 %v2984_v3, %s4670_s26  ;;  %v3256_v19 = vld [vmem:[#allocation2 + $0x8] sm:$0xf] }
0x11e6   : > { %v3281_v21 = vld [vmem:[#allocation2 + $0x8] sm:$0xf] }
0x11e7   : > { %v4645_v6 = vld [vmem:[#allocation2 + $0x8] ss:$0 sps:$4 sm:$0xff]  }
0x11e8   : > { %3031 = vrot.lane.b32.xlu1 %v2984_v3, %s4673_s29  ;;  %v4646_v27 = vld [vmem:[#allocation2 + $0x8] ss:$0 sps:$4 sm:$0xff]  }
0x11e9   : > { %3093 = vrot.lane.b32.xlu0 %v2984_v3, %s4676_s7  ;;  %v3360_v28 = vld [vmem:[#allocation2 + $0x8] sm:$0xf] }
0x11ec   : > { %3078 = vrot.lane.b32.xlu1 %v2984_v3, %s4675_s6 }
0x11ed   : > { %2957 = vrot.lane.b32.xlu0 %v4641_v4, %s4674_s30 }
0x11f0   : > { %3014 = vrot.lane.b32.xlu1 %v2984_v3, %s4672_s28 }
0x11f1   : > { %3080 = vrot.lane.b32.xlu0 %v4642_v15, %s4675_s6 }
0x11f4   : > { %2972 = vrot.lane.b32.xlu1 %v2941_v13, %s4671_s27 }
0x11f5   : > { %2991 = vrot.lane.b32.xlu0 %v2941_v13, %s4669_s25 }
0x11f8   : > { %3033 = vrot.lane.b32.xlu1 %v2941_v13, %s4673_s29 }
0x11f9   : > { %2953 = vrot.lane.b32.xlu0 %v2951_v5, %s4674_s30 }
0x11fc   : > { %3095 = vrot.lane.b32.xlu1 %v2941_v13, %s4676_s7 }
0x11fd   : > { %3058 = vrot.lane.b32.xlu0 %v2941_v13, %s4670_s26 }
0x1200   : > { %3245 = vrot.lane.b32.xlu1 %v3237_v9, %s4671_s27 }
0x1201   : > { %3016 = vrot.lane.b32.xlu0 %v2941_v13, %s4672_s28 }
0x1204   : > { %3306 = vrot.lane.b32.xlu1 %v3298_v17, %s4673_s29 }
0x1205   : > { %3076 = vrot.lane.b32.xlu0 %v2951_v5, %s4675_s6 }
0x1208   : > { %3331 = vrot.lane.b32.xlu1 %v3323_v18, %s4670_s26 }
0x1209   : > { %3264 = vrot.lane.b32.xlu0 %v3256_v19, %s4669_s25 }
0x120c   : > { %3289 = vrot.lane.b32.xlu1 %v3281_v21, %s4672_s28 }
0x120d   : > { %3226 = vrot.lane.b32.xlu0 %v5595_v23, %s4674_s30 }
0x1210   : > { %3260 = vrot.lane.b32.xlu1 %v5595_v23, %s4669_s25 }
0x1211   : > { %3241 = vrot.lane.b32.xlu0 %v5595_v23, %s4671_s27 }
0x1214   : > { %3302 = vrot.lane.b32.xlu1 %v5595_v23, %s4673_s29 }
0x1215   : > { %3327 = vrot.lane.b32.xlu0 %v5595_v23, %s4670_s26 }
0x1218   : > { %3349 = vrot.lane.b32.xlu1 %v5595_v23, %s4675_s6 }
0x1219   : > { %3351 = vrot.lane.b32.xlu0 %v4645_v6, %s4675_s6 }
0x121c   : > { %3228 = vrot.lane.b32.xlu1 %v4646_v27, %s4674_s30 }
0x121d   : > { %3243 = vrot.lane.b32.xlu0 %v3212_v26, %s4671_s27 }
0x1220   : > { %3262 = vrot.lane.b32.xlu1 %v3212_v26, %s4669_s25 }
0x1221   : > { %3304 = vrot.lane.b32.xlu0 %v3212_v26, %s4673_s29 }
0x1224   : > { %3224 = vrot.lane.b32.xlu1 %v3222_v22, %s4674_s30 }
0x1225   : > { %3329 = vrot.lane.b32.xlu0 %v3212_v26, %s4670_s26 }
0x1228   : > { %3285 = vrot.lane.b32.xlu1 %v5595_v23, %s4672_s28 }
0x1229   : > { %3287 = vrot.lane.b32.xlu0 %v3212_v26, %s4672_s28 }
0x122c   : > { %3366 = vrot.lane.b32.xlu1 %v3212_v26, %s4676_s7 }
0x122d   : > { %3347 = vrot.lane.b32.xlu0 %v3222_v22, %s4675_s6 }
0x1230   : > { %3364 = vrot.lane.b32.xlu1 %v5595_v23, %s4676_s7 }
0x1231   : > { %3368 = vrot.lane.b32.xlu0 %v3360_v28, %s4676_s7 }
0x1235   : > { %3394 = vperm.xlu0 %4603, %v4448_v29  }
0x1246   : > { %v2994_v30 = vpop.permute.xlu1 %2993 }
0x1247   : > { %v2975_v25 = vpop.permute.xlu0 %2974 }
0x124a   : > { %v3061_v20 = vpop.permute.xlu1 %3060 }
0x124b   : > { %v3036_v31 = vpop.permute.xlu0 %3035 }
0x124e   : > { %v5632_v33 = vpop.permute.xlu1 %3018 }
0x124f   : > { %v3098_v35 = vpop.permute.xlu0 %3097 }
0x1252   : > { %v2956_v36 = vpop.permute.xlu1 %2955 }
0x1253   : > { %v2990_v32 = vpop.permute.xlu0 %2989 }
0x1256   : > { %v2971_v40 = vpop.permute.xlu1 %2970 }
0x1257   : > { %v3057_v37 = vpop.permute.xlu0 %3056 }
0x125a   : > { %v3032_v43 = vpop.permute.xlu1 %3031 }
0x125b   : > { %v3094_v41 = vpop.permute.xlu0 %3093 }
0x125e   : > { %v5634_v46 = vpop.permute.xlu1 %3078 }
0x125f   : > { %v2958_v45 = vpop.permute.xlu0 %2957 }
0x1260   : > { %v2960_v1 = vsel %vm310_vm8, %v2956_v36, %v2958_v45 }
0x1261   : > { %2964 = vst [vmem:[#allocation3 + $0x8] sm:$0xf0] %v2960_v1 }
0x1262   : > { %v3015_v48 = vpop.permute.xlu1 %3014 }
0x1263   : > { %v3081_v47 = vpop.permute.xlu0 %3080 }
0x1264   : > { %v3083_v49 = vsel %vm443_vm9, %v5634_v46, %v3081_v47 }
0x1265   : > { %3087 = vst [vmem:[#allocation3 + $0x38] sm:$0xf0] %v3083_v49 }
0x1266   : > { %v2973_v54 = vpop.permute.xlu1 %2972 }
0x1267   : > { %v2992_v51 = vpop.permute.xlu0 %2991  ;;  %v2976_v58 = vsel %vm332_vm12, %v2971_v40, %v2973_v54  ;;  %v2977_v59 = vsel %vm332_vm12, %v2973_v54, %v2975_v25 }
0x1268   : > { %v2995_v55 = vsel %vm352_vm10, %v2990_v32, %v2992_v51  ;;  %v2996_v57 = vsel %vm352_vm10, %v2992_v51, %v2994_v30  ;;  %v3110_v60 = vld [vmem:[#allocation3 + $0x8] sm:$0xff]  ;;  %v2980_v39 = vsel %vm267_vm11, %v2976_v58, 0.0  ;;  %v2981_v24 = vsel %vm268_vm13, %v2977_v59, 0.0 }
0x1269   : > { %v2999_v56 = vsel %vm257_vm6, %v2995_v55, 0.0  ;;  %v3000_v38 = vsel %vm258_vm7, %v2996_v57, 0.0  ;;  %3217 = vst [vmem:[#allocation3 + $0x8] sm:$0xf] %v3215_v50  ;;  %2982 = vst [vmem:[#allocation3 + $0x10] sm:$0xf] %v2980_v39 }
0x126a   : > { %v3003_v61 = vrot.slane %v2999_v56, 4  ;;  %v3004_v2 = vrot.slane %v3000_v38, 4  ;;  %2983 = vst [vmem:[#allocation3 + $0x18] sm:$0xf] %v2981_v24  ;;  %v3034_v3 = vpop.permute.xlu1 %3033  ;;  %v3214_v32 = vsel %vm257_vm6, %v5595_v23, 0.0 }
0x126b   : > { %v2954_v4 = vpop.permute.xlu0 %2953  ;;  %v3037_v13 = vsel %vm396_vm15, %v3032_v43, %v3034_v3  ;;  %v3038_v14 = vsel %vm396_vm15, %v3034_v3, %v3036_v31 }
0x126c   : > { %3007 = vst [vmem:[#allocation3 + $0x10] sm:$0xf0] %v3003_v61  ;;  %3008 = vst [vmem:[#allocation3 + $0x18] sm:$0xf0] %v3004_v2  ;;  %v2959_v15 = vsel %vm310_vm8, %v2954_v4, %v2956_v36  ;;  %v3041_v16 = vsel %vm267_vm11, %v3037_v13, 0.0  ;;  %v3042_v5 = vsel %vm268_vm13, %v3038_v14, 0.0 }
0x126d   : > { %2963 = vst [vmem:[#allocation3] sm:$0xf0] %v2959_v15  ;;  %v3045_v9 = vrot.slane %v3041_v16, 4  ;;  %v3046_v17 = vrot.slane %v3042_v5, 4 }
0x126e   : > { %v3096_v18 = vpop.permute.xlu1 %3095 }
0x126f   : > { %v3059_v19 = vpop.permute.xlu0 %3058  ;;  %3049 = vst [vmem:[#allocation3 + $0x20] sm:$0xf0] %v3045_v9  ;;  %3050 = vst [vmem:[#allocation3 + $0x28] sm:$0xf0] %v3046_v17  ;;  %v3099_v21 = vsel %vm6077_vm3, %v3094_v41, %v3096_v18  ;;  %v3100_v6 = vsel %vm6081_vm4, %v3096_v18, %v3098_v35  ;;  %vm6084_vm3 = vcmask 908288  }
0x1270   : > { %v3062_v26 = vsel %vm6082_vm14, %v3057_v37, %v3059_v19  ;;  %v3063_v27 = vsel %vm6083_vm0, %v3059_v19, %v3061_v20  ;;  %v3103_v22 = vsel %vm267_vm11, %v3099_v21, 0.0  ;;  %v3104_v28 = vsel %vm268_vm13, %v3100_v6, 0.0  ;;  %vm6085_vm4 = vmmov %vm6084_vm3 }
0x1271   : > { %v3066_v29 = vsel %vm257_vm6, %v3062_v26, 0.0  ;;  %v3067_v30 = vsel %vm258_vm7, %v3063_v27, 0.0  ;;  %3105 = vst [vmem:[#allocation3 + $0x40] sm:$0xf] %v3103_v22  ;;  %3106 = vst [vmem:[#allocation3 + $0x48] sm:$0xf] %v3104_v28 }
0x1272   : > { %3068 = vst [vmem:[#allocation3 + $0x30] sm:$0xf] %v3066_v29  ;;  %3069 = vst [vmem:[#allocation3 + $0x38] sm:$0xf] %v3067_v30  ;;  %v3246_v25 = vpop.permute.xlu1 %3245 }
0x1273   : > { %v3017_v31 = vpop.permute.xlu0 %3016  ;;  %v3112_v35 = vld [vmem:[#allocation3 + $0x18] sm:$0xff]  ;;  %v3111_v20 = vld [vmem:[#allocation3 + $0x10] sm:$0xff]  ;;  %vm6086_vm14 = vmmov %vm6083_vm0 }
0x1274   : > { %v3020_v36 = vsel %vm6084_vm3, %v3015_v48, %v3017_v31  ;;  %v3021_v37 = vsel %vm6085_vm4, %v3017_v31, %v5632_v33  ;;  %v4543_v40 = vpack.c.bf16 %v3112_v35, %v3110_v60  ;;  %v3109_v41 = vld [vmem:[#allocation3] sm:$0xff]  ;;  %vm6087_vm4 = vmmov %vm6084_vm3 }
0x1275   : > { %3024 = vst [vmem:[#allocation3 + $0x20] sm:$0xf] %v3020_v36  ;;  %3025 = vst [vmem:[#allocation3 + $0x28] sm:$0xf] %v3021_v37  ;;  %v4545_v43 = vpack.c.bf16 %v3111_v20, %v3109_v41 }
0x1276   : > { %3216 = vst [vmem:[#allocation3] sm:$0xf] %v3214_v32  ;;  %4544 = vmatprep.subr.bf16.mxu0 %v4543_v40  ;;  %v3307_v45 = vpop.permute.xlu1 %3306 }
0x1277   : > { %v3077_v1 = vpop.permute.xlu0 %3076  ;;  %4546 = vmatpush1.bf16.msra.mxu0 %v4545_v43 }
0x1278   : > { %v3082_v47 = vsel %vm443_vm9, %v3077_v1, %v5634_v46  ;;  %v3118_v56 = vld [vmem:[#allocation3 + $0x48] sm:$0xf]  ;;  %v3117_v38 = vld [vmem:[#allocation3 + $0x40] sm:$0xf] }
0x1279   : > { %3086 = vst [vmem:[#allocation3 + $0x30] sm:$0xf0] %v3082_v47  ;;  %v3116_v50 = vld [vmem:[#allocation3 + $0x38] sm:$0xff] }
0x127a   : > { %v3332_v23 = vpop.permute.xlu1 %3331 }
0x127b   : > { %v3265_v49 = vpop.permute.xlu0 %3264 }
0x127c   : > { %v3114_v48 = vld [vmem:[#allocation3 + $0x28] sm:$0xff]  ;;  %v3113_v55 = vld [vmem:[#allocation3 + $0x20] sm:$0xff] }
0x127d   : > { %v4547_v51 = vpack.c.bf16 %v3116_v50, %v3114_v48 }
0x127e   : > { %v3290_v33 = vpop.permute.xlu1 %3289 }
0x127f   : > { %v3227_v54 = vpop.permute.xlu0 %3226  ;;  %4548 = vmatprep.subr.bf16.mxu0 %v4547_v51 }
0x1280   : > { %v3115_v57 = vld [vmem:[#allocation3 + $0x30] sm:$0xff] }
0x1281   : > { %v4549_v58 = vpack.c.bf16 %v3115_v57, %v3113_v55 }
0x1282   : > { %v3261_v59 = vpop.permute.xlu1 %3260 }
0x1283   : > { %v3242_v60 = vpop.permute.xlu0 %3241  ;;  %4550 = vmatpush1.bf16.msra.mxu0 %v4549_v58 }
0x1284   : > { %4444 = vmatprep.subr.msk.mxu0 %vm491_vm2, %v3118_v56 }
0x1286   : > { %v3303_v46 = vpop.permute.xlu1 %3302 }
0x1287   : > { %v3328_v39 = vpop.permute.xlu0 %3327  ;;  %4445 = vmatpush1.msk.msra.mxu0 %vm491_vm2, %v3117_v38 }
0x128a   : > { %v3350_v24 = vpop.permute.xlu1 %3349 }
0x128b   : > { %v3352_v61 = vpop.permute.xlu0 %3351 }
0x128c   : > { %v3354_v2 = vsel %vm443_vm9, %v3350_v24, %v3352_v61 }
0x128d   : > { %3358 = vst [vmem:[#allocation3 + $0x38] sm:$0xf0] %v3354_v2 }
0x128e   : > { %v3229_v3 = vpop.permute.xlu1 %3228 }
0x128f   : > { %v3244_v4 = vpop.permute.xlu0 %3243  ;;  %v3231_v13 = vsel %vm310_vm8, %v3227_v54, %v3229_v3 }
0x1290   : > { %v3247_v14 = vsel %vm332_vm12, %v3242_v60, %v3244_v4  ;;  %v3248_v15 = vsel %vm332_vm12, %v3244_v4, %v3246_v25  ;;  %3235 = vst [vmem:[#allocation3 + $0x8] sm:$0xf0] %v3231_v13 }
0x1291   : > { %v3251_v16 = vsel %vm267_vm11, %v3247_v14, 0.0  ;;  %v3252_v5 = vsel %vm268_vm13, %v3248_v15, 0.0  ;;  %v4447_v15 = vld [vmem:[%s6016_s1 + $0x28] sm:$0xf] }
0x1292   : > { %3253 = vst [vmem:[#allocation3 + $0x10] sm:$0xf] %v3251_v16  ;;  %3254 = vst [vmem:[#allocation3 + $0x18] sm:$0xf] %v3252_v5  ;;  %v3263_v9 = vpop.permute.xlu1 %3262 }
0x1293   : > { %v3305_v17 = vpop.permute.xlu0 %3304  ;;  %v3266_v18 = vsel %vm352_vm10, %v3261_v59, %v3263_v9  ;;  %v3267_v19 = vsel %vm352_vm10, %v3263_v9, %v3265_v49 }
0x1294   : > { %v3308_v21 = vsel %vm396_vm15, %v3303_v46, %v3305_v17  ;;  %v3309_v6 = vsel %vm396_vm15, %v3305_v17, %v3307_v45  ;;  %v3270_v26 = vsel %vm257_vm6, %v3266_v18, 0.0  ;;  %v3271_v27 = vsel %vm258_vm7, %v3267_v19, 0.0 }
0x1295   : > { %v3312_v22 = vsel %vm267_vm11, %v3308_v21, 0.0  ;;  %v3313_v28 = vsel %vm268_vm13, %v3309_v6, 0.0  ;;  %v3274_v29 = vrot.slane %v3270_v26, 4  ;;  %v3275_v30 = vrot.slane %v3271_v27, 4 }
0x1296   : > { %v3316_v25 = vrot.slane %v3312_v22, 4  ;;  %v3317_v31 = vrot.slane %v3313_v28, 4  ;;  %v3225_v20 = vpop.permute.xlu1 %3224 }
0x1297   : > { %v3330_v35 = vpop.permute.xlu0 %3329  ;;  %3278 = vst [vmem:[#allocation3 + $0x10] sm:$0xf0] %v3274_v29  ;;  %3279 = vst [vmem:[#allocation3 + $0x18] sm:$0xf0] %v3275_v30  ;;  %v3230_v37 = vsel %vm310_vm8, %v3225_v20, %v3227_v54  ;;  %v3381_v48 = vld [vmem:[#allocation3 + $0x8] sm:$0xff] }
0x1298   : > { %3320 = vst [vmem:[#allocation3 + $0x20] sm:$0xf0] %v3316_v25  ;;  %3321 = vst [vmem:[#allocation3 + $0x28] sm:$0xf0] %v3317_v31  ;;  %v3333_v32 = vsel %vm6086_vm14, %v3328_v39, %v3330_v35  ;;  %v3334_v36 = vsel %vm6083_vm0, %v3330_v35, %v3332_v23  ;;  %vm6088_vm14 = vcmask 769024  }
0x1299   : > { %v3337_v40 = vsel %vm257_vm6, %v3333_v32, 0.0  ;;  %v3338_v41 = vsel %vm258_vm7, %v3334_v36, 0.0  ;;  %3234 = vst [vmem:[#allocation3] sm:$0xf0] %v3230_v37  ;;  %vm6089_vm0 = vmmov %vm6088_vm14 }
0x129a   : > { %3339 = vst [vmem:[#allocation3 + $0x30] sm:$0xf] %v3337_v40  ;;  %3340 = vst [vmem:[#allocation3 + $0x38] sm:$0xf] %v3338_v41  ;;  %v3286_v45 = vpop.permute.xlu1 %3285 }
0x129b   : > { %v3288_v43 = vpop.permute.xlu0 %3287 }
0x129c   : > { %v3292_v1 = vsel %vm6084_vm3, %v3288_v43, %v3290_v33  ;;  %v3291_v47 = vsel %vm6087_vm4, %v3286_v45, %v3288_v43  ;;  %vm6090_vm3 = vcmask 138240   ;;  %vm6091_vm4 = vcmask 134144  }
0x129d   : > { %3296 = vst [vmem:[#allocation3 + $0x28] sm:$0xf] %v3292_v1  ;;  %3295 = vst [vmem:[#allocation3 + $0x20] sm:$0xf] %v3291_v47 }
0x129e   : > { %v3367_v49 = vpop.permute.xlu1 %3366  ;;  %v3383_v50 = vld [vmem:[#allocation3 + $0x18] sm:$0xff]  ;;  %v3382_v51 = vld [vmem:[#allocation3 + $0x10] sm:$0xff] }
0x129f   : > { %v3348_v23 = vpop.permute.xlu0 %3347  ;;  %v4551_v55 = vpack.c.bf16 %v3383_v50, %v3381_v48 }
0x12a0   : > { %v3353_v54 = vsel %vm443_vm9, %v3348_v23, %v3350_v24  ;;  %v3380_v57 = vld [vmem:[#allocation3] sm:$0xff] }
0x12a1   : > { %3357 = vst [vmem:[#allocation3 + $0x30] sm:$0xf0] %v3353_v54  ;;  %v4553_v58 = vpack.c.bf16 %v3382_v51, %v3380_v57  ;;  %4552 = vmatprep.subr.bf16.mxu1 %v4551_v55  ;;  %v3387_v46 = vld [vmem:[#allocation3 + $0x38] sm:$0xff] }
0x12a2   : > { %v3365_v60 = vpop.permute.xlu1 %3364 }
0x12a3   : > { %v3369_v59 = vpop.permute.xlu0 %3368  ;;  %4554 = vmatpush1.bf16.msra.mxu1 %v4553_v58  ;;  %v3370_v56 = vsel %vm6089_vm0, %v3365_v60, %v3367_v49 }
0x12a4   : > { %v3371_v33 = vsel %vm6088_vm14, %v3367_v49, %v3369_v59  ;;  %v3385_v38 = vld [vmem:[#allocation3 + $0x28] sm:$0xff]  ;;  %v3374_v24 = vsel %vm267_vm11, %v3370_v56, 0.0  ;;  %v3384_v2 = vld [vmem:[#allocation3 + $0x20] sm:$0xff]  ;;  %vm6092_vm14 = vmmov %vm6091_vm4 }
0x12a5   : > { %v3375_v39 = vsel %vm268_vm13, %v3371_v33, 0.0  ;;  %v4555_v61 = vpack.c.bf16 %v3387_v46, %v3385_v38  ;;  %3376 = vst [vmem:[#allocation3 + $0x40] sm:$0xf] %v3374_v24  ;;  %v4458_v38 = vld [vmem:[%s6017_s2 + $0x30] sm:$0xf] }
0x12a6   : > { %3377 = vst [vmem:[#allocation3 + $0x48] sm:$0xf] %v3375_v39 }
0x12a7   : > { %4556 = vmatprep.subr.bf16.mxu1 %v4555_v61 }
0x12a8   : > { %v3386_v3 = vld [vmem:[#allocation3 + $0x30] sm:$0xff] }
0x12a9   : > { %v4557_v4 = vpack.c.bf16 %v3386_v3, %v3384_v2 }
0x12ab   : > { %4558 = vmatpush1.bf16.msra.mxu1 %v4557_v4 }
0x12ac   : > { %v3388_v14 = vld [vmem:[#allocation3 + $0x40] sm:$0xf] }
0x12ad   : > { %v3389_v13 = vld [vmem:[#allocation3 + $0x48] sm:$0xf] }
0x12ae   : > { %4449 = vmatprep.subr.msk.mxu1 %vm491_vm2, %v3389_v13 }
0x12af   : > { %4450 = vmatpush1.msk.msra.mxu1 %vm491_vm2, %v3388_v14 }
0x12b0   : > { %4451 = vmatmul.mubr.msk.f32.vlgmr.msra.gmra.mrb[10].mxu1 %vm487_vm1, %v4447_v15 }
0x12b1   : > { %4027 = vmatprep.mubr.f32.mxu1 %v4667_v0 }
0x12b4   : > { %v3395_v16 = vpop.permute.xlu0 %3394 }
0x1383   : > { %v3472_v5 = vpop.f32.mrb[10].mxu1 }
0x1384   : > { %v3473_v9 = vadd.f32 %v3472_v5, %v3395_v16  ;;  %v3474_v17 = vpop.f32.mrb[11].mxu1 }
0x1385   : > { %v3475_v18 = vadd.f32 %v3474_v17, %v3395_v16 }
0x1386   : > { %v3479_v19 = vmin.f32 %v3473_v9, 0.0  ;;  %v3477_v6 = vmax.f32 %v3473_v9, 0.0 }
0x1387   : > { %v3480_v21 = vmin.f32 %v3475_v18, 0.0  ;;  %v3478_v27 = vmax.f32 %v3475_v18, 0.0 }
0x1388   : > { %v3481_v26 = vmul.f32 0.25, %v3479_v19 }
0x1389   : > { %v3482_v22 = vmul.f32 0.25, %v3480_v21 }
0x138a   : > { %v3483_v28 = vadd.f32 %v3481_v26, %v3477_v6 }
0x138b   : > { %v3484_v29 = vadd.f32 %v3482_v22, %v3478_v27 }
0x138d   : > { %v3487_v30 = vcombine.low %v3483_v28, %v3484_v29 }
0x138f   : > { %3488 = vrot.lane.b32.xlu1 %v3487_v30, %s4668_s24 }
0x1401   : > { %v3489_v25 = vpop.permute.xlu1 %3488 }
0x1402   : > { %v3490_v31 = vrot.slane %v3489_v25, 4 }
0x1404   : > { %v3491_v35 = vsel %vm6090_vm3, %v3490_v31, %v3489_v25  ;;  %3495 = vst.msk [vmem:[#allocation2 + $0x8] sm:$0xf] %vm6091_vm4, %v3490_v31  ;;  %vm6093_vm3 = vmmov %vm6089_vm0  ;;  %vm6094_vm4 = vcmask 785408  }
0x1405   : > { %3494 = vst.msk [vmem:[#allocation2] sm:$0xff] %vm4739_vm5, %v3491_v35 }
0x140b   : > { %v3542_v20 = vld [vmem:[#allocation2 + $0x8] sm:$0xf] }
0x140c   : > { %v3523_v32 = vld [vmem:[#allocation2 + $0x8] sm:$0xf]  ;;  %v3496_v37 = vld [vmem:[#allocation2] sm:$0xff]  ;;  %3550 = vrot.lane.b32.xlu1 %v3542_v20, %s4669_s25 }
0x140d   : > { %v3609_v36 = vld [vmem:[#allocation2 + $0x8] sm:$0xf]  ;;  %3531 = vrot.lane.b32.xlu0 %v3523_v32, %s4671_s27  ;;  %v3498_v43 = vcombine.high %v3496_v37, %v3496_v37  ;;  %v3500_v45 = vsel %vm257_vm6, %v3496_v37, 0.0  ;;  %3765 = vst.msk [vmem:[#allocation2] sm:$0xff] %vm4739_vm5, %v4748_v10  ;;  %v4442_v10 = vld [vmem:[%s6016_s1 + $0x24] sm:$0xf] }
0x140e   : > { %v3584_v40 = vld [vmem:[#allocation2 + $0x8] sm:$0xf]  ;;  %3502 = vst [vmem:[#allocation3] sm:$0xf] %v3500_v45  ;;  %4446 = vmatmul.mubr.msk.f32.vlgmr.msra.gmra.mrb[10].mxu0 %vm487_vm1, %v4442_v10 }
0x140f   : > { %v3567_v41 = vld [vmem:[#allocation2 + $0x8] sm:$0xf]  ;;  %v3501_v49 = vsel %vm258_vm7, %v3498_v43, 0.0  ;;  %3756 = vmatprep.mubr.f32.mxu0 %v4667_v0 }
0x1410   : > { %v3646_v1 = vld [vmem:[#allocation2 + $0x8] sm:$0xf]  ;;  %3503 = vst [vmem:[#allocation3 + $0x8] sm:$0xf] %v3501_v49  ;;  %3617 = vrot.lane.b32.xlu1 %v3609_v36, %s4670_s26 }
0x1411   : > { %v4648_v47 = vld [vmem:[#allocation2 + $0x8] ss:$0 sps:$4 sm:$0xff]   ;;  %3592 = vrot.lane.b32.xlu0 %v3584_v40, %s4673_s29 }
0x1412   : > { %v4649_v23 = vld [vmem:[#allocation2 + $0x8] ss:$0 sps:$4 sm:$0xff]  }
0x1413   : > { %3766 = vst.msk [vmem:[#allocation2 + $0x8] sm:$0xf] %vm6092_vm14, %v4743_v8  ;;  %v3508_v8 = vcombine.low %v3496_v37, %v3496_v37  ;;  %vm6095_vm14 = vmmov %vm6094_vm4 }
0x1414   : > { %3575 = vrot.lane.b32.xlu1 %v3567_v41, %s4672_s28  ;;  %v5772_v57 = vld [vmem:[#allocation2] sm:$0xff] }
0x1415   : > { %3654 = vrot.lane.b32.xlu0 %v3646_v1, %s4676_s7  ;;  %v3769_v59 = vcombine.high %v5772_v57, %v5772_v57  ;;  %v3779_v33 = vcombine.low %v5772_v57, %v5772_v57 }
0x1417   : > { %v3772_v26 = vsel %vm258_vm7, %v3769_v59, 0.0 }
0x1418   : > { %3512 = vrot.lane.b32.xlu1 %v3496_v37, %s4674_s30 }
0x1419   : > { %3546 = vrot.lane.b32.xlu0 %v3496_v37, %s4669_s25 }
0x141a   : > { %v3794_v48 = vld [vmem:[#allocation2 + $0x8] sm:$0xf] }
0x141b   : > { %v3855_v50 = vld [vmem:[#allocation2 + $0x8] sm:$0xf] }
0x141c   : > { %3527 = vrot.lane.b32.xlu1 %v3496_v37, %s4671_s27  ;;  %v3880_v51 = vld [vmem:[#allocation2 + $0x8] sm:$0xf] }
0x141d   : > { %3613 = vrot.lane.b32.xlu0 %v3496_v37, %s4670_s26  ;;  %v3813_v54 = vld [vmem:[#allocation2 + $0x8] sm:$0xf] }
0x141e   : > { %v3838_v55 = vld [vmem:[#allocation2 + $0x8] sm:$0xf] }
0x141f   : > { %v4652_v58 = vld [vmem:[#allocation2 + $0x8] ss:$0 sps:$4 sm:$0xff]  }
0x1420   : > { %3588 = vrot.lane.b32.xlu1 %v3496_v37, %s4673_s29  ;;  %v4653_v60 = vld [vmem:[#allocation2 + $0x8] ss:$0 sps:$4 sm:$0xff]  }
0x1421   : > { %3650 = vrot.lane.b32.xlu0 %v3496_v37, %s4676_s7  ;;  %v3917_v56 = vld [vmem:[#allocation2 + $0x8] sm:$0xf] }
0x1424   : > { %3635 = vrot.lane.b32.xlu1 %v3496_v37, %s4675_s6 }
0x1425   : > { %3514 = vrot.lane.b32.xlu0 %v4648_v47, %s4674_s30 }
0x1428   : > { %3571 = vrot.lane.b32.xlu1 %v3496_v37, %s4672_s28 }
0x1429   : > { %3637 = vrot.lane.b32.xlu0 %v4649_v23, %s4675_s6 }
0x142c   : > { %3529 = vrot.lane.b32.xlu1 %v3498_v43, %s4671_s27 }
0x142d   : > { %3548 = vrot.lane.b32.xlu0 %v3498_v43, %s4669_s25 }
0x1430   : > { %3590 = vrot.lane.b32.xlu1 %v3498_v43, %s4673_s29 }
0x1431   : > { %3510 = vrot.lane.b32.xlu0 %v3508_v8, %s4674_s30 }
0x1434   : > { %3652 = vrot.lane.b32.xlu1 %v3498_v43, %s4676_s7 }
0x1435   : > { %3615 = vrot.lane.b32.xlu0 %v3498_v43, %s4670_s26 }
0x1438   : > { %3802 = vrot.lane.b32.xlu1 %v3794_v48, %s4671_s27 }
0x1439   : > { %3573 = vrot.lane.b32.xlu0 %v3498_v43, %s4672_s28 }
0x143c   : > { %3863 = vrot.lane.b32.xlu1 %v3855_v50, %s4673_s29 }
0x143d   : > { %3633 = vrot.lane.b32.xlu0 %v3508_v8, %s4675_s6 }
0x1440   : > { %3888 = vrot.lane.b32.xlu1 %v3880_v51, %s4670_s26 }
0x1441   : > { %3821 = vrot.lane.b32.xlu0 %v3813_v54, %s4669_s25 }
0x1444   : > { %3846 = vrot.lane.b32.xlu1 %v3838_v55, %s4672_s28 }
0x1445   : > { %3783 = vrot.lane.b32.xlu0 %v5772_v57, %s4674_s30 }
0x1448   : > { %3817 = vrot.lane.b32.xlu1 %v5772_v57, %s4669_s25 }
0x1449   : > { %3798 = vrot.lane.b32.xlu0 %v5772_v57, %s4671_s27 }
0x144c   : > { %3859 = vrot.lane.b32.xlu1 %v5772_v57, %s4673_s29 }
0x144d   : > { %3884 = vrot.lane.b32.xlu0 %v5772_v57, %s4670_s26 }
0x1450   : > { %3906 = vrot.lane.b32.xlu1 %v5772_v57, %s4675_s6 }
0x1451   : > { %3908 = vrot.lane.b32.xlu0 %v4652_v58, %s4675_s6 }
0x1454   : > { %3785 = vrot.lane.b32.xlu1 %v4653_v60, %s4674_s30 }
0x1455   : > { %3800 = vrot.lane.b32.xlu0 %v3769_v59, %s4671_s27 }
0x1458   : > { %3819 = vrot.lane.b32.xlu1 %v3769_v59, %s4669_s25 }
0x1459   : > { %3861 = vrot.lane.b32.xlu0 %v3769_v59, %s4673_s29 }
0x145c   : > { %3781 = vrot.lane.b32.xlu1 %v3779_v33, %s4674_s30 }
0x145d   : > { %3886 = vrot.lane.b32.xlu0 %v3769_v59, %s4670_s26 }
0x1460   : > { %3842 = vrot.lane.b32.xlu1 %v5772_v57, %s4672_s28 }
0x1461   : > { %3844 = vrot.lane.b32.xlu0 %v3769_v59, %s4672_s28 }
0x1464   : > { %3923 = vrot.lane.b32.xlu1 %v3769_v59, %s4676_s7 }
0x1465   : > { %3904 = vrot.lane.b32.xlu0 %v3779_v33, %s4675_s6 }
0x1468   : > { %3921 = vrot.lane.b32.xlu1 %v5772_v57, %s4676_s7 }
0x1469   : > { %3925 = vrot.lane.b32.xlu0 %v3917_v56, %s4676_s7 }
0x146d   : > { %3951 = vperm.xlu0 %4603, %v4458_v38  }
0x147e   : > { %v3551_v46 = vpop.permute.xlu1 %3550 }
0x147f   : > { %v3532_v39 = vpop.permute.xlu0 %3531 }
0x1482   : > { %v3618_v24 = vpop.permute.xlu1 %3617 }
0x1483   : > { %v3593_v61 = vpop.permute.xlu0 %3592 }
0x1486   : > { %v5809_v2 = vpop.permute.xlu1 %3575 }
0x1487   : > { %v3655_v3 = vpop.permute.xlu0 %3654 }
0x148a   : > { %v3513_v13 = vpop.permute.xlu1 %3512 }
0x148b   : > { %v3547_v4 = vpop.permute.xlu0 %3546 }
0x148e   : > { %v3528_v15 = vpop.permute.xlu1 %3527 }
0x148f   : > { %v3614_v14 = vpop.permute.xlu0 %3613 }
0x1492   : > { %v3589_v5 = vpop.permute.xlu1 %3588 }
0x1493   : > { %v3651_v16 = vpop.permute.xlu0 %3650 }
0x1496   : > { %v5811_v17 = vpop.permute.xlu1 %3635 }
0x1497   : > { %v3515_v9 = vpop.permute.xlu0 %3514 }
0x1498   : > { %v3517_v18 = vsel %vm310_vm8, %v3513_v13, %v3515_v9 }
0x1499   : > { %3521 = vst [vmem:[#allocation3 + $0x8] sm:$0xf0] %v3517_v18 }
0x149a   : > { %v3572_v21 = vpop.permute.xlu1 %3571 }
0x149b   : > { %v3638_v19 = vpop.permute.xlu0 %3637 }
0x149c   : > { %v3640_v6 = vsel %vm443_vm9, %v5811_v17, %v3638_v19 }
0x149d   : > { %3644 = vst [vmem:[#allocation3 + $0x38] sm:$0xf0] %v3640_v6 }
0x149e   : > { %v3530_v22 = vpop.permute.xlu1 %3529 }
0x149f   : > { %v3549_v27 = vpop.permute.xlu0 %3548  ;;  %v3533_v30 = vsel %vm332_vm12, %v3528_v15, %v3530_v22  ;;  %v3534_v25 = vsel %vm332_vm12, %v3530_v22, %v3532_v39 }
0x14a0   : > { %v3552_v28 = vsel %vm352_vm10, %v3547_v4, %v3549_v27  ;;  %v3553_v29 = vsel %vm352_vm10, %v3549_v27, %v3551_v46  ;;  %v3667_v31 = vld [vmem:[#allocation3 + $0x8] sm:$0xff]  ;;  %v3537_v32 = vsel %vm267_vm11, %v3533_v30, 0.0  ;;  %v3538_v36 = vsel %vm268_vm13, %v3534_v25, 0.0 }
0x14a1   : > { %v3556_v35 = vsel %vm257_vm6, %v3552_v28, 0.0  ;;  %v3557_v20 = vsel %vm258_vm7, %v3553_v29, 0.0  ;;  %3774 = vst [vmem:[#allocation3 + $0x8] sm:$0xf] %v3772_v26  ;;  %3539 = vst [vmem:[#allocation3 + $0x10] sm:$0xf] %v3537_v32 }
0x14a2   : > { %v3560_v37 = vrot.slane %v3556_v35, 4  ;;  %v3561_v40 = vrot.slane %v3557_v20, 4  ;;  %3540 = vst [vmem:[#allocation3 + $0x18] sm:$0xf] %v3538_v36  ;;  %v3591_v41 = vpop.permute.xlu1 %3590 }
0x14a3   : > { %v3511_v43 = vpop.permute.xlu0 %3510  ;;  %v3594_v45 = vsel %vm396_vm15, %v3589_v5, %v3591_v41  ;;  %v3595_v1 = vsel %vm396_vm15, %v3591_v41, %v3593_v61  ;;  %v3771_v61 = vsel %vm257_vm6, %v5772_v57, 0.0 }
0x14a4   : > { %3564 = vst [vmem:[#allocation3 + $0x10] sm:$0xf0] %v3560_v37  ;;  %3565 = vst [vmem:[#allocation3 + $0x18] sm:$0xf0] %v3561_v40  ;;  %v3516_v47 = vsel %vm310_vm8, %v3511_v43, %v3513_v13  ;;  %v3598_v23 = vsel %vm267_vm11, %v3594_v45, 0.0  ;;  %v3599_v49 = vsel %vm268_vm13, %v3595_v1, 0.0 }
0x14a5   : > { %3520 = vst [vmem:[#allocation3] sm:$0xf0] %v3516_v47  ;;  %v3602_v8 = vrot.slane %v3598_v23, 4  ;;  %v3603_v10 = vrot.slane %v3599_v49, 4 }
0x14a6   : > { %v3653_v48 = vpop.permute.xlu1 %3652 }
0x14a7   : > { %v3616_v50 = vpop.permute.xlu0 %3615  ;;  %3606 = vst [vmem:[#allocation3 + $0x20] sm:$0xf0] %v3602_v8  ;;  %3607 = vst [vmem:[#allocation3 + $0x28] sm:$0xf0] %v3603_v10  ;;  %v3656_v51 = vsel %vm6089_vm0, %v3651_v16, %v3653_v48  ;;  %v3657_v54 = vsel %vm6093_vm3, %v3653_v48, %v3655_v3  ;;  %vm6096_vm0 = vcmask 908288  }
0x14a8   : > { %v3619_v55 = vsel %vm6094_vm4, %v3614_v14, %v3616_v50  ;;  %v3620_v58 = vsel %vm6095_vm14, %v3616_v50, %v3618_v24  ;;  %v3660_v59 = vsel %vm267_vm11, %v3656_v51, 0.0  ;;  %v3661_v60 = vsel %vm268_vm13, %v3657_v54, 0.0  ;;  %vm6097_vm3 = vmmov %vm6096_vm0 }
0x14a9   : > { %v3623_v33 = vsel %vm257_vm6, %v3619_v55, 0.0  ;;  %v3624_v56 = vsel %vm258_vm7, %v3620_v58, 0.0  ;;  %3662 = vst [vmem:[#allocation3 + $0x40] sm:$0xf] %v3660_v59  ;;  %3663 = vst [vmem:[#allocation3 + $0x48] sm:$0xf] %v3661_v60 }
0x14aa   : > { %3625 = vst [vmem:[#allocation3 + $0x30] sm:$0xf] %v3623_v33  ;;  %3626 = vst [vmem:[#allocation3 + $0x38] sm:$0xf] %v3624_v56  ;;  %v3803_v38 = vpop.permute.xlu1 %3802 }
0x14ab   : > { %v3574_v46 = vpop.permute.xlu0 %3573  ;;  %v3669_v39 = vld [vmem:[#allocation3 + $0x18] sm:$0xff]  ;;  %v3668_v24 = vld [vmem:[#allocation3 + $0x10] sm:$0xff]  ;;  %vm6098_vm14 = vmmov %vm6094_vm4 }
0x14ac   : > { %v3577_v3 = vsel %vm6096_vm0, %v3572_v21, %v3574_v46  ;;  %v3578_v4 = vsel %vm6097_vm3, %v3574_v46, %v5809_v2  ;;  %v4559_v13 = vpack.c.bf16 %v3669_v39, %v3667_v31  ;;  %v3666_v14 = vld [vmem:[#allocation3] sm:$0xff]  ;;  %vm6099_vm3 = vmmov %vm6096_vm0 }
0x14ad   : > { %3581 = vst [vmem:[#allocation3 + $0x20] sm:$0xf] %v3577_v3  ;;  %3582 = vst [vmem:[#allocation3 + $0x28] sm:$0xf] %v3578_v4  ;;  %v4561_v15 = vpack.c.bf16 %v3668_v24, %v3666_v14 }
0x14ae   : > { %3773 = vst [vmem:[#allocation3] sm:$0xf] %v3771_v61  ;;  %4560 = vmatprep.subr.bf16.mxu0 %v4559_v13  ;;  %v3864_v16 = vpop.permute.xlu1 %3863 }
0x14af   : > { %v3634_v5 = vpop.permute.xlu0 %3633  ;;  %4562 = vmatpush1.bf16.msra.mxu0 %v4561_v15 }
0x14b0   : > { %v3639_v9 = vsel %vm443_vm9, %v3634_v5, %v5811_v17  ;;  %v3675_v25 = vld [vmem:[#allocation3 + $0x48] sm:$0xf]  ;;  %v3674_v31 = vld [vmem:[#allocation3 + $0x40] sm:$0xf] }
0x14b1   : > { %3643 = vst [vmem:[#allocation3 + $0x30] sm:$0xf0] %v3639_v9  ;;  %v3673_v21 = vld [vmem:[#allocation3 + $0x38] sm:$0xff] }
0x14b2   : > { %v3889_v57 = vpop.permute.xlu1 %3888 }
0x14b3   : > { %v3822_v18 = vpop.permute.xlu0 %3821 }
0x14b4   : > { %v3671_v19 = vld [vmem:[#allocation3 + $0x28] sm:$0xff]  ;;  %v3670_v27 = vld [vmem:[#allocation3 + $0x20] sm:$0xff] }
0x14b5   : > { %v4563_v6 = vpack.c.bf16 %v3673_v21, %v3671_v19 }
0x14b6   : > { %v3847_v2 = vpop.permute.xlu1 %3846 }
0x14b7   : > { %v3784_v26 = vpop.permute.xlu0 %3783  ;;  %4564 = vmatprep.subr.bf16.mxu0 %v4563_v6 }
0x14b8   : > { %v3672_v22 = vld [vmem:[#allocation3 + $0x30] sm:$0xff] }
0x14b9   : > { %v4565_v28 = vpack.c.bf16 %v3672_v22, %v3670_v27 }
0x14ba   : > { %v3818_v29 = vpop.permute.xlu1 %3817 }
0x14bb   : > { %v3799_v30 = vpop.permute.xlu0 %3798  ;;  %4566 = vmatpush1.bf16.msra.mxu0 %v4565_v28 }
0x14bc   : > { %4454 = vmatprep.subr.msk.mxu0 %vm491_vm2, %v3675_v25 }
0x14be   : > { %v3860_v17 = vpop.permute.xlu1 %3859 }
0x14bf   : > { %v3885_v35 = vpop.permute.xlu0 %3884  ;;  %4455 = vmatpush1.msk.msra.mxu0 %vm491_vm2, %v3674_v31 }
0x14c2   : > { %v3907_v20 = vpop.permute.xlu1 %3906 }
0x14c3   : > { %v3909_v32 = vpop.permute.xlu0 %3908 }
0x14c4   : > { %v3911_v36 = vsel %vm443_vm9, %v3907_v20, %v3909_v32 }
0x14c5   : > { %3915 = vst [vmem:[#allocation3 + $0x38] sm:$0xf0] %v3911_v36 }
0x14c6   : > { %v3786_v37 = vpop.permute.xlu1 %3785 }
0x14c7   : > { %v3801_v40 = vpop.permute.xlu0 %3800  ;;  %v3788_v41 = vsel %vm310_vm8, %v3784_v26, %v3786_v37 }
0x14c8   : > { %v3804_v43 = vsel %vm332_vm12, %v3799_v30, %v3801_v40  ;;  %v3805_v45 = vsel %vm332_vm12, %v3801_v40, %v3803_v38  ;;  %3792 = vst [vmem:[#allocation3 + $0x8] sm:$0xf0] %v3788_v41  ;;  %v4457_v41 = vld [vmem:[%s6016_s1 + $0x30] sm:$0xf] }
0x14c9   : > { %v3808_v1 = vsel %vm267_vm11, %v3804_v43, 0.0  ;;  %v3809_v47 = vsel %vm268_vm13, %v3805_v45, 0.0  ;;  %v4452_v43 = vld [vmem:[%s6016_s1 + $0x2c] sm:$0xf] }
0x14ca   : > { %3810 = vst [vmem:[#allocation3 + $0x10] sm:$0xf] %v3808_v1  ;;  %3811 = vst [vmem:[#allocation3 + $0x18] sm:$0xf] %v3809_v47  ;;  %v3820_v23 = vpop.permute.xlu1 %3819  ;;  %4456 = vmatmul.mubr.msk.f32.vlgmr.msra.gmra.mrb[12].mxu0 %vm487_vm1, %v4452_v43 }
0x14cb   : > { %v3862_v49 = vpop.permute.xlu0 %3861  ;;  %v3823_v8 = vsel %vm352_vm10, %v3818_v29, %v3820_v23  ;;  %v3824_v10 = vsel %vm352_vm10, %v3820_v23, %v3822_v18  ;;  %4313 = vmatprep.mubr.f32.mxu0 %v4667_v0 }
0x14cc   : > { %v3865_v48 = vsel %vm396_vm15, %v3860_v17, %v3862_v49  ;;  %v3866_v50 = vsel %vm396_vm15, %v3862_v49, %v3864_v16  ;;  %v3827_v51 = vsel %vm257_vm6, %v3823_v8, 0.0  ;;  %v3828_v54 = vsel %vm258_vm7, %v3824_v10, 0.0 }
0x14cd   : > { %v3869_v55 = vsel %vm267_vm11, %v3865_v48, 0.0  ;;  %v3870_v58 = vsel %vm268_vm13, %v3866_v50, 0.0  ;;  %v3831_v59 = vrot.slane %v3827_v51, 4  ;;  %v3832_v60 = vrot.slane %v3828_v54, 4 }
0x14ce   : > { %v3873_v33 = vrot.slane %v3869_v55, 4  ;;  %v3874_v56 = vrot.slane %v3870_v58, 4  ;;  %v3782_v46 = vpop.permute.xlu1 %3781 }
0x14cf   : > { %v3887_v38 = vpop.permute.xlu0 %3886  ;;  %3835 = vst [vmem:[#allocation3 + $0x10] sm:$0xf0] %v3831_v59  ;;  %3836 = vst [vmem:[#allocation3 + $0x18] sm:$0xf0] %v3832_v60  ;;  %v3787_v61 = vsel %vm310_vm8, %v3782_v46, %v3784_v26 }
0x14d0   : > { %3877 = vst [vmem:[#allocation3 + $0x20] sm:$0xf0] %v3873_v33  ;;  %3878 = vst [vmem:[#allocation3 + $0x28] sm:$0xf0] %v3874_v56  ;;  %v3890_v39 = vsel %vm6094_vm4, %v3885_v35, %v3887_v38  ;;  %v3891_v24 = vsel %vm6098_vm14, %v3887_v38, %v3889_v57  ;;  %v3938_v57 = vld [vmem:[#allocation3 + $0x8] sm:$0xff]  ;;  %vm6100_vm4 = vcmask 769024  }
0x14d1   : > { %v3894_v3 = vsel %vm257_vm6, %v3890_v39, 0.0  ;;  %v3895_v4 = vsel %vm258_vm7, %v3891_v24, 0.0  ;;  %3791 = vst [vmem:[#allocation3] sm:$0xf0] %v3787_v61  ;;  %vm6101_vm14 = vmmov %vm6100_vm4 }
0x14d2   : > { %3896 = vst [vmem:[#allocation3 + $0x30] sm:$0xf] %v3894_v3  ;;  %3897 = vst [vmem:[#allocation3 + $0x38] sm:$0xf] %v3895_v4  ;;  %v3843_v14 = vpop.permute.xlu1 %3842 }
0x14d3   : > { %v3845_v13 = vpop.permute.xlu0 %3844 }
0x14d4   : > { %v3849_v15 = vsel %vm6096_vm0, %v3845_v13, %v3847_v2  ;;  %v3848_v16 = vsel %vm6099_vm3, %v3843_v14, %v3845_v13  ;;  %vm6102_vm0 = vcmask 138240   ;;  %vm6103_vm3 = vcmask 134144  }
0x14d5   : > { %3853 = vst [vmem:[#allocation3 + $0x28] sm:$0xf] %v3849_v15  ;;  %3852 = vst [vmem:[#allocation3 + $0x20] sm:$0xf] %v3848_v16 }
0x14d6   : > { %v3924_v9 = vpop.permute.xlu1 %3923  ;;  %v3940_v18 = vld [vmem:[#allocation3 + $0x18] sm:$0xff]  ;;  %v3939_v19 = vld [vmem:[#allocation3 + $0x10] sm:$0xff] }
0x14d7   : > { %v3905_v5 = vpop.permute.xlu0 %3904  ;;  %v4567_v6 = vpack.c.bf16 %v3940_v18, %v3938_v57  ;;  %v4443_v57 = vld [vmem:[%s6017_s2 + $0x24] sm:$0xf]  ;;  %v4453_v18 = vld [vmem:[%s6017_s2 + $0x2c] sm:$0xf] }
0x14d8   : > { %v3910_v21 = vsel %vm443_vm9, %v3905_v5, %v3907_v20  ;;  %v3937_v26 = vld [vmem:[#allocation3] sm:$0xff] }
0x14d9   : > { %3914 = vst [vmem:[#allocation3 + $0x30] sm:$0xf0] %v3910_v21  ;;  %v4569_v27 = vpack.c.bf16 %v3939_v19, %v3937_v26  ;;  %4568 = vmatprep.subr.bf16.mxu1 %v4567_v6  ;;  %v3944_v25 = vld [vmem:[#allocation3 + $0x38] sm:$0xff]  ;;  %v4463_v21 = vld [vmem:[%s6017_s2 + $0x34] sm:$0xf] }
0x14da   : > { %v3922_v28 = vpop.permute.xlu1 %3921 }
0x14db   : > { %v3926_v22 = vpop.permute.xlu0 %3925  ;;  %4570 = vmatpush1.bf16.msra.mxu1 %v4569_v27  ;;  %v3927_v29 = vsel %vm6101_vm14, %v3922_v28, %v3924_v9 }
0x14dc   : > { %v3928_v2 = vsel %vm6100_vm4, %v3924_v9, %v3926_v22  ;;  %v3942_v30 = vld [vmem:[#allocation3 + $0x28] sm:$0xff]  ;;  %v3931_v17 = vsel %vm267_vm11, %v3927_v29, 0.0  ;;  %v3941_v20 = vld [vmem:[#allocation3 + $0x20] sm:$0xff] }
0x14dd   : > { %v3932_v31 = vsel %vm268_vm13, %v3928_v2, 0.0  ;;  %v4571_v35 = vpack.c.bf16 %v3944_v25, %v3942_v30  ;;  %3933 = vst [vmem:[#allocation3 + $0x40] sm:$0xf] %v3931_v17 }
0x14de   : > { %3934 = vst [vmem:[#allocation3 + $0x48] sm:$0xf] %v3932_v31 }
0x14df   : > { %4572 = vmatprep.subr.bf16.mxu1 %v4571_v35 }
0x14e0   : > { %v3943_v32 = vld [vmem:[#allocation3 + $0x30] sm:$0xff] }
0x14e1   : > { %v4573_v36 = vpack.c.bf16 %v3943_v32, %v3941_v20  ;;  %v5937_v5 = vpop.f32.mrb[10].mxu0 }
0x14e2   : > { %v5941_v9 = vpop.f32.mrb[11].mxu0 }
0x14e3   : > { %4574 = vmatpush1.bf16.msra.mxu1 %v4573_v36 }
0x14e4   : > { %v3945_v40 = vld [vmem:[#allocation3 + $0x40] sm:$0xf] }
0x14e5   : > { %v3946_v37 = vld [vmem:[#allocation3 + $0x48] sm:$0xf] }
0x14e6   : > { %4459 = vmatprep.subr.msk.mxu1 %vm491_vm2, %v3946_v37 }
0x14e7   : > { %4460 = vmatpush1.msk.msra.mxu1 %vm491_vm2, %v3945_v40 }
0x14e8   : > { %4461 = vmatmul.mubr.msk.f32.vlgmr.msra.gmra.mrb[12].mxu1 %vm487_vm1, %v4457_v41 }
0x14ec   : > { %v3952_v45 = vpop.permute.xlu0 %3951 }
0x159d   : > { %v5949_v19 = vpop.f32.mrb[12].mxu0 }
0x159e   : > { %v5954_v6 = vpop.f32.mrb[13].mxu0 }
0x15bb   : > { %v4029_v1 = vpop.f32.mrb[12].mxu1 }
0x15bc   : > { %v4030_v47 = vadd.f32 %v4029_v1, %v3952_v45  ;;  %v4031_v23 = vpop.f32.mrb[13].mxu1 }
0x15bd   : > { %v4032_v49 = vadd.f32 %v4031_v23, %v3952_v45 }
0x15be   : > { %v4036_v8 = vmin.f32 %v4030_v47, 0.0  ;;  %v4034_v48 = vmax.f32 %v4030_v47, 0.0 }
0x15bf   : > { %v4037_v10 = vmin.f32 %v4032_v49, 0.0  ;;  %v4035_v51 = vmax.f32 %v4032_v49, 0.0 }
0x15c0   : > { %v4038_v50 = vmul.f32 0.25, %v4036_v8 }
0x15c1   : > { %v4039_v54 = vmul.f32 0.25, %v4037_v10 }
0x15c2   : > { %v4040_v55 = vadd.f32 %v4038_v50, %v4034_v48 }
0x15c3   : > { %v4041_v58 = vadd.f32 %v4039_v54, %v4035_v51 }
0x15c5   : > { %v4044_v59 = vcombine.low %v4040_v55, %v4041_v58 }
0x15c7   : > { %4045 = vrot.lane.b32.xlu1 %v4044_v59, %s4668_s24 }
0x1639   : > { %v4046_v60 = vpop.permute.xlu1 %4045 }
0x163a   : > { %v4047_v33 = vrot.slane %v4046_v60, 4 }
0x163c   : > { %v4048_v0 = vsel %vm6102_vm0, %v4047_v33, %v4046_v60  ;;  %4052 = vst.msk [vmem:[#allocation2 + $0x8] sm:$0xf] %vm6103_vm3, %v4047_v33 }
0x163d   : > { %4051 = vst.msk [vmem:[#allocation2] sm:$0xff] %vm4739_vm5, %v4048_v0  ;;  %vm6104_vm5 = vcmask 785408  }
0x1643   : > { %v4099_v56 = vld [vmem:[#allocation2 + $0x8] sm:$0xf] }
0x1644   : > { %v4080_v38 = vld [vmem:[#allocation2 + $0x8] sm:$0xf]  ;;  %v4053_v46 = vld [vmem:[#allocation2] sm:$0xff]  ;;  %4107 = vrot.lane.b32.xlu1 %v4099_v56, %s4669_s25 }
0x1645   : > { %4088 = vrot.lane.b32.xlu0 %v4080_v38, %s4671_s27  ;;  %v4055_v39 = vcombine.high %v4053_v46, %v4053_v46  ;;  %v4057_v24 = vsel %vm257_vm6, %v4053_v46, 0.0  ;;  %v4166_v3 = vld [vmem:[#allocation2 + $0x8] sm:$0xf]  ;;  %v4065_v15 = vcombine.low %v4053_v46, %v4053_v46 }
0x1646   : > { %4059 = vst [vmem:[#allocation3] sm:$0xf] %v4057_v24  ;;  %v4141_v4 = vld [vmem:[#allocation2 + $0x8] sm:$0xf] }
0x1647   : > { %v4058_v61 = vsel %vm258_vm7, %v4055_v39, 0.0  ;;  %v4124_v7 = vld [vmem:[#allocation2 + $0x8] sm:$0xf] }
0x1648   : > { %4060 = vst [vmem:[#allocation3 + $0x8] sm:$0xf] %v4058_v61  ;;  %4174 = vrot.lane.b32.xlu1 %v4166_v3, %s4670_s26  ;;  %v4655_v13 = vld [vmem:[#allocation2 + $0x8] ss:$0 sps:$4 sm:$0xff]  }
0x1649   : > { %4149 = vrot.lane.b32.xlu0 %v4141_v4, %s4673_s29  ;;  %v4656_v14 = vld [vmem:[#allocation2 + $0x8] ss:$0 sps:$4 sm:$0xff]  }
0x164a   : > { %v4203_v16 = vld [vmem:[#allocation2 + $0x8] sm:$0xf] }
0x164c   : > { %4132 = vrot.lane.b32.xlu1 %v4124_v7, %s4672_s28 }
0x164d   : > { %4103 = vrot.lane.b32.xlu0 %v4053_v46, %s4669_s25 }
0x1650   : > { %4069 = vrot.lane.b32.xlu1 %v4053_v46, %s4674_s30 }
0x1651   : > { %4170 = vrot.lane.b32.xlu0 %v4053_v46, %s4670_s26 }
0x1654   : > { %4084 = vrot.lane.b32.xlu1 %v4053_v46, %s4671_s27 }
0x1655   : > { %4071 = vrot.lane.b32.xlu0 %v4655_v13, %s4674_s30 }
0x1658   : > { %4145 = vrot.lane.b32.xlu1 %v4053_v46, %s4673_s29 }
0x1659   : > { %4194 = vrot.lane.b32.xlu0 %v4656_v14, %s4675_s6 }
0x165c   : > { %4192 = vrot.lane.b32.xlu1 %v4053_v46, %s4675_s6 }
0x165d   : > { %4105 = vrot.lane.b32.xlu0 %v4055_v39, %s4669_s25 }
0x1660   : > { %4086 = vrot.lane.b32.xlu1 %v4055_v39, %s4671_s27 }
0x1661   : > { %4067 = vrot.lane.b32.xlu0 %v4065_v15, %s4674_s30 }
0x1664   : > { %4147 = vrot.lane.b32.xlu1 %v4055_v39, %s4673_s29 }
0x1665   : > { %4172 = vrot.lane.b32.xlu0 %v4055_v39, %s4670_s26 }
0x1668   : > { %4128 = vrot.lane.b32.xlu1 %v4053_v46, %s4672_s28 }
0x1669   : > { %4130 = vrot.lane.b32.xlu0 %v4055_v39, %s4672_s28 }
0x166c   : > { %4209 = vrot.lane.b32.xlu1 %v4055_v39, %s4676_s7 }
0x166d   : > { %4190 = vrot.lane.b32.xlu0 %v4065_v15, %s4675_s6 }
0x1670   : > { %4207 = vrot.lane.b32.xlu1 %v4053_v46, %s4676_s7 }
0x1671   : > { %4211 = vrot.lane.b32.xlu0 %v4203_v16, %s4676_s7  ;;  %s4470_s7 = sshll.u32 %s6111_s19, 5 }
0x1672   : > { %s224_s10 = scalar_lea.vmem %s6020_s5, %s4470_s7 }
0x1674   : > { %3123 = vperm.xlu1 %4602, %v4443_v57  }
0x1675   : > { %3680 = vperm.xlu0 %4603, %v4453_v18  }
0x1679   : > { %4237 = vperm.xlu0 %4603, %v4463_v21  }
0x16b6   : > { %v4108_v26 = vpop.permute.xlu1 %4107 }
0x16b7   : > { %v4089_v27 = vpop.permute.xlu0 %4088 }
0x16ba   : > { %v4175_v22 = vpop.permute.xlu1 %4174 }
0x16bb   : > { %v4150_v28 = vpop.permute.xlu0 %4149 }
0x16be   : > { %v4133_v2 = vpop.permute.xlu1 %4132 }
0x16bf   : > { %v4104_v29 = vpop.permute.xlu0 %4103 }
0x16c2   : > { %v4070_v25 = vpop.permute.xlu1 %4069 }
0x16c3   : > { %v4171_v30 = vpop.permute.xlu0 %4170 }
0x16c6   : > { %v4085_v17 = vpop.permute.xlu1 %4084 }
0x16c7   : > { %v4072_v31 = vpop.permute.xlu0 %4071 }
0x16c8   : > { %v4074_v35 = vsel %vm310_vm8, %v4070_v25, %v4072_v31 }
0x16c9   : > { %4078 = vst [vmem:[#allocation3 + $0x8] sm:$0xf0] %v4074_v35 }
0x16ca   : > { %v4146_v32 = vpop.permute.xlu1 %4145 }
0x16cb   : > { %v4195_v20 = vpop.permute.xlu0 %4194 }
0x16ce   : > { %v4193_v37 = vpop.permute.xlu1 %4192 }
0x16cf   : > { %v4106_v36 = vpop.permute.xlu0 %4105  ;;  %v4197_v43 = vsel %vm443_vm9, %v4193_v37, %v4195_v20 }
0x16d0   : > { %v4109_v40 = vsel %vm352_vm10, %v4104_v29, %v4106_v36  ;;  %v4110_v41 = vsel %vm352_vm10, %v4106_v36, %v4108_v26  ;;  %4201 = vst [vmem:[#allocation3 + $0x38] sm:$0xf0] %v4197_v43  ;;  %vm6105_vm10 = vmmov %vm6104_vm5  ;;  %v4224_v11 = vld [vmem:[#allocation3 + $0x8] sm:$0xff] }
0x16d1   : > { %v4113_v45 = vsel %vm257_vm6, %v4109_v40, 0.0  ;;  %v4114_v1 = vsel %vm258_vm7, %v4110_v41, 0.0  ;;  %v4462_v40 = vld [vmem:[%s6016_s1 + $0x34] sm:$0xf] }
0x16d2   : > { %v4117_v47 = vrot.slane %v4113_v45, 4  ;;  %v4118_v23 = vrot.slane %v4114_v1, 4  ;;  %v4087_v49 = vpop.permute.xlu1 %4086 }
0x16d3   : > { %v4068_v8 = vpop.permute.xlu0 %4067  ;;  %v4090_v10 = vsel %vm332_vm12, %v4085_v17, %v4087_v49  ;;  %v4091_v48 = vsel %vm332_vm12, %v4087_v49, %v4089_v27 }
0x16d4   : > { %4121 = vst [vmem:[#allocation3 + $0x10] sm:$0xf0] %v4117_v47  ;;  %4122 = vst [vmem:[#allocation3 + $0x18] sm:$0xf0] %v4118_v23  ;;  %v4073_v50 = vsel %vm310_vm8, %v4068_v8, %v4070_v25  ;;  %v4094_v51 = vsel %vm267_vm11, %v4090_v10, 0.0  ;;  %v4095_v54 = vsel %vm268_vm13, %v4091_v48, 0.0 }
0x16d5   : > { %4077 = vst [vmem:[#allocation3] sm:$0xf0] %v4073_v50  ;;  %4096 = vst [vmem:[#allocation3 + $0x10] sm:$0xf] %v4094_v51  ;;  %vm6106_vm8 = vcmask 908288   ;;  %v4658_v51 = vld [vmem:[%s4726_s23] sm:$0xff] }
0x16d6   : > { %4097 = vst [vmem:[#allocation3 + $0x18] sm:$0xf] %v4095_v54  ;;  %v4148_v55 = vpop.permute.xlu1 %4147  ;;  %vm6107_vm12 = vmmov %vm6106_vm8 }
0x16d7   : > { %v4173_v58 = vpop.permute.xlu0 %4172  ;;  %v4151_v59 = vsel %vm396_vm15, %v4146_v32, %v4148_v55  ;;  %v4152_v60 = vsel %vm396_vm15, %v4148_v55, %v4150_v28 }
0x16d8   : > { %v4176_v33 = vsel %vm6104_vm5, %v4171_v30, %v4173_v58  ;;  %v4177_v0 = vsel %vm6105_vm10, %v4173_v58, %v4175_v22  ;;  %v4155_v56 = vsel %vm267_vm11, %v4151_v59, 0.0  ;;  %v4156_v38 = vsel %vm268_vm13, %v4152_v60, 0.0 }
0x16d9   : > { %v4180_v46 = vsel %vm257_vm6, %v4176_v33, 0.0  ;;  %v4181_v39 = vsel %vm258_vm7, %v4177_v0, 0.0  ;;  %v4159_v24 = vrot.slane %v4155_v56, 4  ;;  %v4160_v61 = vrot.slane %v4156_v38, 4  ;;  %vm6108_vm6 = vmmov %vm6100_vm4 }
0x16da   : > { %4182 = vst [vmem:[#allocation3 + $0x30] sm:$0xf] %v4180_v46  ;;  %4183 = vst [vmem:[#allocation3 + $0x38] sm:$0xf] %v4181_v39  ;;  %v4129_v3 = vpop.permute.xlu1 %4128 }
0x16db   : > { %v4131_v4 = vpop.permute.xlu0 %4130  ;;  %4163 = vst [vmem:[#allocation3 + $0x20] sm:$0xf0] %v4159_v24  ;;  %4164 = vst [vmem:[#allocation3 + $0x28] sm:$0xf0] %v4160_v61 }
0x16dc   : > { %v4134_v7 = vsel %vm6106_vm8, %v4129_v3, %v4131_v4  ;;  %v4135_v13 = vsel %vm6107_vm12, %v4131_v4, %v4133_v2  ;;  %v4223_v14 = vld [vmem:[#allocation3] sm:$0xff]  ;;  %v4225_v16 = vld [vmem:[#allocation3 + $0x10] sm:$0xff]  ;;  %vm6109_vm7 = vmmov %vm6100_vm4 }
0x16dd   : > { %4138 = vst [vmem:[#allocation3 + $0x20] sm:$0xf] %v4134_v7  ;;  %4139 = vst [vmem:[#allocation3 + $0x28] sm:$0xf] %v4135_v13  ;;  %v4226_v15 = vld [vmem:[#allocation3 + $0x18] sm:$0xff]  ;;  %v4577_v57 = vpack.c.bf16 %v4225_v16, %v4223_v14 }
0x16de   : > { %v4575_v12 = vpack.c.bf16 %v4226_v15, %v4224_v11  ;;  %v4210_v18 = vpop.permute.xlu1 %4209 }
0x16df   : > { %v4191_v21 = vpop.permute.xlu0 %4190 }
0x16e0   : > { %v4196_v26 = vsel %vm443_vm9, %v4191_v21, %v4193_v37  ;;  %4576 = vmatprep.subr.bf16.mxu0 %v4575_v12 }
0x16e1   : > { %4200 = vst [vmem:[#allocation3 + $0x30] sm:$0xf0] %v4196_v26  ;;  %4578 = vmatpush1.bf16.msra.mxu0 %v4577_v57  ;;  %v4230_v30 = vld [vmem:[#allocation3 + $0x38] sm:$0xff] }
0x16e2   : > { %v4208_v27 = vpop.permute.xlu1 %4207 }
0x16e3   : > { %v4212_v22 = vpop.permute.xlu0 %4211  ;;  %v4213_v28 = vsel %vm6108_vm6, %v4208_v27, %v4210_v18 }
0x16e4   : > { %v4214_v2 = vsel %vm6109_vm7, %v4210_v18, %v4212_v22  ;;  %v4228_v29 = vld [vmem:[#allocation3 + $0x28] sm:$0xff]  ;;  %v4217_v25 = vsel %vm267_vm11, %v4213_v28, 0.0  ;;  %v4227_v35 = vld [vmem:[#allocation3 + $0x20] sm:$0xff] }
0x16e5   : > { %v4218_v31 = vsel %vm268_vm13, %v4214_v2, 0.0  ;;  %v4579_v17 = vpack.c.bf16 %v4230_v30, %v4228_v29  ;;  %4219 = vst [vmem:[#allocation3 + $0x40] sm:$0xf] %v4217_v25 }
0x16e6   : > { %4220 = vst [vmem:[#allocation3 + $0x48] sm:$0xf] %v4218_v31 }
0x16e7   : > { %4580 = vmatprep.subr.bf16.mxu0 %v4579_v17 }
0x16e8   : > { %v4229_v20 = vld [vmem:[#allocation3 + $0x30] sm:$0xff] }
0x16e9   : > { %v4581_v32 = vpack.c.bf16 %v4229_v20, %v4227_v35 }
0x16eb   : > { %4582 = vmatpush1.bf16.msra.mxu0 %v4581_v32 }
0x16ec   : > { %v4231_v37 = vld [vmem:[#allocation3 + $0x40] sm:$0xf] }
0x16ed   : > { %v4232_v36 = vld [vmem:[#allocation3 + $0x48] sm:$0xf] }
0x16ee   : > { %4464 = vmatprep.subr.msk.mxu0 %vm491_vm2, %v4232_v36 }
0x16ef   : > { %4465 = vmatpush1.msk.msra.mxu0 %vm491_vm2, %v4231_v37 }
0x16f0   : > { %4466 = vmatmul.mubr.msk.f32.vlgmr.msra.gmra.mrb[14].mxu0 %vm487_vm1, %v4462_v40 }
0x16f3   : > { %v3124_v42 = vpop.permute.xlu1 %3123 }
0x16f4   : > { %v3681_v44 = vpop.permute.xlu0 %3680  ;;  %v3202_v41 = vadd.f32 %v5937_v5, %v3124_v42  ;;  %v3204_v43 = vadd.f32 %v5941_v9, %v3124_v42 }
0x16f5   : > { %v3759_v45 = vadd.f32 %v5949_v19, %v3681_v44  ;;  %v3761_v1 = vadd.f32 %v5954_v6, %v3681_v44 }
0x16f6   : > { %v3206_v47 = vadd.f32 %v3202_v41, %v5467_v52  ;;  %v3207_v23 = vadd.f32 %v3204_v43, %v5470_v53 }
0x16f7   : > { %v3763_v49 = vadd.f32 %v3759_v45, %v5295_v62  ;;  %v3764_v8 = vadd.f32 %v3761_v1, %v5297_v63 }
0x16f8   : > { %4322 = vst [vmem:[%s224_s10] sm:$0xf] %v3206_v47  ;;  %4323 = vst [vmem:[%s224_s10 + $0x8] sm:$0xf] %v3207_v23  ;;  %v4238_v19 = vpop.permute.xlu0 %4237 }
0x16f9   : > { %v4326_v5 = vrot.slane %v3763_v49, 4  ;;  %v4327_v9 = vrot.slane %v3764_v8, 4 }
0x16fb   : > { %4330 = vst [vmem:[%s224_s10] sm:$0xf0] %v4326_v5  ;;  %4331 = vst [vmem:[%s224_s10 + $0x8] sm:$0xf0] %v4327_v9 }
0x17c3   : > { %v4315_v6 = vpop.f32.mrb[14].mxu0 }
0x17c4   : > { %v4316_v10 = vadd.f32 %v4315_v6, %v4238_v19  ;;  %v4317_v48 = vpop.f32.mrb[15].mxu0 }
0x17c5   : > { %v4318_v50 = vadd.f32 %v4317_v48, %v4238_v19 }
0x17c6   : > { %v4320_v54 = vadd.f32 %v4658_v51, %v4316_v10 }
0x17c7   : > { %v4321_v52 = vadd.f32 %v4318_v50, %v4930_v34 }
0x17c8   : > { %4332 = vst [vmem:[%s224_s10 + $0x10] sm:$0xf] %v4320_v54 }
0x17c9   : > { %4333 = vst [vmem:[%s224_s10 + $0x18] sm:$0xf] %v4321_v52 }
0x17ca PF: > { %s15_s18 = sadd.s32 1, %s4665_s18  }
0x17cb   : > { %p12_p4 = scmp.ge.s32.totalorder %s15_s18, 4  }
0x17cd   :  { %14 = sbr.rel (!%p12_p4) target bundleno = 1 (0x1), region = 96 }

</bundles_post_ra>
